<compile_context>
chip_gen: v6e
topology: v6e:2x2x1
jax: 0.10.0
libtpu: 0.0.40
codegen_flags: <defaults>
</compile_context>

<pallas_src>
import functools

import jax
import jax.numpy as jnp
from jax.experimental import pallas as pl
from jax.experimental.pallas import tpu as pltpu

_VMEM_LIMIT = 32 * 1024 * 1024  # raise v5e's 16 MiB default; safe on v6e/v7x
_EPS = 1e-5


# ----------------------------------------------------------------------------
# Pallas kernels
# ----------------------------------------------------------------------------
def _mm_bias_act_kernel(x_ref, w_ref, b_ref, o_ref, acc_ref, *, act):
    """Tiled o = act(x @ w + b); grid (M/tm, N/tn, K/tk), fp32 accumulator."""
    k = pl.program_id(2)

    @pl.when(k == 0)
    def _():
        acc_ref[...] = jnp.zeros_like(acc_ref)

    acc_ref[...] += jnp.dot(x_ref[...], w_ref[...],
                            preferred_element_type=jnp.float32)

    @pl.when(k == pl.num_programs(2) - 1)
    def _():
        y = acc_ref[...] + b_ref[...]
        if act == "leaky":
            y = jnp.where(y >= 0.0, y, 0.2 * y)
        elif act == "sigmoid":
            y = jax.nn.sigmoid(y)
        o_ref[...] = y.astype(o_ref.dtype)


def _conv_in_leaky_kernel(x_ref, w_ref, b_ref, o_ref, acc_ref):
    """Per-batch conv-matmul with fused InstanceNorm2d + LeakyReLU(0.2).

    Grid (B, K/tk).  x:(1,HW,tk) bf16, w:(tk,C) bf16, b:(1,C) f32,
    o:(1,HW,C), acc:(HW,C) f32.  Stats over the HW axis on the last K step
    (matches torch InstanceNorm2d defaults: affine=False, eps=1e-5, biased var).
    """
    k = pl.program_id(1)

    @pl.when(k == 0)
    def _():
        acc_ref[...] = jnp.zeros_like(acc_ref)

    acc_ref[...] += jnp.dot(x_ref[0], w_ref[...],
                            preferred_element_type=jnp.float32)

    @pl.when(k == pl.num_programs(1) - 1)
    def _():
        y = acc_ref[...] + b_ref[...]                       # (HW, C), fp32
        mean = jnp.mean(y, axis=0, keepdims=True)           # (1, C)
        var = jnp.mean((y - mean) ** 2, axis=0, keepdims=True)
        y = (y - mean) * jax.lax.rsqrt(var + _EPS)
        y = jnp.where(y >= 0.0, y, 0.2 * y)
        o_ref[0] = y.astype(o_ref.dtype)


# ----------------------------------------------------------------------------
# Helpers
# ----------------------------------------------------------------------------
def _round_up(x, m):
    return ((x + m - 1) // m) * m


def _pick_tile(dim, preferred, align):
    """Largest tile <= preferred that divides dim and is a multiple of align;
    falls back to the full dim (always a legal block)."""
    if dim <= preferred:
        return dim
    t = (preferred // align) * align
    while t >= align:
        if dim % t == 0:
            return t
        t -= align
    return dim


def _im2col(x_nhwc, k, stride, pad):
    """Extract (k x k) patches in bf16.  pad = ((top,bottom),(left,right)).

    Returns (N, Ho, Wo, k*k*C) with K-axis ordering (kh, kw, cin).
    """
    x = jnp.pad(x_nhwc.astype(jnp.bfloat16), ((0, 0), pad[0], pad[1], (0, 0)))
    N, H, W, C = x.shape
    Ho = (H - k) // stride + 1
    Wo = (W - k) // stride + 1
    taps = []
    for di in range(k):
        for dj in range(k):
            taps.append(x[:, di:di + stride * Ho:stride,
                          dj:dj + stride * Wo:stride, :])
    p = jnp.stack(taps, axis=3)                  # (N, Ho, Wo, k*k, C)
    return p.reshape(N, Ho, Wo, k * k * C)


def _weight_matrix(w_oihw):
    """(Cout, Cin, KH, KW) -> bf16 (KH*KW*Cin, Cout), matching im2col K order."""
    Cout, Cin, KH, KW = w_oihw.shape
    w = jnp.transpose(w_oihw, (2, 3, 1, 0)).reshape(KH * KW * Cin, Cout)
    return w.astype(jnp.bfloat16)


# ----------------------------------------------------------------------------
# Pallas-call wrappers
# ----------------------------------------------------------------------------
def _matmul_bias_act(x, w, b, act, out_dtype):
    """act(x @ w + b).  x:(M,K) bf16, w:(K,N) bf16, b:(N,) f32."""
    M, K = x.shape
    Kw, N = w.shape
    assert K == Kw and K % 128 == 0 and N % 128 == 0

    tm = _pick_tile(M, 256, 8)
    tn = _pick_tile(N, 256, 128)
    tk = _pick_tile(K, 512, 128)
    grid = (M // tm, N // tn, K // tk)

    cost = pl.CostEstimate(
        flops=2 * M * N * K,
        transcendentals=M * N if act == "sigmoid" else 0,
        bytes_accessed=(M * K + K * N) * 2 + M * N * jnp.dtype(out_dtype).itemsize,
    )
    kernel = functools.partial(_mm_bias_act_kernel, act=act)
    return pl.pallas_call(
        kernel,
        out_shape=jax.ShapeDtypeStruct((M, N), out_dtype),
        grid=grid,
        in_specs=[
            pl.BlockSpec((tm, tk), lambda i, j, k: (i, k)),
            pl.BlockSpec((tk, tn), lambda i, j, k: (k, j)),
            pl.BlockSpec((1, tn), lambda i, j, k: (0, j)),
        ],
        out_specs=pl.BlockSpec((tm, tn), lambda i, j, k: (i, j)),
        scratch_shapes=[pltpu.VMEM((tm, tn), jnp.float32)],
        compiler_params=pltpu.CompilerParams(
            dimension_semantics=("parallel", "parallel", "arbitrary"),
            vmem_limit_bytes=_VMEM_LIMIT),
        cost_estimate=cost,
    )(x, w, b.reshape(1, N).astype(jnp.float32))


def _conv_instnorm_leaky_matmul(patches, w, b, out_dtype=jnp.bfloat16):
    """Fused conv-matmul + InstanceNorm + LeakyReLU.

    patches:(B,HW,K) bf16, w:(K,C) bf16, b:(C,) f32 -> (B,HW,C) out_dtype.
    """
    B, HW, K = patches.shape
    Kw, C = w.shape
    assert K == Kw and K % 128 == 0 and C % 128 == 0

    tk = _pick_tile(K, 512, 128)
    grid = (B, K // tk)

    cost = pl.CostEstimate(
        flops=2 * B * HW * C * K,
        transcendentals=0,
        bytes_accessed=(B * HW * K + B * K * C) * 2
        + B * HW * C * jnp.dtype(out_dtype).itemsize,
    )
    return pl.pallas_call(
        _conv_in_leaky_kernel,
        out_shape=jax.ShapeDtypeStruct((B, HW, C), out_dtype),
        grid=grid,
        in_specs=[
            pl.BlockSpec((1, HW, tk), lambda bi, k: (bi, 0, k)),
            pl.BlockSpec((tk, C), lambda bi, k: (k, 0)),
            pl.BlockSpec((1, C), lambda bi, k: (0, 0)),
        ],
        out_specs=pl.BlockSpec((1, HW, C), lambda bi, k: (bi, 0, 0)),
        scratch_shapes=[pltpu.VMEM((HW, C), jnp.float32)],
        compiler_params=pltpu.CompilerParams(
            dimension_semantics=("parallel", "arbitrary"),
            vmem_limit_bytes=_VMEM_LIMIT),
        cost_estimate=cost,
    )(patches, w, b.astype(jnp.float32).reshape(1, C))


# ----------------------------------------------------------------------------
# Layer wrappers
# ----------------------------------------------------------------------------
def _conv_leaky_layer1(x_nhwc, w_oihw, b):
    """Conv2d(C,64,4,s=2,p=1) + LeakyReLU.  K (=48) and Cout (=64) padded to 128."""
    Cout = w_oihw.shape[0]
    KH = w_oihw.shape[2]
    patches = _im2col(x_nhwc, KH, 2, ((1, 1), (1, 1)))          # (N,Ho,Wo,K)
    N, Ho, Wo, K = patches.shape
    Kp = _round_up(K, 128)
    Np = _round_up(Cout, 128)

    x2d = patches.reshape(N * Ho * Wo, K)
    if Kp != K:
        x2d = jnp.pad(x2d, ((0, 0), (0, Kp - K)))
    w_mat = jnp.pad(_weight_matrix(w_oihw), ((0, Kp - K), (0, Np - Cout)))
    b_pad = jnp.pad(b, (0, Np - Cout))

    y = _matmul_bias_act(x2d, w_mat, b_pad, act="leaky", out_dtype=jnp.bfloat16)
    return y.reshape(N, Ho, Wo, Np)[..., :Cout]


def _conv_in_leaky(x_nhwc, w_oihw, b):
    """Conv2d(4,s=2,p=1) with fused InstanceNorm2d + LeakyReLU epilogue."""
    Cout = w_oihw.shape[0]
    KH = w_oihw.shape[2]
    patches = _im2col(x_nhwc, KH, 2, ((1, 1), (1, 1)))          # (N,Ho,Wo,K)
    N, Ho, Wo, K = patches.shape
    y = _conv_instnorm_leaky_matmul(patches.reshape(N, Ho * Wo, K),
                                    _weight_matrix(w_oihw), b)
    return y.reshape(N, Ho, Wo, Cout)


def _conv_sigmoid_final(x_nhwc, w_oihw, b):
    """ZeroPad2d((1,0,1,0)) + Conv2d(512,1,4,p=1) + Sigmoid.

    Cout=1 is padded to 128 lanes (lane-dense stores), sliced afterwards.
    """
    Cout = w_oihw.shape[0]
    KH = w_oihw.shape[2]
    # ZeroPad2d(left=1,right=0,top=1,bottom=0) followed by conv padding=1:
    # total padding = ((2,1),(2,1)).
    patches = _im2col(x_nhwc, KH, 1, ((2, 1), (2, 1)))
    N, Ho, Wo, K = patches.shape
    assert K % 128 == 0
    Np = 128
    w_mat = jnp.pad(_weight_matrix(w_oihw), ((0, 0), (0, Np - Cout)))
    b_pad = jnp.pad(b, (0, Np - Cout))

    x2d = patches.reshape(N * Ho * Wo, K)
    y = _matmul_bias_act(x2d, w_mat, b_pad, act="sigmoid", out_dtype=jnp.float32)
    return y.reshape(N, Ho, Wo, Np)[..., :Cout]


# ----------------------------------------------------------------------------
# Parameter init (deterministic, synthetic)
# ----------------------------------------------------------------------------
def init_params(key, in_channels):
    shapes = {
        "w1": (64, in_channels, 4, 4), "b1": (64,),
        "w2": (128, 64, 4, 4),          "b2": (128,),
        "w3": (256, 128, 4, 4),         "b3": (256,),
        "w4": (512, 256, 4, 4),         "b4": (512,),
        "w5": (1, 512, 4, 4),           "b5": (1,),
    }
    params = {}
    keys = jax.random.split(key, len(shapes))
    for k_, (name, shp) in zip(keys, sorted(shapes.items())):
        params[name] = 0.05 * jax.random.normal(k_, shp, dtype=jnp.float32)
    return params


# ----------------------------------------------------------------------------
# Forward pass
# ----------------------------------------------------------------------------
def discriminator_forward(img_nchw, params):
    x = jnp.transpose(img_nchw, (0, 2, 3, 1)).astype(jnp.float32)  # NCHW -> NHWC

    # block 1: conv s2 p1 + LeakyReLU (no norm)
    x = _conv_leaky_layer1(x, params["w1"], params["b1"])
    # blocks 2-4: conv s2 p1 with fused InstanceNorm2d + LeakyReLU
    for i in (2, 3, 4):
        x = _conv_in_leaky(x, params[f"w{i}"], params[f"b{i}"])
    # final: ZeroPad2d + conv p1 s1 + Sigmoid
    x = _conv_sigmoid_final(x, params["w5"], params["b5"])

    return jnp.transpose(x, (0, 3, 1, 2))  # NHWC -> NCHW


# ----------------------------------------------------------------------------
if __name__ == "__main__":
    B, C, H, W = 2, 3, 32, 32   # small but deep enough for 4 stride-2 stages
    key = jax.random.PRNGKey(0)
    k_img, k_par = jax.random.split(key)
    img = jax.random.normal(k_img, (B, C, H, W), dtype=jnp.float32)
    params = init_params(k_par, C)

    out = jax.jit(discriminator_forward)(img, params)
    out = jax.block_until_ready(out)

    expected_shape = (B, 1, H // 2 ** 4, W // 2 ** 4)
    assert out.shape == expected_shape, (out.shape, expected_shape)
    assert bool(jnp.all(jnp.isfinite(out)))
    assert bool(jnp.all((out >= 0.0) & (out <= 1.0)))  # sigmoid range
    print("KERNEL_OK")
</pallas_src>

<mosaic_0001>
module attributes {stable_mosaic.version = 11 : i64} {
  func.func @_mm_bias_act_kernel(%arg0: i32, %arg1: i32, %arg2: i32, %arg3: memref<256x128xbf16, #tpu.memory_space<vmem>>, %arg4: memref<128x128xbf16, #tpu.memory_space<vmem>>, %arg5: memref<1x128xf32, #tpu.memory_space<vmem>>, %arg6: memref<256x128xbf16, #tpu.memory_space<vmem>>, %arg7: memref<256x128xf32, #tpu.memory_space<vmem>>) attributes {dimension_semantics = [#tpu.dimension_semantics<parallel>, #tpu.dimension_semantics<parallel>, #tpu.dimension_semantics<arbitrary>], iteration_bounds = array<i64: 2, 1, 1>, scalar_prefetch = 0 : i64, scratch_operands = 1 : i64, tpu.core_type = #tpu.core_type<tc>, window_params = [{transform_indices = @transform_0, window_bounds = array<i64: 256, 128>}, {transform_indices = @transform_1, window_bounds = array<i64: 128, 128>}, {transform_indices = @transform_2, window_bounds = array<i64: 1, 128>}, {transform_indices = @transform_3, window_bounds = array<i64: 256, 128>}]} {
    %c0_i32 = arith.constant 0 : i32
    %0 = arith.cmpi eq, %arg2, %c0_i32 : i32
    %1 = arith.extui %0 : i1 to i32
    %c0_i32_0 = arith.constant 0 : i32
    %2 = arith.cmpi ne, %1, %c0_i32_0 : i32
    scf.if %2 {
      %cst_10 = arith.constant 0.000000e+00 : f32
      %12 = vector.broadcast %cst_10 : f32 to vector<256x128xf32>
      %c0_11 = arith.constant 0 : index
      %c0_12 = arith.constant 0 : index
      %13 = vector.load %arg7[%c0_11, %c0_12] : memref<256x128xf32, #tpu.memory_space<vmem>>, vector<256x128xf32>
      tpu.vector_store %arg7[%c0_11, %c0_12], %12 {strides = array<i32>} : memref<256x128xf32, #tpu.memory_space<vmem>>, vector<256x128xf32>,
    } else {
    }
    %c0 = arith.constant 0 : index
    %c0_1 = arith.constant 0 : index
    %3 = vector.load %arg7[%c0, %c0_1] : memref<256x128xf32, #tpu.memory_space<vmem>>, vector<256x128xf32>
    %c0_2 = arith.constant 0 : index
    %c0_3 = arith.constant 0 : index
    %4 = vector.load %arg3[%c0_2, %c0_3] : memref<256x128xbf16, #tpu.memory_space<vmem>>, vector<256x128xbf16>
    %c0_4 = arith.constant 0 : index
    %c0_5 = arith.constant 0 : index
    %5 = vector.load %arg4[%c0_4, %c0_5] : memref<128x128xbf16, #tpu.memory_space<vmem>>, vector<128x128xbf16>
    %cst = arith.constant dense<0.000000e+00> : vector<256x128xf32>
    %6 = tpu.matmul %4, %5, %cst {dimension_numbers = #tpu.dot_dimension_numbers<[1], [0], [0], [1], [0, 0, 1, 1], [], []>} : vector<256x128xbf16>, vector<128x128xbf16>, vector<256x128xf32> -> vector<256x128xf32>
    %7 = arith.addf %3, %6 : vector<256x128xf32>
    %c0_6 = arith.constant 0 : index
    %c0_7 = arith.constant 0 : index
    %8 = vector.load %arg7[%c0_6, %c0_7] : memref<256x128xf32, #tpu.memory_space<vmem>>, vector<256x128xf32>
    tpu.vector_store %arg7[%c0_6, %c0_7], %7 {strides = array<i32>} : memref<256x128xf32, #tpu.memory_space<vmem>>, vector<256x128xf32>,
    %c0_i32_8 = arith.constant 0 : i32
    %9 = arith.cmpi eq, %arg2, %c0_i32_8 : i32
    %10 = arith.extui %9 : i1 to i32
    %c0_i32_9 = arith.constant 0 : i32
    %11 = arith.cmpi ne, %10, %c0_i32_9 : i32
    scf.if %11 {
      %c0_10 = arith.constant 0 : index
      %c0_11 = arith.constant 0 : index
      %12 = vector.load %arg7[%c0_10, %c0_11] : memref<256x128xf32, #tpu.memory_space<vmem>>, vector<256x128xf32>
      %c0_12 = arith.constant 0 : index
      %c0_13 = arith.constant 0 : index
      %13 = vector.load %arg5[%c0_12, %c0_13] : memref<1x128xf32, #tpu.memory_space<vmem>>, vector<1x128xf32>
      %14 = vector.broadcast %13 : vector<1x128xf32> to vector<256x128xf32>
      %15 = arith.addf %12, %14 : vector<256x128xf32>
      %cst_14 = arith.constant 0.000000e+00 : f32
      %16 = vector.broadcast %cst_14 : f32 to vector<256x128xf32>
      %17 = arith.cmpf oge, %15, %16 : vector<256x128xf32>
      %cst_15 = arith.constant 2.000000e-01 : f32
      %18 = vector.broadcast %cst_15 : f32 to vector<256x128xf32>
      %19 = arith.mulf %18, %15 : vector<256x128xf32>
      %20 = arith.select %17, %15, %19 : vector<256x128xi1>, vector<256x128xf32>
      %21 = arith.truncf %20 : vector<256x128xf32> to vector<256x128xbf16>
      %c0_16 = arith.constant 0 : index
      %c0_17 = arith.constant 0 : index
      %22 = vector.load %arg6[%c0_16, %c0_17] : memref<256x128xbf16, #tpu.memory_space<vmem>>, vector<256x128xbf16>
      tpu.vector_store %arg6[%c0_16, %c0_17], %21 {strides = array<i32>} : memref<256x128xbf16, #tpu.memory_space<vmem>>, vector<256x128xbf16>,
    } else {
    }
    return
  }
  func.func @transform_0(%arg0: i32, %arg1: i32, %arg2: i32) -> (i32, i32) {
    %c0_i32 = arith.constant 0 : i32
    return %arg0, %arg2 : i32, i32
  }
  func.func @transform_1(%arg0: i32, %arg1: i32, %arg2: i32) -> (i32, i32) {
    %c0_i32 = arith.constant 0 : i32
    return %arg2, %arg1 : i32, i32
  }
  func.func @transform_2(%arg0: i32, %arg1: i32, %arg2: i32) -> (i32, i32) {
    %c0_i32 = arith.constant 0 : i32
    %c0_i32_0 = arith.constant 0 : i32
    return %c0_i32, %arg1 : i32, i32
  }
  func.func @transform_3(%arg0: i32, %arg1: i32, %arg2: i32) -> (i32, i32) {
    %c0_i32 = arith.constant 0 : i32
    return %arg0, %arg1 : i32, i32
  }
}

module attributes {stable_mosaic.version = 11 : i64} {
  func.func @_conv_in_leaky_kernel(%arg0: i32, %arg1: i32, %arg2: memref<1x64x512xbf16, #tpu.memory_space<vmem>>, %arg3: memref<512x128xbf16, #tpu.memory_space<vmem>>, %arg4: memref<1x128xf32, #tpu.memory_space<vmem>>, %arg5: memref<1x64x128xbf16, #tpu.memory_space<vmem>>, %arg6: memref<64x128xf32, #tpu.memory_space<vmem>>) attributes {dimension_semantics = [#tpu.dimension_semantics<parallel>, #tpu.dimension_semantics<arbitrary>], iteration_bounds = array<i64: 2, 2>, scalar_prefetch = 0 : i64, scratch_operands = 1 : i64, tpu.core_type = #tpu.core_type<tc>, window_params = [{transform_indices = @transform_0, window_bounds = array<i64: 1, 64, 512>}, {transform_indices = @transform_1, window_bounds = array<i64: 512, 128>}, {pipeline_mode = #tpu.pipeline_mode<synchronous>, transform_indices = @transform_2, window_bounds = array<i64: 1, 128>}, {transform_indices = @transform_3, window_bounds = array<i64: 1, 64, 128>}]} {
    %c0_i32 = arith.constant 0 : i32
    %0 = arith.cmpi eq, %arg1, %c0_i32 : i32
    %1 = arith.extui %0 : i1 to i32
    %c0_i32_0 = arith.constant 0 : i32
    %2 = arith.cmpi ne, %1, %c0_i32_0 : i32
    scf.if %2 {
      %cst_10 = arith.constant 0.000000e+00 : f32
      %13 = vector.broadcast %cst_10 : f32 to vector<64x128xf32>
      %c0_11 = arith.constant 0 : index
      %c0_12 = arith.constant 0 : index
      %14 = vector.load %arg6[%c0_11, %c0_12] : memref<64x128xf32, #tpu.memory_space<vmem>>, vector<64x128xf32>
      tpu.vector_store %arg6[%c0_11, %c0_12], %13 {strides = array<i32>} : memref<64x128xf32, #tpu.memory_space<vmem>>, vector<64x128xf32>,
    } else {
    }
    %c0 = arith.constant 0 : index
    %c0_1 = arith.constant 0 : index
    %3 = vector.load %arg6[%c0, %c0_1] : memref<64x128xf32, #tpu.memory_space<vmem>>, vector<64x128xf32>
    %c0_2 = arith.constant 0 : index
    %c0_3 = arith.constant 0 : index
    %c0_4 = arith.constant 0 : index
    %4 = vector.load %arg2[%c0_2, %c0_3, %c0_4] : memref<1x64x512xbf16, #tpu.memory_space<vmem>>, vector<1x64x512xbf16>
    %5 = vector.shape_cast %4 : vector<1x64x512xbf16> to vector<64x512xbf16>
    %c0_5 = arith.constant 0 : index
    %c0_6 = arith.constant 0 : index
    %6 = vector.load %arg3[%c0_5, %c0_6] : memref<512x128xbf16, #tpu.memory_space<vmem>>, vector<512x128xbf16>
    %cst = arith.constant dense<0.000000e+00> : vector<64x128xf32>
    %7 = tpu.matmul %5, %6, %cst {dimension_numbers = #tpu.dot_dimension_numbers<[1], [0], [0], [1], [0, 0, 1, 1], [], []>} : vector<64x512xbf16>, vector<512x128xbf16>, vector<64x128xf32> -> vector<64x128xf32>
    %8 = arith.addf %3, %7 : vector<64x128xf32>
    %c0_7 = arith.constant 0 : index
    %c0_8 = arith.constant 0 : index
    %9 = vector.load %arg6[%c0_7, %c0_8] : memref<64x128xf32, #tpu.memory_space<vmem>>, vector<64x128xf32>
    tpu.vector_store %arg6[%c0_7, %c0_8], %8 {strides = array<i32>} : memref<64x128xf32, #tpu.memory_space<vmem>>, vector<64x128xf32>,
    %c1_i32 = arith.constant 1 : i32
    %10 = arith.cmpi eq, %arg1, %c1_i32 : i32
    %11 = arith.extui %10 : i1 to i32
    %c0_i32_9 = arith.constant 0 : i32
    %12 = arith.cmpi ne, %11, %c0_i32_9 : i32
    scf.if %12 {
      %c0_10 = arith.constant 0 : index
      %c0_11 = arith.constant 0 : index
      %13 = vector.load %arg6[%c0_10, %c0_11] : memref<64x128xf32, #tpu.memory_space<vmem>>, vector<64x128xf32>
      %c0_12 = arith.constant 0 : index
      %c0_13 = arith.constant 0 : index
      %14 = vector.load %arg4[%c0_12, %c0_13] : memref<1x128xf32, #tpu.memory_space<vmem>>, vector<1x128xf32>
      %15 = vector.broadcast %14 : vector<1x128xf32> to vector<64x128xf32>
      %16 = arith.addf %13, %15 : vector<64x128xf32>
      %cst_14 = arith.constant dense<0.000000e+00> : vector<128xf32>
      %17 = vector.multi_reduction <add>, %16, %cst_14 [0] : vector<64x128xf32> to vector<128xf32>
      %18 = vector.shape_cast %17 : vector<128xf32> to vector<1x128xf32>
      %cst_15 = arith.constant 6.400000e+01 : f32
      %19 = vector.broadcast %cst_15 : f32 to vector<1x128xf32>
      %20 = arith.divf %18, %19 : vector<1x128xf32>
      %21 = vector.broadcast %20 : vector<1x128xf32> to vector<64x128xf32>
      %22 = arith.subf %16, %21 : vector<64x128xf32>
      %23 = arith.mulf %22, %22 : vector<64x128xf32>
      %cst_16 = arith.constant dense<0.000000e+00> : vector<128xf32>
      %24 = vector.multi_reduction <add>, %23, %cst_16 [0] : vector<64x128xf32> to vector<128xf32>
      %25 = vector.shape_cast %24 : vector<128xf32> to vector<1x128xf32>
      %cst_17 = arith.constant 6.400000e+01 : f32
      %26 = vector.broadcast %cst_17 : f32 to vector<1x128xf32>
      %27 = arith.divf %25, %26 : vector<1x128xf32>
      %28 = vector.broadcast %20 : vector<1x128xf32> to vector<64x128xf32>
      %29 = arith.subf %16, %28 : vector<64x128xf32>
      %cst_18 = arith.constant 9.99999974E-6 : f32
      %30 = vector.broadcast %cst_18 : f32 to vector<1x128xf32>
      %31 = arith.addf %27, %30 : vector<1x128xf32>
      %32 = math.rsqrt %31 : vector<1x128xf32>
      %33 = vector.broadcast %32 : vector<1x128xf32> to vector<64x128xf32>
      %34 = arith.mulf %29, %33 : vector<64x128xf32>
      %cst_19 = arith.constant 0.000000e+00 : f32
      %35 = vector.broadcast %cst_19 : f32 to vector<64x128xf32>
      %36 = arith.cmpf oge, %34, %35 : vector<64x128xf32>
      %cst_20 = arith.constant 2.000000e-01 : f32
      %37 = vector.broadcast %cst_20 : f32 to vector<64x128xf32>
      %38 = arith.mulf %37, %34 : vector<64x128xf32>
      %39 = arith.select %36, %34, %38 : vector<64x128xi1>, vector<64x128xf32>
      %40 = arith.truncf %39 : vector<64x128xf32> to vector<64x128xbf16>
      %c0_21 = arith.constant 0 : index
      %c0_22 = arith.constant 0 : index
      %c0_23 = arith.constant 0 : index
      %41 = vector.load %arg5[%c0_21, %c0_22, %c0_23] : memref<1x64x128xbf16, #tpu.memory_space<vmem>>, vector<1x64x128xbf16>
      %42 = vector.shape_cast %41 : vector<1x64x128xbf16> to vector<64x128xbf16>
      %43 = vector.shape_cast %40 : vector<64x128xbf16> to vector<1x64x128xbf16>
      tpu.vector_store %arg5[%c0_21, %c0_22, %c0_23], %43 {strides = array<i32>} : memref<1x64x128xbf16, #tpu.memory_space<vmem>>, vector<1x64x128xbf16>,
    } else {
    }
    return
  }
  func.func @transform_0(%arg0: i32, %arg1: i32) -> (i32, i32, i32) {
    %c0_i32 = arith.constant 0 : i32
    %c0_i32_0 = arith.constant 0 : i32
    return %arg0, %c0_i32, %arg1 : i32, i32, i32
  }
  func.func @transform_1(%arg0: i32, %arg1: i32) -> (i32, i32) {
    %c0_i32 = arith.constant 0 : i32
    %c0_i32_0 = arith.constant 0 : i32
    return %arg1, %c0_i32 : i32, i32
  }
  func.func @transform_2(%arg0: i32, %arg1: i32) -> (i32, i32) {
    %c0_i32 = arith.constant 0 : i32
    %c0_i32_0 = arith.constant 0 : i32
    %c0_i32_1 = arith.constant 0 : i32
    return %c0_i32, %c0_i32_0 : i32, i32
  }
  func.func @transform_3(%arg0: i32, %arg1: i32) -> (i32, i32, i32) {
    %c0_i32 = arith.constant 0 : i32
    %c0_i32_0 = arith.constant 0 : i32
    %c0_i32_1 = arith.constant 0 : i32
    return %arg0, %c0_i32, %c0_i32_0 : i32, i32, i32
  }
}

module attributes {stable_mosaic.version = 11 : i64} {
  func.func @_conv_in_leaky_kernel(%arg0: i32, %arg1: i32, %arg2: memref<1x16x512xbf16, #tpu.memory_space<vmem>>, %arg3: memref<512x256xbf16, #tpu.memory_space<vmem>>, %arg4: memref<1x256xf32, #tpu.memory_space<vmem>>, %arg5: memref<1x16x256xbf16, #tpu.memory_space<vmem>>, %arg6: memref<16x256xf32, #tpu.memory_space<vmem>>) attributes {dimension_semantics = [#tpu.dimension_semantics<parallel>, #tpu.dimension_semantics<arbitrary>], iteration_bounds = array<i64: 2, 4>, scalar_prefetch = 0 : i64, scratch_operands = 1 : i64, tpu.core_type = #tpu.core_type<tc>, window_params = [{transform_indices = @transform_0, window_bounds = array<i64: 1, 16, 512>}, {transform_indices = @transform_1, window_bounds = array<i64: 512, 256>}, {pipeline_mode = #tpu.pipeline_mode<synchronous>, transform_indices = @transform_2, window_bounds = array<i64: 1, 256>}, {transform_indices = @transform_3, window_bounds = array<i64: 1, 16, 256>}]} {
    %c0_i32 = arith.constant 0 : i32
    %0 = arith.cmpi eq, %arg1, %c0_i32 : i32
    %1 = arith.extui %0 : i1 to i32
    %c0_i32_0 = arith.constant 0 : i32
    %2 = arith.cmpi ne, %1, %c0_i32_0 : i32
    scf.if %2 {
      %cst_10 = arith.constant 0.000000e+00 : f32
      %13 = vector.broadcast %cst_10 : f32 to vector<16x256xf32>
      %c0_11 = arith.constant 0 : index
      %c0_12 = arith.constant 0 : index
      %14 = vector.load %arg6[%c0_11, %c0_12] : memref<16x256xf32, #tpu.memory_space<vmem>>, vector<16x256xf32>
      tpu.vector_store %arg6[%c0_11, %c0_12], %13 {strides = array<i32>} : memref<16x256xf32, #tpu.memory_space<vmem>>, vector<16x256xf32>,
    } else {
    }
    %c0 = arith.constant 0 : index
    %c0_1 = arith.constant 0 : index
    %3 = vector.load %arg6[%c0, %c0_1] : memref<16x256xf32, #tpu.memory_space<vmem>>, vector<16x256xf32>
    %c0_2 = arith.constant 0 : index
    %c0_3 = arith.constant 0 : index
    %c0_4 = arith.constant 0 : index
    %4 = vector.load %arg2[%c0_2, %c0_3, %c0_4] : memref<1x16x512xbf16, #tpu.memory_space<vmem>>, vector<1x16x512xbf16>
    %5 = vector.shape_cast %4 : vector<1x16x512xbf16> to vector<16x512xbf16>
    %c0_5 = arith.constant 0 : index
    %c0_6 = arith.constant 0 : index
    %6 = vector.load %arg3[%c0_5, %c0_6] : memref<512x256xbf16, #tpu.memory_space<vmem>>, vector<512x256xbf16>
    %cst = arith.constant dense<0.000000e+00> : vector<16x256xf32>
    %7 = tpu.matmul %5, %6, %cst {dimension_numbers = #tpu.dot_dimension_numbers<[1], [0], [0], [1], [0, 0, 1, 1], [], []>} : vector<16x512xbf16>, vector<512x256xbf16>, vector<16x256xf32> -> vector<16x256xf32>
    %8 = arith.addf %3, %7 : vector<16x256xf32>
    %c0_7 = arith.constant 0 : index
    %c0_8 = arith.constant 0 : index
    %9 = vector.load %arg6[%c0_7, %c0_8] : memref<16x256xf32, #tpu.memory_space<vmem>>, vector<16x256xf32>
    tpu.vector_store %arg6[%c0_7, %c0_8], %8 {strides = array<i32>} : memref<16x256xf32, #tpu.memory_space<vmem>>, vector<16x256xf32>,
    %c3_i32 = arith.constant 3 : i32
    %10 = arith.cmpi eq, %arg1, %c3_i32 : i32
    %11 = arith.extui %10 : i1 to i32
    %c0_i32_9 = arith.constant 0 : i32
    %12 = arith.cmpi ne, %11, %c0_i32_9 : i32
    scf.if %12 {
      %c0_10 = arith.constant 0 : index
      %c0_11 = arith.constant 0 : index
      %13 = vector.load %arg6[%c0_10, %c0_11] : memref<16x256xf32, #tpu.memory_space<vmem>>, vector<16x256xf32>
      %c0_12 = arith.constant 0 : index
      %c0_13 = arith.constant 0 : index
      %14 = vector.load %arg4[%c0_12, %c0_13] : memref<1x256xf32, #tpu.memory_space<vmem>>, vector<1x256xf32>
      %15 = vector.broadcast %14 : vector<1x256xf32> to vector<16x256xf32>
      %16 = arith.addf %13, %15 : vector<16x256xf32>
      %cst_14 = arith.constant dense<0.000000e+00> : vector<256xf32>
      %17 = vector.multi_reduction <add>, %16, %cst_14 [0] : vector<16x256xf32> to vector<256xf32>
      %18 = vector.shape_cast %17 : vector<256xf32> to vector<1x256xf32>
      %cst_15 = arith.constant 1.600000e+01 : f32
      %19 = vector.broadcast %cst_15 : f32 to vector<1x256xf32>
      %20 = arith.divf %18, %19 : vector<1x256xf32>
      %21 = vector.broadcast %20 : vector<1x256xf32> to vector<16x256xf32>
      %22 = arith.subf %16, %21 : vector<16x256xf32>
      %23 = arith.mulf %22, %22 : vector<16x256xf32>
      %cst_16 = arith.constant dense<0.000000e+00> : vector<256xf32>
      %24 = vector.multi_reduction <add>, %23, %cst_16 [0] : vector<16x256xf32> to vector<256xf32>
      %25 = vector.shape_cast %24 : vector<256xf32> to vector<1x256xf32>
      %cst_17 = arith.constant 1.600000e+01 : f32
      %26 = vector.broadcast %cst_17 : f32 to vector<1x256xf32>
      %27 = arith.divf %25, %26 : vector<1x256xf32>
      %28 = vector.broadcast %20 : vector<1x256xf32> to vector<16x256xf32>
      %29 = arith.subf %16, %28 : vector<16x256xf32>
      %cst_18 = arith.constant 9.99999974E-6 : f32
      %30 = vector.broadcast %cst_18 : f32 to vector<1x256xf32>
      %31 = arith.addf %27, %30 : vector<1x256xf32>
      %32 = math.rsqrt %31 : vector<1x256xf32>
      %33 = vector.broadcast %32 : vector<1x256xf32> to vector<16x256xf32>
      %34 = arith.mulf %29, %33 : vector<16x256xf32>
      %cst_19 = arith.constant 0.000000e+00 : f32
      %35 = vector.broadcast %cst_19 : f32 to vector<16x256xf32>
      %36 = arith.cmpf oge, %34, %35 : vector<16x256xf32>
      %cst_20 = arith.constant 2.000000e-01 : f32
      %37 = vector.broadcast %cst_20 : f32 to vector<16x256xf32>
      %38 = arith.mulf %37, %34 : vector<16x256xf32>
      %39 = arith.select %36, %34, %38 : vector<16x256xi1>, vector<16x256xf32>
      %40 = arith.truncf %39 : vector<16x256xf32> to vector<16x256xbf16>
      %c0_21 = arith.constant 0 : index
      %c0_22 = arith.constant 0 : index
      %c0_23 = arith.constant 0 : index
      %41 = vector.load %arg5[%c0_21, %c0_22, %c0_23] : memref<1x16x256xbf16, #tpu.memory_space<vmem>>, vector<1x16x256xbf16>
      %42 = vector.shape_cast %41 : vector<1x16x256xbf16> to vector<16x256xbf16>
      %43 = vector.shape_cast %40 : vector<16x256xbf16> to vector<1x16x256xbf16>
      tpu.vector_store %arg5[%c0_21, %c0_22, %c0_23], %43 {strides = array<i32>} : memref<1x16x256xbf16, #tpu.memory_space<vmem>>, vector<1x16x256xbf16>,
    } else {
    }
    return
  }
  func.func @transform_0(%arg0: i32, %arg1: i32) -> (i32, i32, i32) {
    %c0_i32 = arith.constant 0 : i32
    %c0_i32_0 = arith.constant 0 : i32
    return %arg0, %c0_i32, %arg1 : i32, i32, i32
  }
  func.func @transform_1(%arg0: i32, %arg1: i32) -> (i32, i32) {
    %c0_i32 = arith.constant 0 : i32
    %c0_i32_0 = arith.constant 0 : i32
    return %arg1, %c0_i32 : i32, i32
  }
  func.func @transform_2(%arg0: i32, %arg1: i32) -> (i32, i32) {
    %c0_i32 = arith.constant 0 : i32
    %c0_i32_0 = arith.constant 0 : i32
    %c0_i32_1 = arith.constant 0 : i32
    return %c0_i32, %c0_i32_0 : i32, i32
  }
  func.func @transform_3(%arg0: i32, %arg1: i32) -> (i32, i32, i32) {
    %c0_i32 = arith.constant 0 : i32
    %c0_i32_0 = arith.constant 0 : i32
    %c0_i32_1 = arith.constant 0 : i32
    return %arg0, %c0_i32, %c0_i32_0 : i32, i32, i32
  }
}

module attributes {stable_mosaic.version = 11 : i64} {
  func.func @_conv_in_leaky_kernel(%arg0: i32, %arg1: i32, %arg2: memref<1x4x512xbf16, #tpu.memory_space<vmem>>, %arg3: memref<512x512xbf16, #tpu.memory_space<vmem>>, %arg4: memref<1x512xf32, #tpu.memory_space<vmem>>, %arg5: memref<1x4x512xbf16, #tpu.memory_space<vmem>>, %arg6: memref<4x512xf32, #tpu.memory_space<vmem>>) attributes {dimension_semantics = [#tpu.dimension_semantics<parallel>, #tpu.dimension_semantics<arbitrary>], iteration_bounds = array<i64: 2, 8>, scalar_prefetch = 0 : i64, scratch_operands = 1 : i64, tpu.core_type = #tpu.core_type<tc>, window_params = [{transform_indices = @transform_0, window_bounds = array<i64: 1, 4, 512>}, {transform_indices = @transform_1, window_bounds = array<i64: 512, 512>}, {pipeline_mode = #tpu.pipeline_mode<synchronous>, transform_indices = @transform_2, window_bounds = array<i64: 1, 512>}, {transform_indices = @transform_3, window_bounds = array<i64: 1, 4, 512>}]} {
    %c0_i32 = arith.constant 0 : i32
    %0 = arith.cmpi eq, %arg1, %c0_i32 : i32
    %1 = arith.extui %0 : i1 to i32
    %c0_i32_0 = arith.constant 0 : i32
    %2 = arith.cmpi ne, %1, %c0_i32_0 : i32
    scf.if %2 {
      %cst_10 = arith.constant 0.000000e+00 : f32
      %13 = vector.broadcast %cst_10 : f32 to vector<4x512xf32>
      %c0_11 = arith.constant 0 : index
      %c0_12 = arith.constant 0 : index
      %14 = vector.load %arg6[%c0_11, %c0_12] : memref<4x512xf32, #tpu.memory_space<vmem>>, vector<4x512xf32>
      tpu.vector_store %arg6[%c0_11, %c0_12], %13 {strides = array<i32>} : memref<4x512xf32, #tpu.memory_space<vmem>>, vector<4x512xf32>,
    } else {
    }
    %c0 = arith.constant 0 : index
    %c0_1 = arith.constant 0 : index
    %3 = vector.load %arg6[%c0, %c0_1] : memref<4x512xf32, #tpu.memory_space<vmem>>, vector<4x512xf32>
    %c0_2 = arith.constant 0 : index
    %c0_3 = arith.constant 0 : index
    %c0_4 = arith.constant 0 : index
    %4 = vector.load %arg2[%c0_2, %c0_3, %c0_4] : memref<1x4x512xbf16, #tpu.memory_space<vmem>>, vector<1x4x512xbf16>
    %5 = vector.shape_cast %4 : vector<1x4x512xbf16> to vector<4x512xbf16>
    %c0_5 = arith.constant 0 : index
    %c0_6 = arith.constant 0 : index
    %6 = vector.load %arg3[%c0_5, %c0_6] : memref<512x512xbf16, #tpu.memory_space<vmem>>, vector<512x512xbf16>
    %cst = arith.constant dense<0.000000e+00> : vector<4x512xf32>
    %7 = tpu.matmul %5, %6, %cst {dimension_numbers = #tpu.dot_dimension_numbers<[1], [0], [0], [1], [0, 0, 1, 1], [], []>} : vector<4x512xbf16>, vector<512x512xbf16>, vector<4x512xf32> -> vector<4x512xf32>
    %8 = arith.addf %3, %7 : vector<4x512xf32>
    %c0_7 = arith.constant 0 : index
    %c0_8 = arith.constant 0 : index
    %9 = vector.load %arg6[%c0_7, %c0_8] : memref<4x512xf32, #tpu.memory_space<vmem>>, vector<4x512xf32>
    tpu.vector_store %arg6[%c0_7, %c0_8], %8 {strides = array<i32>} : memref<4x512xf32, #tpu.memory_space<vmem>>, vector<4x512xf32>,
    %c7_i32 = arith.constant 7 : i32
    %10 = arith.cmpi eq, %arg1, %c7_i32 : i32
    %11 = arith.extui %10 : i1 to i32
    %c0_i32_9 = arith.constant 0 : i32
    %12 = arith.cmpi ne, %11, %c0_i32_9 : i32
    scf.if %12 {
      %c0_10 = arith.constant 0 : index
      %c0_11 = arith.constant 0 : index
      %13 = vector.load %arg6[%c0_10, %c0_11] : memref<4x512xf32, #tpu.memory_space<vmem>>, vector<4x512xf32>
      %c0_12 = arith.constant 0 : index
      %c0_13 = arith.constant 0 : index
      %14 = vector.load %arg4[%c0_12, %c0_13] : memref<1x512xf32, #tpu.memory_space<vmem>>, vector<1x512xf32>
      %15 = vector.broadcast %14 : vector<1x512xf32> to vector<4x512xf32>
      %16 = arith.addf %13, %15 : vector<4x512xf32>
      %cst_14 = arith.constant dense<0.000000e+00> : vector<512xf32>
      %17 = vector.multi_reduction <add>, %16, %cst_14 [0] : vector<4x512xf32> to vector<512xf32>
      %18 = vector.shape_cast %17 : vector<512xf32> to vector<1x512xf32>
      %cst_15 = arith.constant 4.000000e+00 : f32
      %19 = vector.broadcast %cst_15 : f32 to vector<1x512xf32>
      %20 = arith.divf %18, %19 : vector<1x512xf32>
      %21 = vector.broadcast %20 : vector<1x512xf32> to vector<4x512xf32>
      %22 = arith.subf %16, %21 : vector<4x512xf32>
      %23 = arith.mulf %22, %22 : vector<4x512xf32>
      %cst_16 = arith.constant dense<0.000000e+00> : vector<512xf32>
      %24 = vector.multi_reduction <add>, %23, %cst_16 [0] : vector<4x512xf32> to vector<512xf32>
      %25 = vector.shape_cast %24 : vector<512xf32> to vector<1x512xf32>
      %cst_17 = arith.constant 4.000000e+00 : f32
      %26 = vector.broadcast %cst_17 : f32 to vector<1x512xf32>
      %27 = arith.divf %25, %26 : vector<1x512xf32>
      %28 = vector.broadcast %20 : vector<1x512xf32> to vector<4x512xf32>
      %29 = arith.subf %16, %28 : vector<4x512xf32>
      %cst_18 = arith.constant 9.99999974E-6 : f32
      %30 = vector.broadcast %cst_18 : f32 to vector<1x512xf32>
      %31 = arith.addf %27, %30 : vector<1x512xf32>
      %32 = math.rsqrt %31 : vector<1x512xf32>
      %33 = vector.broadcast %32 : vector<1x512xf32> to vector<4x512xf32>
      %34 = arith.mulf %29, %33 : vector<4x512xf32>
      %cst_19 = arith.constant 0.000000e+00 : f32
      %35 = vector.broadcast %cst_19 : f32 to vector<4x512xf32>
      %36 = arith.cmpf oge, %34, %35 : vector<4x512xf32>
      %cst_20 = arith.constant 2.000000e-01 : f32
      %37 = vector.broadcast %cst_20 : f32 to vector<4x512xf32>
      %38 = arith.mulf %37, %34 : vector<4x512xf32>
      %39 = arith.select %36, %34, %38 : vector<4x512xi1>, vector<4x512xf32>
      %40 = arith.truncf %39 : vector<4x512xf32> to vector<4x512xbf16>
      %c0_21 = arith.constant 0 : index
      %c0_22 = arith.constant 0 : index
      %c0_23 = arith.constant 0 : index
      %41 = vector.load %arg5[%c0_21, %c0_22, %c0_23] : memref<1x4x512xbf16, #tpu.memory_space<vmem>>, vector<1x4x512xbf16>
      %42 = vector.shape_cast %41 : vector<1x4x512xbf16> to vector<4x512xbf16>
      %43 = vector.shape_cast %40 : vector<4x512xbf16> to vector<1x4x512xbf16>
      tpu.vector_store %arg5[%c0_21, %c0_22, %c0_23], %43 {strides = array<i32>} : memref<1x4x512xbf16, #tpu.memory_space<vmem>>, vector<1x4x512xbf16>,
    } else {
    }
    return
  }
  func.func @transform_0(%arg0: i32, %arg1: i32) -> (i32, i32, i32) {
    %c0_i32 = arith.constant 0 : i32
    %c0_i32_0 = arith.constant 0 : i32
    return %arg0, %c0_i32, %arg1 : i32, i32, i32
  }
  func.func @transform_1(%arg0: i32, %arg1: i32) -> (i32, i32) {
    %c0_i32 = arith.constant 0 : i32
    %c0_i32_0 = arith.constant 0 : i32
    return %arg1, %c0_i32 : i32, i32
  }
  func.func @transform_2(%arg0: i32, %arg1: i32) -> (i32, i32) {
    %c0_i32 = arith.constant 0 : i32
    %c0_i32_0 = arith.constant 0 : i32
    %c0_i32_1 = arith.constant 0 : i32
    return %c0_i32, %c0_i32_0 : i32, i32
  }
  func.func @transform_3(%arg0: i32, %arg1: i32) -> (i32, i32, i32) {
    %c0_i32 = arith.constant 0 : i32
    %c0_i32_0 = arith.constant 0 : i32
    %c0_i32_1 = arith.constant 0 : i32
    return %arg0, %c0_i32, %c0_i32_0 : i32, i32, i32
  }
}

module attributes {stable_mosaic.version = 11 : i64} {
  func.func @_mm_bias_act_kernel(%arg0: i32, %arg1: i32, %arg2: i32, %arg3: memref<8x512xbf16, #tpu.memory_space<vmem>>, %arg4: memref<512x128xbf16, #tpu.memory_space<vmem>>, %arg5: memref<1x128xf32, #tpu.memory_space<vmem>>, %arg6: memref<8x128xf32, #tpu.memory_space<vmem>>, %arg7: memref<8x128xf32, #tpu.memory_space<vmem>>) attributes {dimension_semantics = [#tpu.dimension_semantics<parallel>, #tpu.dimension_semantics<parallel>, #tpu.dimension_semantics<arbitrary>], iteration_bounds = array<i64: 1, 1, 16>, scalar_prefetch = 0 : i64, scratch_operands = 1 : i64, tpu.core_type = #tpu.core_type<tc>, window_params = [{transform_indices = @transform_0, window_bounds = array<i64: 8, 512>}, {transform_indices = @transform_1, window_bounds = array<i64: 512, 128>}, {transform_indices = @transform_2, window_bounds = array<i64: 1, 128>}, {transform_indices = @transform_3, window_bounds = array<i64: 8, 128>}]} {
    %c0_i32 = arith.constant 0 : i32
    %0 = arith.cmpi eq, %arg2, %c0_i32 : i32
    %1 = arith.extui %0 : i1 to i32
    %c0_i32_0 = arith.constant 0 : i32
    %2 = arith.cmpi ne, %1, %c0_i32_0 : i32
    scf.if %2 {
      %cst_9 = arith.constant 0.000000e+00 : f32
      %12 = vector.broadcast %cst_9 : f32 to vector<8x128xf32>
      %c0_10 = arith.constant 0 : index
      %c0_11 = arith.constant 0 : index
      %13 = vector.load %arg7[%c0_10, %c0_11] : memref<8x128xf32, #tpu.memory_space<vmem>>, vector<8x128xf32>
      tpu.vector_store %arg7[%c0_10, %c0_11], %12 {strides = array<i32>} : memref<8x128xf32, #tpu.memory_space<vmem>>, vector<8x128xf32>,
    } else {
    }
    %c0 = arith.constant 0 : index
    %c0_1 = arith.constant 0 : index
    %3 = vector.load %arg7[%c0, %c0_1] : memref<8x128xf32, #tpu.memory_space<vmem>>, vector<8x128xf32>
    %c0_2 = arith.constant 0 : index
    %c0_3 = arith.constant 0 : index
    %4 = vector.load %arg3[%c0_2, %c0_3] : memref<8x512xbf16, #tpu.memory_space<vmem>>, vector<8x512xbf16>
    %c0_4 = arith.constant 0 : index
    %c0_5 = arith.constant 0 : index
    %5 = vector.load %arg4[%c0_4, %c0_5] : memref<512x128xbf16, #tpu.memory_space<vmem>>, vector<512x128xbf16>
    %cst = arith.constant dense<0.000000e+00> : vector<8x128xf32>
    %6 = tpu.matmul %4, %5, %cst {dimension_numbers = #tpu.dot_dimension_numbers<[1], [0], [0], [1], [0, 0, 1, 1], [], []>} : vector<8x512xbf16>, vector<512x128xbf16>, vector<8x128xf32> -> vector<8x128xf32>
    %7 = arith.addf %3, %6 : vector<8x128xf32>
    %c0_6 = arith.constant 0 : index
    %c0_7 = arith.constant 0 : index
    %8 = vector.load %arg7[%c0_6, %c0_7] : memref<8x128xf32, #tpu.memory_space<vmem>>, vector<8x128xf32>
    tpu.vector_store %arg7[%c0_6, %c0_7], %7 {strides = array<i32>} : memref<8x128xf32, #tpu.memory_space<vmem>>, vector<8x128xf32>,
    %c15_i32 = arith.constant 15 : i32
    %9 = arith.cmpi eq, %arg2, %c15_i32 : i32
    %10 = arith.extui %9 : i1 to i32
    %c0_i32_8 = arith.constant 0 : i32
    %11 = arith.cmpi ne, %10, %c0_i32_8 : i32
    scf.if %11 {
      %c0_9 = arith.constant 0 : index
      %c0_10 = arith.constant 0 : index
      %12 = vector.load %arg7[%c0_9, %c0_10] : memref<8x128xf32, #tpu.memory_space<vmem>>, vector<8x128xf32>
      %c0_11 = arith.constant 0 : index
      %c0_12 = arith.constant 0 : index
      %13 = vector.load %arg5[%c0_11, %c0_12] : memref<1x128xf32, #tpu.memory_space<vmem>>, vector<1x128xf32>
      %14 = vector.broadcast %13 : vector<1x128xf32> to vector<8x128xf32>
      %15 = arith.addf %12, %14 : vector<8x128xf32>
      %16 = arith.negf %15 : vector<8x128xf32>
      %17 = math.exp %16 : vector<8x128xf32>
      %cst_13 = arith.constant 1.000000e+00 : f32
      %18 = vector.broadcast %cst_13 : f32 to vector<8x128xf32>
      %19 = arith.addf %18, %17 : vector<8x128xf32>
      %20 = arith.divf %18, %19 : vector<8x128xf32>
      %c0_14 = arith.constant 0 : index
      %c0_15 = arith.constant 0 : index
      %21 = vector.load %arg6[%c0_14, %c0_15] : memref<8x128xf32, #tpu.memory_space<vmem>>, vector<8x128xf32>
      tpu.vector_store %arg6[%c0_14, %c0_15], %20 {strides = array<i32>} : memref<8x128xf32, #tpu.memory_space<vmem>>, vector<8x128xf32>,
    } else {
    }
    return
  }
  func.func @transform_0(%arg0: i32, %arg1: i32, %arg2: i32) -> (i32, i32) {
    %c0_i32 = arith.constant 0 : i32
    return %arg0, %arg2 : i32, i32
  }
  func.func @transform_1(%arg0: i32, %arg1: i32, %arg2: i32) -> (i32, i32) {
    %c0_i32 = arith.constant 0 : i32
    return %arg2, %arg1 : i32, i32
  }
  func.func @transform_2(%arg0: i32, %arg1: i32, %arg2: i32) -> (i32, i32) {
    %c0_i32 = arith.constant 0 : i32
    %c0_i32_0 = arith.constant 0 : i32
    return %c0_i32, %arg1 : i32, i32
  }
  func.func @transform_3(%arg0: i32, %arg1: i32, %arg2: i32) -> (i32, i32) {
    %c0_i32 = arith.constant 0 : i32
    return %arg0, %arg1 : i32, i32
  }
}

</mosaic_0001>

<bundles_post_ra>
// kernel: discriminator_forward.5
= control target key start
LH: loop header
LB: loop body
LE: loop exit
PB: predicated region body
PF: predicated region fallthrough
CT: control target
= control target key end

     0   :  { %s1563_s12 = smov 0   ;;  %s1565_s13 = smov 0   ;;  %s1704_s0 = inlined_call_operand.vmem [shape: bf16[512,128], index: 0, kind: input, shape index: {}]   ;;  %s1705_s1 = inlined_call_operand.vmem [shape: bf16[128,128], index: 1, kind: input, shape index: {}]   ;;  %s1706_s2 = inlined_call_operand.vmem [shape: f32[1,128], index: 2, kind: input, shape index: {}]   ;;  %s1707_s3 = inlined_call_operand.vmem [shape: bf16[512,128], index: 3, kind: output, shape index: {}]  }
   0x1   :  { %s1567_s14 = smov 0  }
   0x2 LB: > { %s32_s15 = sadd.s32 1, %s1537_s13  ;;  %p1192_p0 = scmp.ge.s32.totalorder %s1541_s14, 1  ;;  %s1541_s14 = sphi %s1567_s14, %s13_s14   ;;  %s1537_s13 = sphi %s1565_s13, %s1709_s13   ;;  %s1533_s12 = sphi %s1563_s12, %s1708_s12  }
   0x3   : > { %p34_p1 = scmp.ge.s32.totalorder %s32_s15, 2  ;;  %p188_p2 = scmp.lt.s32.totalorder %s1541_s14, 3 }
   0x5   : > { %s1711_s15 = smov (%p34_p1, %s32_s15), 0  ;;  %p189_p3 = pnand %p1192_p0, %p188_p2 }
   0x6   : > { %s1193_s18 = sshll.u32 (!%p189_p3), %s1533_s12, 5 }
   0x7   : > { %192 = sbr.rel (%p189_p3) target bundleno = 280 (0x118), region = 32  ;;  %p230_p4 = scmp.lt.s32.totalorder (!%p189_p3), %s1193_s18, 63 }
   0xc   : > { %v1495_v0 = vld [vmem:[%s1705_s1 + $0x38] sm:$0xff]   ;;  %v1496_v1 = vld [vmem:[%s1705_s1 + $0x30] sm:$0xff]   ;;  %s1713_s18 = smov (!%p230_p4, %s1193_s18), 63  ;;  %v1497_v2 = vld [vmem:[%s1705_s1 + $0x28] sm:$0xff]  }
   0xd   : > { %1407 = vmatprep.subr.bf16.mxu0 %v1495_v0  ;;  %1455 = vmatprep.subr.bf16.mxu1 %v1495_v0  ;;  %s1194_s23 = sshll.u32 %s1713_s18, 2  ;;  %v1498_v3 = vld [vmem:[%s1705_s1 + $0x20] sm:$0xff]   ;;  %v1499_v6 = vld [vmem:[%s1705_s1 + $0x18] sm:$0xff]   ;;  %v1500_v7 = vld [vmem:[%s1705_s1 + $0x10] sm:$0xff]  }
   0xe   : > { %1408 = vmatpush3.bf16.msra.mxu0 %v1495_v0  ;;  %1463 = vmatpush3.bf16.msra.mxu1 %v1495_v0  ;;  %s1598_s26 = scalar_lea.vmem %s1704_s0, %s1194_s23  ;;  %v1501_v8 = vld [vmem:[%s1705_s1 + $0x8] sm:$0xff]   ;;  %v1502_v9 = vld [vmem:[%s1705_s1] sm:$0xff]   ;;  %s1649_s17 = scalar_lea.vmem %s1707_s3, %s1194_s23 }
   0xf   : > { %1409 = vmatprep.subr.bf16.mxu0 %v1496_v1  ;;  %1456 = vmatprep.subr.bf16.mxu1 %v1496_v1  ;;  %v1503_v4 = vld [vmem:[%s1598_s26] sm:$0xff]   ;;  %v1505_v10 = vld [vmem:[%s1598_s26 + $0x8] sm:$0xff]   ;;  %v1507_v12 = vld [vmem:[%s1598_s26 + $0x10] sm:$0xff]  }
  0x10   : > { %v1504_v5 = vld [vmem:[%s1598_s26 + $0x40] sm:$0xff]   ;;  %1423 = vmatprep.mubr.bf16.mxu0 %v1503_v4  ;;  %v1506_v11 = vld [vmem:[%s1598_s26 + $0x48] sm:$0xff]   ;;  %v1508_v13 = vld [vmem:[%s1598_s26 + $0x50] sm:$0xff]  }
  0x11   : > { %1439 = vmatprep.mubr.bf16.mxu1 %v1504_v5  ;;  %v1509_v14 = vld [vmem:[%s1598_s26 + $0x18] sm:$0xff]   ;;  %v1511_v16 = vld [vmem:[%s1598_s26 + $0x20] sm:$0xff]   ;;  %v1513_v18 = vld [vmem:[%s1598_s26 + $0x28] sm:$0xff]  }
  0x12   : > { %1410 = vmatpush3.bf16.msra.mxu0 %v1496_v1  ;;  %1464 = vmatpush3.bf16.msra.mxu1 %v1496_v1  ;;  %v1510_v15 = vld [vmem:[%s1598_s26 + $0x58] sm:$0xff]   ;;  %v1512_v17 = vld [vmem:[%s1598_s26 + $0x60] sm:$0xff]   ;;  %v1514_v19 = vld [vmem:[%s1598_s26 + $0x68] sm:$0xff]  }
  0x13   : > { %1411 = vmatprep.subr.bf16.mxu0 %v1497_v2  ;;  %1457 = vmatprep.subr.bf16.mxu1 %v1497_v2  ;;  %v1515_v20 = vld [vmem:[%s1598_s26 + $0x30] sm:$0xff]   ;;  %v1517_v22 = vld [vmem:[%s1598_s26 + $0x38] sm:$0xff]   ;;  %v1634_v24 = vld [vmem:[%s1706_s2] ss:$0 sm:$0xff] }
  0x14   : > { %v1516_v21 = vld [vmem:[%s1598_s26 + $0x70] sm:$0xff]   ;;  %v1518_v23 = vld [vmem:[%s1598_s26 + $0x78] sm:$0xff]  }
  0x16   : > { %1412 = vmatpush3.bf16.msra.mxu0 %v1497_v2  ;;  %1465 = vmatpush3.bf16.msra.mxu1 %v1497_v2 }
  0x17   : > { %1413 = vmatprep.subr.bf16.mxu0 %v1498_v3  ;;  %1458 = vmatprep.subr.bf16.mxu1 %v1498_v3 }
  0x1a   : > { %1414 = vmatpush3.bf16.msra.mxu0 %v1498_v3  ;;  %1466 = vmatpush3.bf16.msra.mxu1 %v1498_v3 }
  0x1b   : > { %1415 = vmatprep.subr.bf16.mxu0 %v1499_v6  ;;  %1459 = vmatprep.subr.bf16.mxu1 %v1499_v6 }
  0x1e   : > { %1416 = vmatpush3.bf16.msra.mxu0 %v1499_v6  ;;  %1467 = vmatpush3.bf16.msra.mxu1 %v1499_v6 }
  0x1f   : > { %1417 = vmatprep.subr.bf16.mxu0 %v1500_v7  ;;  %1460 = vmatprep.subr.bf16.mxu1 %v1500_v7 }
  0x22   : > { %1418 = vmatpush3.bf16.msra.mxu0 %v1500_v7  ;;  %1468 = vmatpush3.bf16.msra.mxu1 %v1500_v7 }
  0x23   : > { %1419 = vmatprep.subr.bf16.mxu0 %v1501_v8  ;;  %1461 = vmatprep.subr.bf16.mxu1 %v1501_v8 }
  0x26   : > { %1420 = vmatpush3.bf16.msra.mxu0 %v1501_v8  ;;  %1469 = vmatpush3.bf16.msra.mxu1 %v1501_v8 }
  0x27   : > { %1421 = vmatprep.subr.bf16.mxu0 %v1502_v9  ;;  %1462 = vmatprep.subr.bf16.mxu1 %v1502_v9 }
  0x2a   : > { %1422 = vmatpush3.bf16.msra.mxu0 %v1502_v9  ;;  %1470 = vmatpush3.bf16.msra.mxu1 %v1502_v9 }
  0x2d   : > { %1424 = vmatmul.mubr.bf16.vlgmr.msra.gmra.mxu0 %v1505_v10  ;;  %1440 = vmatmul.mubr.bf16.vlgmr.msra.gmra.mxu1 %v1506_v11 }
  0x2e   : > { %1427 = vmatprep.mubr.bf16.mxu0 %v1507_v12  ;;  %1443 = vmatprep.mubr.bf16.mxu1 %v1508_v13 }
  0x35   : > { %1428 = vmatmul.mubr.bf16.gmra.mxu0 %v1509_v14  ;;  %1444 = vmatmul.mubr.bf16.gmra.mxu1 %v1510_v15 }
  0x36   : > { %1431 = vmatprep.mubr.bf16.mxu0 %v1511_v16  ;;  %1447 = vmatprep.mubr.bf16.mxu1 %v1512_v17 }
  0x3d   : > { %1432 = vmatmul.mubr.bf16.gmra.mxu0 %v1513_v18  ;;  %1448 = vmatmul.mubr.bf16.gmra.mxu1 %v1514_v19 }
  0x3e   : > { %1435 = vmatprep.mubr.bf16.mxu0 %v1515_v20  ;;  %1451 = vmatprep.mubr.bf16.mxu1 %v1516_v21 }
  0x45   : > { %1436 = vmatmul.mubr.bf16.gmra.mxu0 %v1517_v22  ;;  %1452 = vmatmul.mubr.bf16.gmra.mxu1 %v1518_v23 }
  0xed   : > { %v1425_v25 = vpop.f32.mrf.mxu0  ;;  %v1441_v26 = vpop.f32.mrf.mxu1 }
  0xee   : > { %v789_v27 = vadd.f32 %v1425_v25, %v1634_v24  ;;  %v805_v28 = vadd.f32 %v1441_v26, %v1634_v24 }
  0xef   : > { %v554_v29 = vpop.f32.mrf.mxu0  ;;  %v618_v30 = vpop.f32.mrf.mxu1 }
  0xf0   : > { %vm821_vm0 = vcmp.ge.f32.partialorder %v789_v27, 0.0  ;;  %v853_v31 = vmul.f32 0.2, %v789_v27  ;;  %vm837_vm1 = vcmp.ge.f32.partialorder %v805_v28, 0.0  ;;  %v869_v32 = vmul.f32 0.2, %v805_v28 }
  0xf1   : > { %v787_v33 = vadd.f32 %v1634_v24, %v554_v29  ;;  %v803_v34 = vadd.f32 %v1634_v24, %v618_v30  ;;  %v1426_v35 = vpop.f32.mrf.mxu0  ;;  %v1442_v36 = vpop.f32.mrf.mxu1 }
  0xf2   : > { %v885_v37 = vsel %vm821_vm0, %v789_v27, %v853_v31  ;;  %v790_v38 = vadd.f32 %v1426_v35, %v1634_v24  ;;  %v806_v39 = vadd.f32 %v1442_v36, %v1634_v24  ;;  %v901_v40 = vsel %vm837_vm1, %v805_v28, %v869_v32 }
  0xf3   : > { %vm819_vm2 = vcmp.ge.f32.partialorder %v787_v33, 0.0  ;;  %v851_v41 = vmul.f32 0.2, %v787_v33  ;;  %vm835_vm3 = vcmp.ge.f32.partialorder %v803_v34, 0.0  ;;  %v557_v42 = vpop.f32.mrf.mxu0  ;;  %v621_v43 = vpop.f32.mrf.mxu1  ;;  %v867_v47 = vmul.f32 0.2, %v803_v34 }
  0xf4   : > { %vm822_vm4 = vcmp.ge.f32.partialorder %v790_v38, 0.0  ;;  %v854_v44 = vmul.f32 0.2, %v790_v38  ;;  %vm838_vm5 = vcmp.ge.f32.partialorder %v806_v39, 0.0  ;;  %v870_v45 = vmul.f32 0.2, %v806_v39 }
  0xf5   : > { %v883_v46 = vsel %vm819_vm2, %v787_v33, %v851_v41  ;;  %v788_v48 = vadd.f32 %v1634_v24, %v557_v42  ;;  %v804_v49 = vadd.f32 %v1634_v24, %v621_v43  ;;  %v1429_v50 = vpop.f32.mrf.mxu0  ;;  %v1445_v51 = vpop.f32.mrf.mxu1  ;;  %v899_v63 = vsel %vm835_vm3, %v803_v34, %v867_v47 }
  0xf6   : > { %v886_v52 = vsel %vm822_vm4, %v790_v38, %v854_v44  ;;  %v902_v53 = vsel %vm838_vm5, %v806_v39, %v870_v45  ;;  %v793_v54 = vadd.f32 %v1429_v50, %v1634_v24  ;;  %v809_v55 = vadd.f32 %v1445_v51, %v1634_v24 }
  0xf7   : > { %v1296_v56 = vpack.c.bf16 %v886_v52, %v885_v37  ;;  %v1336_v57 = vpack.c.bf16 %v902_v53, %v901_v40  ;;  %vm820_vm6 = vcmp.ge.f32.partialorder %v788_v48, 0.0  ;;  %v852_v58 = vmul.f32 0.2, %v788_v48  ;;  %v570_v59 = vpop.f32.mrf.mxu0  ;;  %v634_v60 = vpop.f32.mrf.mxu1 }
  0xf8   : > { %vm836_vm7 = vcmp.ge.f32.partialorder %v804_v49, 0.0  ;;  %v868_v61 = vmul.f32 0.2, %v804_v49  ;;  %vm825_vm8 = vcmp.ge.f32.partialorder %v793_v54, 0.0  ;;  %v857_v62 = vmul.f32 0.2, %v793_v54 }
  0xf9   : > { %1368 = vst [vmem:[%s1649_s17 + $0x8] sm:$0xff] %v1296_v56   ;;  %1376 = vst [vmem:[%s1649_s17 + $0x48] sm:$0xff] %v1336_v57   ;;  %v884_v0 = vsel %vm820_vm6, %v788_v48, %v852_v58  ;;  %v873_v1 = vmul.f32 0.2, %v809_v55  ;;  %v791_v2 = vadd.f32 %v1634_v24, %v570_v59  ;;  %v1430_v3 = vpop.f32.mrf.mxu0  ;;  %v1446_v4 = vpop.f32.mrf.mxu1  ;;  %vm841_vm9 = vcmp.ge.f32.partialorder %v809_v55, 0.0 }
  0xfa   : > { %v1291_v5 = vpack.c.bf16 %v884_v0, %v883_v46  ;;  %v900_v6 = vsel %vm836_vm7, %v804_v49, %v868_v61  ;;  %v807_v7 = vadd.f32 %v1634_v24, %v634_v60  ;;  %v889_v9 = vsel %vm825_vm8, %v793_v54, %v857_v62 }
  0xfb   : > { %v1331_v8 = vpack.c.bf16 %v900_v6, %v899_v63  ;;  %vm823_vm10 = vcmp.ge.f32.partialorder %v791_v2, 0.0  ;;  %v855_v10 = vmul.f32 0.2, %v791_v2  ;;  %v573_v11 = vpop.f32.mrf.mxu0  ;;  %v637_v12 = vpop.f32.mrf.mxu1  ;;  %v794_v14 = vadd.f32 %v1430_v3, %v1634_v24 }
  0xfc   : > { %1292 = vst [vmem:[%s1649_s17] sm:$0xff] %v1291_v5   ;;  %vm839_vm11 = vcmp.ge.f32.partialorder %v807_v7, 0.0  ;;  %v871_v13 = vmul.f32 0.2, %v807_v7  ;;  %v810_v15 = vadd.f32 %v1446_v4, %v1634_v24  ;;  %v905_v16 = vsel %vm841_vm9, %v809_v55, %v873_v1 }
  0xfd   : > { %1375 = vst [vmem:[%s1649_s17 + $0x40] sm:$0xff] %v1331_v8   ;;  %v887_v17 = vsel %vm823_vm10, %v791_v2, %v855_v10  ;;  %v792_v18 = vadd.f32 %v1634_v24, %v573_v11  ;;  %v808_v19 = vadd.f32 %v1634_v24, %v637_v12  ;;  %v1433_v20 = vpop.f32.mrf.mxu0  ;;  %v1449_v21 = vpop.f32.mrf.mxu1  ;;  %vm826_vm12 = vcmp.ge.f32.partialorder %v794_v14, 0.0 }
  0xfe   : > { %v903_v22 = vsel %vm839_vm11, %v807_v7, %v871_v13  ;;  %v858_v23 = vmul.f32 0.2, %v794_v14  ;;  %vm842_vm13 = vcmp.ge.f32.partialorder %v810_v15, 0.0  ;;  %v874_v25 = vmul.f32 0.2, %v810_v15 }
  0xff   : > { %vm824_vm14 = vcmp.ge.f32.partialorder %v792_v18, 0.0  ;;  %v856_v26 = vmul.f32 0.2, %v792_v18  ;;  %vm840_vm15 = vcmp.ge.f32.partialorder %v808_v19, 0.0  ;;  %v586_v27 = vpop.f32.mrf.mxu0  ;;  %v650_v28 = vpop.f32.mrf.mxu1  ;;  %v872_v30 = vmul.f32 0.2, %v808_v19 }
 0x100   : > { %v890_v29 = vsel %vm826_vm12, %v794_v14, %v858_v23  ;;  %v797_v31 = vadd.f32 %v1433_v20, %v1634_v24  ;;  %v813_v32 = vadd.f32 %v1449_v21, %v1634_v24  ;;  %v906_v34 = vsel %vm842_vm13, %v810_v15, %v874_v25 }
 0x101   : > { %v1306_v33 = vpack.c.bf16 %v890_v29, %v889_v9  ;;  %v888_v35 = vsel %vm824_vm14, %v792_v18, %v856_v26  ;;  %v795_v36 = vadd.f32 %v1634_v24, %v586_v27  ;;  %v1434_v37 = vpop.f32.mrf.mxu0  ;;  %v1450_v38 = vpop.f32.mrf.mxu1  ;;  %v1346_v39 = vpack.c.bf16 %v906_v34, %v905_v16 }
 0x102   : > { %v1301_v40 = vpack.c.bf16 %v888_v35, %v887_v17  ;;  %v904_v41 = vsel %vm840_vm15, %v808_v19, %v872_v30  ;;  %vm829_vm0 = vcmp.ge.f32.partialorder %v797_v31, 0.0  ;;  %v861_v43 = vmul.f32 0.2, %v797_v31 }
 0x103   : > { %1370 = vst [vmem:[%s1649_s17 + $0x18] sm:$0xff] %v1306_v33   ;;  %v1341_v42 = vpack.c.bf16 %v904_v41, %v903_v22  ;;  %vm845_vm1 = vcmp.ge.f32.partialorder %v813_v32, 0.0  ;;  %v877_v44 = vmul.f32 0.2, %v813_v32  ;;  %v589_v45 = vpop.f32.mrf.mxu0  ;;  %v653_v46 = vpop.f32.mrf.mxu1  ;;  %1378 = vst [vmem:[%s1649_s17 + $0x58] sm:$0xff] %v1346_v39   ;;  %vm827_vm2 = vcmp.ge.f32.partialorder %v795_v36, 0.0 }
 0x104   : > { %1369 = vst [vmem:[%s1649_s17 + $0x10] sm:$0xff] %v1301_v40   ;;  %v859_v47 = vmul.f32 0.2, %v795_v36  ;;  %v811_v48 = vadd.f32 %v1634_v24, %v650_v28  ;;  %v798_v49 = vadd.f32 %v1434_v37, %v1634_v24  ;;  %v893_v50 = vsel %vm829_vm0, %v797_v31, %v861_v43 }
 0x105   : > { %1377 = vst [vmem:[%s1649_s17 + $0x50] sm:$0xff] %v1341_v42   ;;  %v814_v51 = vadd.f32 %v1450_v38, %v1634_v24  ;;  %v796_v52 = vadd.f32 %v1634_v24, %v589_v45  ;;  %v1437_v53 = vpop.f32.mrf.mxu0  ;;  %v1453_v54 = vpop.f32.mrf.mxu1  ;;  %v909_v55 = vsel %vm845_vm1, %v813_v32, %v877_v44  ;;  %v812_v63 = vadd.f32 %v1634_v24, %v653_v46 }
 0x106   : > { %v891_v56 = vsel %vm827_vm2, %v795_v36, %v859_v47  ;;  %vm843_vm3 = vcmp.ge.f32.partialorder %v811_v48, 0.0  ;;  %vm830_vm4 = vcmp.ge.f32.partialorder %v798_v49, 0.0  ;;  %v862_v57 = vmul.f32 0.2, %v798_v49 }
 0x107   : > { %vm846_vm5 = vcmp.ge.f32.partialorder %v814_v51, 0.0  ;;  %v878_v58 = vmul.f32 0.2, %v814_v51  ;;  %vm828_vm6 = vcmp.ge.f32.partialorder %v796_v52, 0.0  ;;  %v602_v59 = vpop.f32.mrf.mxu0  ;;  %v666_v60 = vpop.f32.mrf.mxu1  ;;  %v875_v61 = vmul.f32 0.2, %v811_v48 }
 0x108   : > { %v860_v62 = vmul.f32 0.2, %v796_v52  ;;  %v801_v0 = vadd.f32 %v1437_v53, %v1634_v24  ;;  %v894_v1 = vsel %vm830_vm4, %v798_v49, %v862_v57  ;;  %v817_v3 = vadd.f32 %v1453_v54, %v1634_v24 }
 0x109   : > { %v910_v2 = vsel %vm846_vm5, %v814_v51, %v878_v58  ;;  %v799_v4 = vadd.f32 %v1634_v24, %v602_v59  ;;  %v1438_v5 = vpop.f32.mrf.mxu0  ;;  %v1454_v6 = vpop.f32.mrf.mxu1  ;;  %v1316_v7 = vpack.c.bf16 %v894_v1, %v893_v50  ;;  %vm844_vm7 = vcmp.ge.f32.partialorder %v812_v63, 0.0 }
 0x10a   : > { %v1356_v8 = vpack.c.bf16 %v910_v2, %v909_v55  ;;  %v892_v9 = vsel %vm828_vm6, %v796_v52, %v860_v62  ;;  %v876_v11 = vmul.f32 0.2, %v812_v63  ;;  %v865_v12 = vmul.f32 0.2, %v801_v0 }
 0x10b   : > { %v1311_v10 = vpack.c.bf16 %v892_v9, %v891_v56  ;;  %v907_v13 = vsel %vm843_vm3, %v811_v48, %v875_v61  ;;  %1372 = vst [vmem:[%s1649_s17 + $0x28] sm:$0xff] %v1316_v7   ;;  %vm833_vm8 = vcmp.ge.f32.partialorder %v801_v0, 0.0  ;;  %v881_v15 = vmul.f32 0.2, %v817_v3  ;;  %v605_v18 = vpop.f32.mrf.mxu0  ;;  %v669_v19 = vpop.f32.mrf.mxu1 }
 0x10c   : > { %1380 = vst [vmem:[%s1649_s17 + $0x68] sm:$0xff] %v1356_v8   ;;  %v908_v14 = vsel %vm844_vm7, %v812_v63, %v876_v11  ;;  %v815_v16 = vadd.f32 %v1634_v24, %v666_v60  ;;  %v802_v17 = vadd.f32 %v1438_v5, %v1634_v24  ;;  %vm849_vm9 = vcmp.ge.f32.partialorder %v817_v3, 0.0 }
 0x10d   : > { %1371 = vst [vmem:[%s1649_s17 + $0x20] sm:$0xff] %v1311_v10   ;;  %v1351_v20 = vpack.c.bf16 %v908_v14, %v907_v13  ;;  %vm831_vm10 = vcmp.ge.f32.partialorder %v799_v4, 0.0  ;;  %v818_v21 = vadd.f32 %v1454_v6, %v1634_v24  ;;  %v897_v22 = vsel %vm833_vm8, %v801_v0, %v865_v12 }
 0x10e   : > { %v863_v23 = vmul.f32 0.2, %v799_v4  ;;  %vm834_vm11 = vcmp.ge.f32.partialorder %v802_v17, 0.0  ;;  %v866_v25 = vmul.f32 0.2, %v802_v17  ;;  %v800_v27 = vadd.f32 %v1634_v24, %v605_v18 }
 0x10f   : > { %1379 = vst [vmem:[%s1649_s17 + $0x60] sm:$0xff] %v1351_v20   ;;  %vm850_vm12 = vcmp.ge.f32.partialorder %v818_v21, 0.0  ;;  %v882_v26 = vmul.f32 0.2, %v818_v21  ;;  %v816_v28 = vadd.f32 %v1634_v24, %v669_v19  ;;  %v913_v29 = vsel %vm849_vm9, %v817_v3, %v881_v15 }
 0x110   : > { %vm847_vm13 = vcmp.ge.f32.partialorder %v815_v16, 0.0  ;;  %v879_v30 = vmul.f32 0.2, %v815_v16  ;;  %v898_v31 = vsel %vm834_vm11, %v802_v17, %v866_v25  ;;  %vm832_vm14 = vcmp.ge.f32.partialorder %v800_v27, 0.0 }
 0x111   : > { %v1326_v32 = vpack.c.bf16 %v898_v31, %v897_v22  ;;  %v914_v33 = vsel %vm850_vm12, %v818_v21, %v882_v26  ;;  %v864_v34 = vmul.f32 0.2, %v800_v27  ;;  %vm848_vm15 = vcmp.ge.f32.partialorder %v816_v28, 0.0 }
 0x112   : > { %v1366_v35 = vpack.c.bf16 %v914_v33, %v913_v29  ;;  %v880_v36 = vmul.f32 0.2, %v816_v28  ;;  %v895_v37 = vsel %vm831_vm10, %v799_v4, %v863_v23  ;;  %v911_v39 = vsel %vm847_vm13, %v815_v16, %v879_v30 }
 0x113   : > { %1374 = vst [vmem:[%s1649_s17 + $0x38] sm:$0xff] %v1326_v32   ;;  %v896_v38 = vsel %vm832_vm14, %v800_v27, %v864_v34 }
 0x114   : > { %1382 = vst [vmem:[%s1649_s17 + $0x78] sm:$0xff] %v1366_v35   ;;  %v1321_v24 = vpack.c.bf16 %v896_v38, %v895_v37  ;;  %v912_v40 = vsel %vm848_vm15, %v816_v28, %v880_v36 }
 0x115   : > { %v1361_v41 = vpack.c.bf16 %v912_v40, %v911_v39 }
 0x116   : > { %1373 = vst [vmem:[%s1649_s17 + $0x30] sm:$0xff] %v1321_v24  }
 0x117   : > { %1381 = vst [vmem:[%s1649_s17 + $0x70] sm:$0xff] %v1361_v41  }
 0x118 PF: > { %s13_s14 = sadd.s32 1, %s1541_s14   ;;  %s1708_s12 = smov %s1537_s13 }
 0x119   : > { %p10_p5 = scmp.ge.s32.totalorder %s13_s14, 4   ;;  %s1709_s13 = smov %s1711_s15 }
 0x11b   :  { %12 = sbr.rel (!%p10_p5) target bundleno = 2 (0x2), region = 76 }

// kernel: discriminator_forward.6
= control target key start
LH: loop header
LB: loop body
LE: loop exit
PB: predicated region body
PF: predicated region fallthrough
CT: control target
= control target key end

     0   :  { %s1391_s12 = smov 0   ;;  %s1393_s13 = smov 0   ;;  %s1565_s0 = inlined_call_operand.vmem [shape: bf16[2,64,1024], index: 0, kind: input, shape index: {}]   ;;  %s1566_s1 = inlined_call_operand.vmem [shape: bf16[1024,128], index: 1, kind: input, shape index: {}]   ;;  %s1567_s2 = inlined_call_operand.vmem [shape: f32[1,128], index: 2, kind: input, shape index: {}]   ;;  %s1568_s3 = inlined_call_operand.vmem [shape: bf16[2,64,128], index: 3, kind: output, shape index: {}]  }
   0x1   :  { %s1395_s14 = smov 0   ;;  %s1397_s15 = smov 0  }
   0x2   :  { %s1399_s16 = smov 0   ;;  %s1401_s17 = smov 0  }
   0x3   :  { %s1403_s18 = smov 0  }
   0x4 LB: > { %s22_s19 = sadd.s32 1, %s1360_s16  ;;  %s25_s20 = sadd.s32 1, %s1364_s17  ;;  %s1368_s18 = sphi %s1403_s18, %s13_s18   ;;  %s1364_s17 = sphi %s1401_s17, %s1574_s17   ;;  %s1360_s16 = sphi %s1399_s16, %s1573_s16   ;;  %s1356_s15 = sphi %s1397_s15, %s1572_s15   ;;  %s1352_s14 = sphi %s1395_s14, %s1571_s14   ;;  %s1348_s13 = sphi %s1393_s13, %s1570_s13   ;;  %s1344_s12 = sphi %s1391_s12, %s1569_s12  }
   0x5   : > { %p23_p0 = scmp.ge.s32.totalorder %s22_s19, 2  ;;  %p41_p1 = scmp.ne.s32.totalorder %s1348_s13, %s1344_s12 }
   0x6   : > { %p42_p2 = scmp.eq.s32.totalorder %s1368_s18, 0  ;;  %s34_s24 = sadd.s32 1, %s1348_s13 }
   0x7   : > { %s1576_s19 = smov (%p23_p0, %s22_s19), 0  ;;  %s1578_s20 = smov (!%p23_p0, %s25_s20), %s1364_s17 }
   0x8   : > { %p43_p3 = por %p42_p2, %p41_p1  ;;  %p27_p4 = scmp.ge.s32.totalorder %s1578_s20, 2 }
   0x9   : > { %s30_s21 = ssub.s32 %s1360_s16, %s1576_s19  ;;  %p1015_p6 = scmp.ge.s32.totalorder %s1368_s18, 4 }
   0xa   : > { %s1580_s20 = smov (%p27_p4, %s1578_s20), 0 }
   0xb   : > { %s29_s22 = ssub.s32 %s1364_s17, %s1580_s20  ;;  %143 = sbr.rel (%p1015_p6) target bundleno = 31 (0x1f), region = 20 }
   0xc   : > { %s31_s23 = sor.u32 %s30_s21, %s29_s22 }
   0xd   : > { %p32_p5 = scmp.eq.s32.totalorder %s31_s23, 0 }
   0xf   : > { %s1442_s25 = scalar_select %p32_p5, %s1348_s13, %s34_s24  }
  0x10   : > { %146 = sbr.rel (!%p43_p3) target bundleno = 31 (0x1f), region = 24  ;;  %s148_s26 = sand.u32 (%p43_p3), 1, %s1348_s13  }
  0x11   : > { %s1017_s27 = sshll.u32 (%p43_p3), %s1360_s16, 2  ;;  %s1016_s28 = sshll.u32 (%p43_p3), %s148_s26, 7 }
  0x12   : > { %s1018_s29 = sshll.u32 (%p43_p3), %s1364_s17, 6  ;;  %s150_s8 = scalar_lea.vmem (%p43_p3), [#allocation3], %s1016_s28 }
  0x13   : > { %s153_s30 = sadd.s32 (%p43_p3), %s1018_s29, %s1017_s27 }
  0x14   : > { %s1019_s4 = sshll.u32 (%p43_p3), %s153_s30, 2 }
  0x15   : > { %s1451_s7 = scalar_lea.vmem %s1565_s0, %s1019_s4 }
  0x16   : > { %v168_v0 = vld [vmem:[%s1451_s7] sm:$0xff]  ;;  %v170_v1 = vld [vmem:[%s1451_s7 + $0x8] sm:$0xff] }
  0x17   : > { %v172_v2 = vld [vmem:[%s1451_s7 + $0x20] sm:$0xff]  ;;  %169 = vst [vmem:[%s150_s8] sm:$0xff] %v168_v0  ;;  %171 = vst [vmem:[%s150_s8 + $0x8] sm:$0xff] %v170_v1  ;;  %v174_v3 = vld [vmem:[%s1451_s7 + $0x28] sm:$0xff] }
  0x18   : > { %173 = vst [vmem:[%s150_s8 + $0x10] sm:$0xff] %v172_v2  ;;  %v176_v4 = vld [vmem:[%s1451_s7 + $0x40] sm:$0xff]  ;;  %v178_v5 = vld [vmem:[%s1451_s7 + $0x48] sm:$0xff]  ;;  %175 = vst [vmem:[%s150_s8 + $0x18] sm:$0xff] %v174_v3 }
  0x19   : > { %177 = vst [vmem:[%s150_s8 + $0x20] sm:$0xff] %v176_v4  ;;  %179 = vst [vmem:[%s150_s8 + $0x28] sm:$0xff] %v178_v5  ;;  %v180_v6 = vld [vmem:[%s1451_s7 + $0x60] sm:$0xff]  ;;  %v182_v7 = vld [vmem:[%s1451_s7 + $0x68] sm:$0xff] }
  0x1a   : > { %v184_v8 = vld [vmem:[%s1451_s7 + $0x80] sm:$0xff]  ;;  %181 = vst [vmem:[%s150_s8 + $0x30] sm:$0xff] %v180_v6  ;;  %183 = vst [vmem:[%s150_s8 + $0x38] sm:$0xff] %v182_v7  ;;  %v186_v9 = vld [vmem:[%s1451_s7 + $0x88] sm:$0xff] }
  0x1b   : > { %185 = vst [vmem:[%s150_s8 + $0x40] sm:$0xff] %v184_v8  ;;  %v188_v10 = vld [vmem:[%s1451_s7 + $0xa0] sm:$0xff]  ;;  %v190_v11 = vld [vmem:[%s1451_s7 + $0xa8] sm:$0xff]  ;;  %187 = vst [vmem:[%s150_s8 + $0x48] sm:$0xff] %v186_v9 }
  0x1c   : > { %189 = vst [vmem:[%s150_s8 + $0x50] sm:$0xff] %v188_v10  ;;  %191 = vst [vmem:[%s150_s8 + $0x58] sm:$0xff] %v190_v11  ;;  %v192_v12 = vld [vmem:[%s1451_s7 + $0xc0] sm:$0xff]  ;;  %v194_v13 = vld [vmem:[%s1451_s7 + $0xc8] sm:$0xff] }
  0x1d   : > { %v196_v14 = vld [vmem:[%s1451_s7 + $0xe0] sm:$0xff]  ;;  %193 = vst [vmem:[%s150_s8 + $0x60] sm:$0xff] %v192_v12  ;;  %195 = vst [vmem:[%s150_s8 + $0x68] sm:$0xff] %v194_v13  ;;  %v198_v15 = vld [vmem:[%s1451_s7 + $0xe8] sm:$0xff] }
  0x1e   : > { %197 = vst [vmem:[%s150_s8 + $0x70] sm:$0xff] %v196_v14  ;;  %199 = vst [vmem:[%s150_s8 + $0x78] sm:$0xff] %v198_v15 }
  0x1f PF: > { %p1020_p7 = scmp.ge.s32.totalorder %s1368_s18, 1  ;;  %p213_p8 = scmp.lt.s32.totalorder %s1368_s18, 5 }
  0x21   : > { %p214_p9 = pnand %p1020_p7, %p213_p8 }
  0x22   : > { %s220_s9 = sand.u32 (!%p214_p9), 1, %s1344_s12   ;;  %s1022_s10 = sshll.u32 (!%p214_p9), %s1352_s14, 6 }
  0x23   : > { %217 = sbr.rel (%p214_p9) target bundleno = 411 (0x19b), region = 51  ;;  %s1021_s11 = sshll.u32 (!%p214_p9), %s220_s9, 7 }
  0x24   : > { %p250_p10 = scmp.lt.s32.totalorder (!%p214_p9), %s1022_s10, 127  ;;  %p255_p11 = scmp.lt.s32.totalorder (!%p214_p9), %s1356_s15, 1 }
  0x25   : > { %s1485_s30 = scalar_lea.vmem (!%p214_p9), [#allocation3], %s1021_s11  ;;  %p1026_p12 = scmp.ne.s32.totalorder (!%p214_p9), %s1352_s14, 0 }
  0x28   : > { %s1582_s10 = smov (!%p250_p10, %s1022_s10), 127  ;;  %s1584_s15 = smov (!%p255_p11, %s1356_s15), 1 }
  0x29   : > { %s1023_s21 = sshll.u32 %s1582_s10, 2  ;;  %s1087_s26 = sshll.u32 %s1584_s15, 5 }
  0x2a   : > { %s1478_s24 = scalar_lea.vmem %s1566_s1, %s1023_s21  ;;  %s1483_s29 = scalar_lea.vmem %s1568_s3, %s1087_s26 }
  0x2b   : > { %264 = sbr.rel (%p1026_p12) target bundleno = 53 (0x35), region = 59 }
  0x30   : > { %v1370_v16 = vmov 0.0  }
  0x31   : > { %265 = vst [vmem:[#allocation2 + $0x30] sm:$0xff] %v1370_v16  ;;  %266 = vst [vmem:[#allocation2] sm:$0xff] %v1370_v16 }
  0x32   : > { %267 = vst [vmem:[#allocation2 + $0x18] sm:$0xff] %v1370_v16  ;;  %268 = vst [vmem:[#allocation2 + $0x10] sm:$0xff] %v1370_v16 }
  0x33   : > { %269 = vst [vmem:[#allocation2 + $0x8] sm:$0xff] %v1370_v16  ;;  %270 = vst [vmem:[#allocation2 + $0x20] sm:$0xff] %v1370_v16 }
  0x34   : > { %271 = vst [vmem:[#allocation2 + $0x28] sm:$0xff] %v1370_v16  ;;  %272 = vst [vmem:[#allocation2 + $0x38] sm:$0xff] %v1370_v16 }
  0x35 PF: > { %v1256_v17 = vld [vmem:[%s1478_s24 + $0x78] sm:$0xff]   ;;  %v1260_v21 = vld [vmem:[%s1478_s24 + $0x70] sm:$0xff]   ;;  %v1264_v25 = vld [vmem:[%s1478_s24 + $0x68] sm:$0xff]   ;;  %p1075_p13 = scmp.ne.s32.totalorder %s1352_s14, 1 }
  0x36   : > { %v1257_v18 = vld [vmem:[%s1478_s24 + $0xf8] sm:$0xff]   ;;  %1119 = vmatprep.subr.bf16.mxu0 %v1256_v17  ;;  %v1261_v22 = vld [vmem:[%s1478_s24 + $0xf0] sm:$0xff]   ;;  %v1265_v26 = vld [vmem:[%s1478_s24 + $0xe8] sm:$0xff]  }
  0x37   : > { %v1258_v19 = vld [vmem:[%s1478_s24 + $0x38] sm:$0xff]   ;;  %1159 = vmatprep.subr.bf16.mxu1 %v1257_v18  ;;  %v1262_v23 = vld [vmem:[%s1478_s24 + $0x30] sm:$0xff]   ;;  %v1266_v27 = vld [vmem:[%s1478_s24 + $0x28] sm:$0xff]  }
  0x38   : > { %v1259_v20 = vld [vmem:[%s1478_s24 + $0xb8] sm:$0xff]   ;;  %1120 = vmatpush3.bf16.msra.mxu0 %v1258_v19  ;;  %v1263_v24 = vld [vmem:[%s1478_s24 + $0xb0] sm:$0xff]   ;;  %v1267_v28 = vld [vmem:[%s1478_s24 + $0xa8] sm:$0xff]  }
  0x39   : > { %1160 = vmatpush3.bf16.msra.mxu1 %v1259_v20  ;;  %1121 = vmatprep.subr.bf16.mxu0 %v1260_v21  ;;  %v1268_v29 = vld [vmem:[%s1478_s24 + $0x60] sm:$0xff]   ;;  %v1272_v33 = vld [vmem:[%s1478_s24 + $0x58] sm:$0xff]   ;;  %v1276_v37 = vld [vmem:[%s1478_s24 + $0x50] sm:$0xff]  }
  0x3a   : > { %1161 = vmatprep.subr.bf16.mxu1 %v1261_v22  ;;  %v1269_v30 = vld [vmem:[%s1478_s24 + $0xe0] sm:$0xff]   ;;  %v1273_v34 = vld [vmem:[%s1478_s24 + $0xd8] sm:$0xff]   ;;  %v1277_v38 = vld [vmem:[%s1478_s24 + $0xd0] sm:$0xff]  }
  0x3b   : > { %v1270_v31 = vld [vmem:[%s1478_s24 + $0x20] sm:$0xff]   ;;  %v1274_v35 = vld [vmem:[%s1478_s24 + $0x18] sm:$0xff]   ;;  %v1278_v39 = vld [vmem:[%s1478_s24 + $0x10] sm:$0xff]  }
  0x3c   : > { %1122 = vmatpush3.bf16.msra.mxu0 %v1262_v23  ;;  %v1271_v32 = vld [vmem:[%s1478_s24 + $0xa0] sm:$0xff]   ;;  %v1275_v36 = vld [vmem:[%s1478_s24 + $0x98] sm:$0xff]   ;;  %v1279_v40 = vld [vmem:[%s1478_s24 + $0x90] sm:$0xff]  }
  0x3d   : > { %1162 = vmatpush3.bf16.msra.mxu1 %v1263_v24  ;;  %1123 = vmatprep.subr.bf16.mxu0 %v1264_v25  ;;  %v1280_v41 = vld [vmem:[%s1478_s24 + $0x48] sm:$0xff]   ;;  %v1284_v45 = vld [vmem:[%s1478_s24 + $0x40] sm:$0xff]   ;;  %v273_v8 = vld [vmem:[#allocation2 + $0x30] sm:$0xff] }
  0x3e   : > { %1163 = vmatprep.subr.bf16.mxu1 %v1265_v26  ;;  %v1281_v42 = vld [vmem:[%s1478_s24 + $0xc8] sm:$0xff]   ;;  %v1285_v46 = vld [vmem:[%s1478_s24 + $0xc0] sm:$0xff]   ;;  %v275_v26 = vld [vmem:[#allocation2 + $0x18] sm:$0xff] }
  0x3f   : > { %v1282_v43 = vld [vmem:[%s1478_s24 + $0x8] sm:$0xff]   ;;  %v1286_v47 = vld [vmem:[%s1478_s24] sm:$0xff]  }
  0x40   : > { %1124 = vmatpush3.bf16.msra.mxu0 %v1266_v27  ;;  %v1283_v44 = vld [vmem:[%s1478_s24 + $0x88] sm:$0xff]   ;;  %v1287_v48 = vld [vmem:[%s1478_s24 + $0x80] sm:$0xff]  }
  0x41   : > { %1164 = vmatpush3.bf16.msra.mxu1 %v1267_v28  ;;  %1125 = vmatprep.subr.bf16.mxu0 %v1268_v29  ;;  %v1288_v49 = vld [vmem:[%s1485_s30] ss:$16 sps:$4 sm:$0xff]   ;;  %v1290_v50 = vld [vmem:[%s1485_s30 + $0x4] ss:$16 sps:$4 sm:$0xff]   ;;  %v1291_v51 = vld [vmem:[%s1485_s30 + $0x8] ss:$16 sps:$4 sm:$0xff]  }
  0x42   : > { %1165 = vmatprep.subr.bf16.mxu1 %v1269_v30  ;;  %v1293_v52 = vld [vmem:[%s1485_s30 + $0xc] ss:$16 sps:$4 sm:$0xff]   ;;  %665 = vmatprep.mubr.bf16.mxu0 %v1290_v50  ;;  %v1294_v53 = vld [vmem:[%s1485_s30 + $0x24] ss:$16 sps:$4 sm:$0xff]   ;;  %v1298_v55 = vld [vmem:[%s1485_s30 + $0x20] ss:$16 sps:$4 sm:$0xff]  }
  0x43   : > { %730 = vmatprep.mubr.bf16.mxu1 %v1293_v52  ;;  %v1296_v54 = vld [vmem:[%s1485_s30 + $0x2c] ss:$16 sps:$4 sm:$0xff]   ;;  %v1299_v56 = vld [vmem:[%s1485_s30 + $0x28] ss:$16 sps:$4 sm:$0xff]   ;;  %v1300_v57 = vld [vmem:[%s1485_s30 + $0x44] ss:$16 sps:$4 sm:$0xff]  }
  0x44   : > { %1126 = vmatpush3.bf16.msra.mxu0 %v1270_v31  ;;  %v1302_v58 = vld [vmem:[%s1485_s30 + $0x4c] ss:$16 sps:$4 sm:$0xff]   ;;  %v1304_v59 = vld [vmem:[%s1485_s30 + $0x40] ss:$16 sps:$4 sm:$0xff]   ;;  %v1305_v60 = vld [vmem:[%s1485_s30 + $0x48] ss:$16 sps:$4 sm:$0xff]  }
  0x45   : > { %1166 = vmatpush3.bf16.msra.mxu1 %v1271_v32  ;;  %1127 = vmatprep.subr.bf16.mxu0 %v1272_v33  ;;  %v1306_v61 = vld [vmem:[%s1485_s30 + $0x64] ss:$16 sps:$4 sm:$0xff]   ;;  %v1308_v62 = vld [vmem:[%s1485_s30 + $0x6c] ss:$16 sps:$4 sm:$0xff]   ;;  %v1310_v63 = vld [vmem:[%s1485_s30 + $0x60] ss:$16 sps:$4 sm:$0xff]  }
  0x46   : > { %1167 = vmatprep.subr.bf16.mxu1 %v1273_v34  ;;  %v1311_v0 = vld [vmem:[%s1485_s30 + $0x68] ss:$16 sps:$4 sm:$0xff]   ;;  %v274_v17 = vld [vmem:[#allocation2] sm:$0xff] }
  0x48   : > { %1128 = vmatpush3.bf16.msra.mxu0 %v1274_v35  ;;  %v276_v35 = vld [vmem:[#allocation2 + $0x10] sm:$0xff] }
  0x49   : > { %1168 = vmatpush3.bf16.msra.mxu1 %v1275_v36  ;;  %1129 = vmatprep.subr.bf16.mxu0 %v1276_v37 }
  0x4a   : > { %1169 = vmatprep.subr.bf16.mxu1 %v1277_v38 }
  0x4c   : > { %1130 = vmatpush3.bf16.msra.mxu0 %v1278_v39 }
  0x4d   : > { %1170 = vmatpush3.bf16.msra.mxu1 %v1279_v40  ;;  %1131 = vmatprep.subr.bf16.mxu0 %v1280_v41 }
  0x4e   : > { %1171 = vmatprep.subr.bf16.mxu1 %v1281_v42 }
  0x50   : > { %1132 = vmatpush3.bf16.msra.mxu0 %v1282_v43 }
  0x51   : > { %1172 = vmatpush3.bf16.msra.mxu1 %v1283_v44  ;;  %1133 = vmatprep.subr.bf16.mxu0 %v1284_v45  ;;  %v277_v44 = vld [vmem:[#allocation2 + $0x8] sm:$0xff] }
  0x52   : > { %1173 = vmatprep.subr.bf16.mxu1 %v1285_v46 }
  0x54   : > { %1134 = vmatpush3.bf16.msra.mxu0 %v1286_v47 }
  0x55   : > { %1174 = vmatpush3.bf16.msra.mxu1 %v1287_v48 }
  0x57   : > { %666 = vmatmul.mubr.bf16.vlgmr.msra.gmra.mxu0 %v1288_v49 }
  0x58   : > { %731 = vmatmul.mubr.bf16.vlgmr.msra.gmra.mxu1 %v1291_v51  ;;  %673 = vmatprep.mubr.bf16.mxu0 %v1294_v53  ;;  %v278_v53 = vld [vmem:[#allocation2 + $0x20] sm:$0xff] }
  0x59   : > { %738 = vmatprep.mubr.bf16.mxu1 %v1296_v54 }
  0x5f   : > { %674 = vmatmul.mubr.bf16.gmra.mxu0 %v1298_v55 }
  0x60   : > { %739 = vmatmul.mubr.bf16.gmra.mxu1 %v1299_v56  ;;  %681 = vmatprep.mubr.bf16.mxu0 %v1300_v57 }
  0x61   : > { %746 = vmatprep.mubr.bf16.mxu1 %v1302_v58 }
  0x67   : > { %682 = vmatmul.mubr.bf16.gmra.mxu0 %v1304_v59 }
  0x68   : > { %747 = vmatmul.mubr.bf16.gmra.mxu1 %v1305_v60  ;;  %689 = vmatprep.mubr.bf16.mxu0 %v1306_v61 }
  0x69   : > { %754 = vmatprep.mubr.bf16.mxu1 %v1308_v62  ;;  %v279_v62 = vld [vmem:[#allocation2 + $0x28] sm:$0xff] }
  0x6f   : > { %690 = vmatmul.mubr.bf16.gmra.mxu0 %v1310_v63 }
  0x70   : > { %755 = vmatmul.mubr.bf16.gmra.mxu1 %v1311_v0 }
 0x117   : > { %v1135_v1 = vpop.f32.mrf.mxu0 }
 0x118   : > { %v1175_v2 = vpop.f32.mrf.mxu1 }
 0x119   : > { %v1136_v3 = vpop.f32.mrf.mxu0 }
 0x11a   : > { %v1137_v4 = vadd.f32 %v1136_v3, %v1135_v1  ;;  %v1176_v5 = vpop.f32.mrf.mxu1 }
 0x11b   : > { %v1177_v6 = vadd.f32 %v1176_v5, %v1175_v2  ;;  %v1138_v7 = vpop.f32.mrf.mxu0 }
 0x11c   : > { %v1178_v9 = vpop.f32.mrf.mxu1 }
 0x11d   : > { %v733_v10 = vadd.f32 %v1177_v6, %v1137_v4  ;;  %v1139_v11 = vpop.f32.mrf.mxu0  ;;  %v280_v6 = vld [vmem:[#allocation2 + $0x38] sm:$0xff] }
 0x11e   : > { %v1140_v12 = vadd.f32 %v1139_v11, %v1138_v7  ;;  %v1179_v13 = vpop.f32.mrf.mxu1 }
 0x11f   : > { %v763_v14 = vadd.f32 %v733_v10, %v273_v8  ;;  %v1180_v15 = vadd.f32 %v1179_v13, %v1178_v9  ;;  %v1141_v16 = vpop.f32.mrf.mxu0 }
 0x120   : > { %v1181_v18 = vpop.f32.mrf.mxu1 }
 0x121   : > { %771 = vst [vmem:[#allocation2 + $0x30] sm:$0xff] %v763_v14  ;;  %v736_v19 = vadd.f32 %v1180_v15, %v1140_v12  ;;  %v1142_v20 = vpop.f32.mrf.mxu0 }
 0x122   : > { %v1143_v21 = vadd.f32 %v1142_v20, %v1141_v16  ;;  %v1182_v22 = vpop.f32.mrf.mxu1 }
 0x123   : > { %v764_v23 = vadd.f32 %v736_v19, %v274_v17  ;;  %v1183_v24 = vadd.f32 %v1182_v22, %v1181_v18  ;;  %v1144_v25 = vpop.f32.mrf.mxu0 }
 0x124   : > { %v1184_v27 = vpop.f32.mrf.mxu1 }
 0x125   : > { %772 = vst [vmem:[#allocation2] sm:$0xff] %v764_v23  ;;  %v741_v28 = vadd.f32 %v1183_v24, %v1143_v21  ;;  %v1145_v29 = vpop.f32.mrf.mxu0 }
 0x126   : > { %v1146_v30 = vadd.f32 %v1145_v29, %v1144_v25  ;;  %v1185_v31 = vpop.f32.mrf.mxu1 }
 0x127   : > { %v765_v32 = vadd.f32 %v741_v28, %v275_v26  ;;  %v1186_v33 = vadd.f32 %v1185_v31, %v1184_v27  ;;  %v1147_v34 = vpop.f32.mrf.mxu0 }
 0x128   : > { %v1187_v36 = vpop.f32.mrf.mxu1 }
 0x129   : > { %773 = vst [vmem:[#allocation2 + $0x18] sm:$0xff] %v765_v32  ;;  %v744_v37 = vadd.f32 %v1186_v33, %v1146_v30  ;;  %v1148_v38 = vpop.f32.mrf.mxu0 }
 0x12a   : > { %v1149_v39 = vadd.f32 %v1148_v38, %v1147_v34  ;;  %v1188_v40 = vpop.f32.mrf.mxu1 }
 0x12b   : > { %v766_v41 = vadd.f32 %v744_v37, %v276_v35  ;;  %v1189_v42 = vadd.f32 %v1188_v40, %v1187_v36  ;;  %v1150_v43 = vpop.f32.mrf.mxu0 }
 0x12c   : > { %v1190_v45 = vpop.f32.mrf.mxu1 }
 0x12d   : > { %774 = vst [vmem:[#allocation2 + $0x10] sm:$0xff] %v766_v41  ;;  %v749_v46 = vadd.f32 %v1189_v42, %v1149_v39  ;;  %v1151_v47 = vpop.f32.mrf.mxu0 }
 0x12e   : > { %v1152_v48 = vadd.f32 %v1151_v47, %v1150_v43  ;;  %v1191_v49 = vpop.f32.mrf.mxu1 }
 0x12f   : > { %v767_v50 = vadd.f32 %v749_v46, %v277_v44  ;;  %v1192_v51 = vadd.f32 %v1191_v49, %v1190_v45  ;;  %v1153_v52 = vpop.f32.mrf.mxu0 }
 0x130   : > { %v1193_v54 = vpop.f32.mrf.mxu1 }
 0x131   : > { %775 = vst [vmem:[#allocation2 + $0x8] sm:$0xff] %v767_v50  ;;  %v752_v55 = vadd.f32 %v1192_v51, %v1152_v48  ;;  %v1154_v56 = vpop.f32.mrf.mxu0 }
 0x132   : > { %v1155_v57 = vadd.f32 %v1154_v56, %v1153_v52  ;;  %v1194_v58 = vpop.f32.mrf.mxu1 }
 0x133   : > { %v768_v59 = vadd.f32 %v752_v55, %v278_v53  ;;  %v1195_v60 = vadd.f32 %v1194_v58, %v1193_v54  ;;  %v1156_v61 = vpop.f32.mrf.mxu0 }
 0x134   : > { %v1196_v63 = vpop.f32.mrf.mxu1 }
 0x135   : > { %776 = vst [vmem:[#allocation2 + $0x20] sm:$0xff] %v768_v59  ;;  %v757_v0 = vadd.f32 %v1195_v60, %v1155_v57  ;;  %v1157_v1 = vpop.f32.mrf.mxu0 }
 0x136   : > { %v1158_v2 = vadd.f32 %v1157_v1, %v1156_v61  ;;  %v1197_v3 = vpop.f32.mrf.mxu1 }
 0x137   : > { %v769_v4 = vadd.f32 %v757_v0, %v279_v62  ;;  %v1198_v5 = vadd.f32 %v1197_v3, %v1196_v63 }
 0x139   : > { %777 = vst [vmem:[#allocation2 + $0x28] sm:$0xff] %v769_v4  ;;  %v760_v7 = vadd.f32 %v1198_v5, %v1158_v2  ;;  %782 = sbr.rel (%p1075_p13) target bundleno = 411 (0x19b), region = 63 }
 0x13b   : > { %v770_v8 = vadd.f32 %v760_v7, %v280_v6 }
 0x13d   : > { %778 = vst [vmem:[#allocation2 + $0x38] sm:$0xff] %v770_v8 }
 0x13e   : > { %v783_v9 = vld [vmem:[#allocation2 + $0x30] sm:$0xff]  ;;  %v784_v10 = vld [vmem:[#allocation2] sm:$0xff]  ;;  %v785_v11 = vld [vmem:[#allocation2 + $0x18] sm:$0xff] }
 0x13f   : > { %v786_v12 = vld [vmem:[#allocation2 + $0x10] sm:$0xff]  ;;  %v1076_v13 = vld [vmem:[%s1567_s2] ss:$0 sm:$0xff]  ;;  %v787_v17 = vld [vmem:[#allocation2 + $0x8] sm:$0xff] }
 0x140   : > { %v798_v14 = vadd.f32 %v1076_v13, %v783_v9  ;;  %v799_v15 = vadd.f32 %v1076_v13, %v784_v10  ;;  %v800_v16 = vadd.f32 %v1076_v13, %v785_v11  ;;  %v801_v18 = vadd.f32 %v1076_v13, %v786_v12  ;;  %v788_v20 = vld [vmem:[#allocation2 + $0x20] sm:$0xff]  ;;  %v789_v23 = vld [vmem:[#allocation2 + $0x28] sm:$0xff] }
 0x141   : > { %v802_v21 = vadd.f32 %v1076_v13, %v787_v17  ;;  %v803_v24 = vadd.f32 %v1076_v13, %v788_v20  ;;  %v804_v27 = vadd.f32 %v1076_v13, %v789_v23 }
 0x142   : > { %v806_v19 = vadd.f32 %v799_v15, %v798_v14 }
 0x144   : > { %v807_v22 = vadd.f32 %v806_v19, %v800_v16  ;;  %v790_v26 = vld [vmem:[#allocation2 + $0x38] sm:$0xff] }
 0x145   : > { %v805_v29 = vadd.f32 %v1076_v13, %v790_v26 }
 0x146   : > { %v808_v25 = vadd.f32 %v807_v22, %v801_v18 }
 0x148   : > { %v809_v28 = vadd.f32 %v808_v25, %v802_v21 }
 0x14a   : > { %v810_v30 = vadd.f32 %v809_v28, %v803_v24 }
 0x14c   : > { %v811_v31 = vadd.f32 %v810_v30, %v804_v27 }
 0x14e   : > { %v812_v32 = vadd.f32 %v811_v31, %v805_v29 }
 0x150   : > { %v813_v33 = vrot.slane %v812_v32, 4 }
 0x152   : > { %v814_v34 = vadd.f32 %v813_v33, %v812_v32 }
 0x154   : > { %v815_v35 = vrot.slane %v814_v34, 2 }
 0x156   : > { %v816_v36 = vadd.f32 %v815_v35, %v814_v34 }
 0x158   : > { %v817_v37 = vrot.slane %v816_v36, 1 }
 0x15a   : > { %v818_v38 = vadd.f32 %v817_v37, %v816_v36 }
 0x15c   : > { %v820_v39 = vmul.f32 0.015625, %v818_v38 }
 0x15e   : > { %v821_v40 = vsub.f32 %v798_v14, %v820_v39  ;;  %v822_v41 = vsub.f32 %v799_v15, %v820_v39  ;;  %v823_v42 = vsub.f32 %v800_v16, %v820_v39  ;;  %v824_v43 = vsub.f32 %v801_v18, %v820_v39 }
 0x15f   : > { %v825_v44 = vsub.f32 %v802_v21, %v820_v39  ;;  %v826_v48 = vsub.f32 %v803_v24, %v820_v39  ;;  %v827_v51 = vsub.f32 %v804_v27, %v820_v39  ;;  %v828_v54 = vsub.f32 %v805_v29, %v820_v39 }
 0x160   : > { %v829_v45 = vmul.f32 %v821_v40, %v821_v40  ;;  %v830_v46 = vmul.f32 %v822_v41, %v822_v41  ;;  %v831_v47 = vmul.f32 %v823_v42, %v823_v42  ;;  %v832_v49 = vmul.f32 %v824_v43, %v824_v43 }
 0x161   : > { %v833_v52 = vmul.f32 %v825_v44, %v825_v44  ;;  %v834_v55 = vmul.f32 %v826_v48, %v826_v48  ;;  %v835_v57 = vmul.f32 %v827_v51, %v827_v51  ;;  %v836_v59 = vmul.f32 %v828_v54, %v828_v54 }
 0x162   : > { %v837_v50 = vadd.f32 %v830_v46, %v829_v45 }
 0x164   : > { %v838_v53 = vadd.f32 %v837_v50, %v831_v47 }
 0x166   : > { %v839_v56 = vadd.f32 %v838_v53, %v832_v49 }
 0x168   : > { %v840_v58 = vadd.f32 %v839_v56, %v833_v52 }
 0x16a   : > { %v841_v60 = vadd.f32 %v840_v58, %v834_v55 }
 0x16c   : > { %v842_v61 = vadd.f32 %v841_v60, %v835_v57 }
 0x16e   : > { %v843_v62 = vadd.f32 %v842_v61, %v836_v59 }
 0x170   : > { %v844_v63 = vrot.slane %v843_v62, 4 }
 0x172   : > { %v845_v0 = vadd.f32 %v844_v63, %v843_v62 }
 0x174   : > { %v846_v1 = vrot.slane %v845_v0, 2 }
 0x176   : > { %v847_v2 = vadd.f32 %v846_v1, %v845_v0 }
 0x178   : > { %v848_v3 = vrot.slane %v847_v2, 1 }
 0x17a   : > { %v849_v4 = vadd.f32 %v848_v3, %v847_v2 }
 0x17c   : > { %v850_v5 = vmul.f32 0.015625, %v849_v4 }
 0x17e   : > { %v851_v6 = vadd.f32 1e-05, %v850_v5 }
 0x180   : > { %1312 = vrsqrt.f32 %v851_v6 }
 0x18d   : > { %v1313_v7 = vpop.eup %1312 }
 0x18e   : > { %v853_v8 = vmul.f32 %v1313_v7, %v821_v40  ;;  %v854_v9 = vmul.f32 %v1313_v7, %v822_v41  ;;  %v855_v10 = vmul.f32 %v1313_v7, %v823_v42  ;;  %v856_v11 = vmul.f32 %v1313_v7, %v824_v43 }
 0x18f   : > { %v857_v12 = vmul.f32 %v1313_v7, %v825_v44  ;;  %v858_v13 = vmul.f32 %v1313_v7, %v826_v48  ;;  %v859_v14 = vmul.f32 %v1313_v7, %v827_v51  ;;  %v860_v15 = vmul.f32 %v1313_v7, %v828_v54 }
 0x190   : > { %vm861_vm0 = vcmp.ge.f32.partialorder %v853_v8, 0.0  ;;  %vm862_vm1 = vcmp.ge.f32.partialorder %v854_v9, 0.0  ;;  %v869_v16 = vmul.f32 0.2, %v853_v8  ;;  %v870_v17 = vmul.f32 0.2, %v854_v9 }
 0x191   : > { %vm863_vm2 = vcmp.ge.f32.partialorder %v855_v10, 0.0  ;;  %vm864_vm3 = vcmp.ge.f32.partialorder %v856_v11, 0.0  ;;  %v871_v18 = vmul.f32 0.2, %v855_v10  ;;  %v872_v19 = vmul.f32 0.2, %v856_v11 }
 0x192   : > { %v877_v20 = vsel %vm861_vm0, %v853_v8, %v869_v16  ;;  %v878_v21 = vsel %vm862_vm1, %v854_v9, %v870_v17  ;;  %vm865_vm4 = vcmp.ge.f32.partialorder %v857_v12, 0.0  ;;  %vm866_vm5 = vcmp.ge.f32.partialorder %v858_v13, 0.0 }
 0x193   : > { %v1099_v22 = vpack.c.bf16 %v878_v21, %v877_v20  ;;  %v879_v23 = vsel %vm863_vm2, %v855_v10, %v871_v18  ;;  %v880_v24 = vsel %vm864_vm3, %v856_v11, %v872_v19  ;;  %v873_v25 = vmul.f32 0.2, %v857_v12 }
 0x194   : > { %v1104_v26 = vpack.c.bf16 %v880_v24, %v879_v23  ;;  %v874_v27 = vmul.f32 0.2, %v858_v13  ;;  %vm867_vm6 = vcmp.ge.f32.partialorder %v859_v14, 0.0  ;;  %vm868_vm7 = vcmp.ge.f32.partialorder %v860_v15, 0.0 }
 0x195   : > { %1100 = vst [vmem:[%s1483_s29] sm:$0xff] %v1099_v22   ;;  %v881_v28 = vsel %vm865_vm4, %v857_v12, %v873_v25  ;;  %v875_v29 = vmul.f32 0.2, %v859_v14  ;;  %v876_v30 = vmul.f32 0.2, %v860_v15 }
 0x196   : > { %1116 = vst [vmem:[%s1483_s29 + $0x8] sm:$0xff] %v1104_v26   ;;  %v882_v31 = vsel %vm866_vm5, %v858_v13, %v874_v27 }
 0x197   : > { %v1109_v32 = vpack.c.bf16 %v882_v31, %v881_v28  ;;  %v883_v33 = vsel %vm867_vm6, %v859_v14, %v875_v29  ;;  %v884_v34 = vsel %vm868_vm7, %v860_v15, %v876_v30 }
 0x198   : > { %v1114_v35 = vpack.c.bf16 %v884_v34, %v883_v33 }
 0x199   : > { %1117 = vst [vmem:[%s1483_s29 + $0x10] sm:$0xff] %v1109_v32  }
 0x19a   : > { %1118 = vst [vmem:[%s1483_s29 + $0x18] sm:$0xff] %v1114_v35  }
 0x19b PF: > { %s13_s18 = sadd.s32 1, %s1368_s18   ;;  %s1569_s12 = smov %s1348_s13 }
 0x19c   : > { %p10_p0 = scmp.ge.s32.totalorder %s13_s18, 6   ;;  %s1570_s13 = smov %s1442_s25 }
 0x19d   : > { %s1571_s14 = smov %s1360_s16  ;;  %s1572_s15 = smov %s1364_s17 }
 0x19e   : > { %s1573_s16 = smov %s1576_s19  ;;  %s1574_s17 = smov %s1580_s20 }
 0x19f   :  { %12 = sbr.rel (!%p10_p0) target bundleno = 4 (0x4), region = 101 }

// kernel: discriminator_forward.7
= control target key start
LH: loop header
LB: loop body
LE: loop exit
PB: predicated region body
PF: predicated region fallthrough
CT: control target
= control target key end

     0   :  { %s1272_s12 = smov 0   ;;  %s1274_s13 = smov 0   ;;  %s1446_s0 = inlined_call_operand.vmem [shape: bf16[2,16,2048], index: 0, kind: input, shape index: {}]   ;;  %s1447_s1 = inlined_call_operand.vmem [shape: bf16[2048,256], index: 1, kind: input, shape index: {}]   ;;  %s1448_s2 = inlined_call_operand.vmem [shape: f32[1,256], index: 2, kind: input, shape index: {}]   ;;  %s1449_s3 = inlined_call_operand.vmem [shape: bf16[2,16,256], index: 3, kind: output, shape index: {}]  }
   0x1   :  { %s1276_s14 = smov 0   ;;  %s1278_s15 = smov 0  }
   0x2   :  { %s1280_s16 = smov 0   ;;  %s1282_s17 = smov 0  }
   0x3   :  { %s1284_s18 = smov 0  }
   0x4 LB: > { %s22_s19 = sadd.s32 1, %s1241_s16  ;;  %s25_s20 = sadd.s32 1, %s1245_s17  ;;  %s1249_s18 = sphi %s1284_s18, %s13_s18   ;;  %s1245_s17 = sphi %s1282_s17, %s1455_s17   ;;  %s1241_s16 = sphi %s1280_s16, %s1454_s16   ;;  %s1237_s15 = sphi %s1278_s15, %s1453_s15   ;;  %s1233_s14 = sphi %s1276_s14, %s1452_s14   ;;  %s1229_s13 = sphi %s1274_s13, %s1451_s13   ;;  %s1225_s12 = sphi %s1272_s12, %s1450_s12  }
   0x5   : > { %p23_p0 = scmp.ge.s32.totalorder %s22_s19, 4  ;;  %p41_p1 = scmp.ne.s32.totalorder %s1229_s13, %s1225_s12 }
   0x6   : > { %p42_p2 = scmp.eq.s32.totalorder %s1249_s18, 0  ;;  %s34_s24 = sadd.s32 1, %s1229_s13 }
   0x7   : > { %s1457_s19 = smov (%p23_p0, %s22_s19), 0  ;;  %s1459_s20 = smov (!%p23_p0, %s25_s20), %s1245_s17 }
   0x8   : > { %p43_p3 = por %p42_p2, %p41_p1  ;;  %p27_p4 = scmp.ge.s32.totalorder %s1459_s20, 2 }
   0x9   : > { %s30_s21 = ssub.s32 %s1241_s16, %s1457_s19  ;;  %p942_p6 = scmp.ge.s32.totalorder %s1249_s18, 8 }
   0xa   : > { %s1461_s20 = smov (%p27_p4, %s1459_s20), 0 }
   0xb   : > { %s29_s22 = ssub.s32 %s1245_s17, %s1461_s20  ;;  %143 = sbr.rel (%p942_p6) target bundleno = 25 (0x19), region = 20 }
   0xc   : > { %s31_s23 = sor.u32 %s30_s21, %s29_s22 }
   0xd   : > { %p32_p5 = scmp.eq.s32.totalorder %s31_s23, 0 }
   0xf   : > { %s1323_s25 = scalar_select %p32_p5, %s1229_s13, %s34_s24  }
  0x10   : > { %146 = sbr.rel (!%p43_p3) target bundleno = 25 (0x19), region = 24  ;;  %s148_s26 = sand.u32 (%p43_p3), 1, %s1229_s13  }
  0x11   : > { %s944_s27 = sshll.u32 (%p43_p3), %s1241_s16, 2  ;;  %s943_s28 = sshll.u32 (%p43_p3), %s148_s26, 5 }
  0x12   : > { %s945_s29 = sshll.u32 (%p43_p3), %s1245_s17, 5  ;;  %s150_s8 = scalar_lea.vmem (%p43_p3), [#allocation3], %s943_s28 }
  0x13   : > { %s153_s30 = sadd.s32 (%p43_p3), %s945_s29, %s944_s27 }
  0x14   : > { %s946_s4 = sshll.u32 (%p43_p3), %s153_s30, 2 }
  0x15   : > { %s155_s7 = scalar_lea.vmem %s1446_s0, %s946_s4 }
  0x16   : > { %v168_v0 = vld [vmem:[%s155_s7] sm:$0xff]  ;;  %v170_v1 = vld [vmem:[%s155_s7 + $0x8] sm:$0xff] }
  0x17   : > { %v172_v2 = vld [vmem:[%s155_s7 + $0x40] sm:$0xff]  ;;  %169 = vst [vmem:[%s150_s8] sm:$0xff] %v168_v0  ;;  %171 = vst [vmem:[%s150_s8 + $0x8] sm:$0xff] %v170_v1  ;;  %v174_v3 = vld [vmem:[%s155_s7 + $0x48] sm:$0xff] }
  0x18   : > { %173 = vst [vmem:[%s150_s8 + $0x10] sm:$0xff] %v172_v2  ;;  %175 = vst [vmem:[%s150_s8 + $0x18] sm:$0xff] %v174_v3 }
  0x19 PF: > { %p947_p7 = scmp.ge.s32.totalorder %s1249_s18, 1  ;;  %p190_p8 = scmp.lt.s32.totalorder %s1249_s18, 9 }
  0x1b   : > { %p191_p9 = pnand %p947_p7, %p190_p8 }
  0x1c   : > { %s197_s9 = sand.u32 (!%p191_p9), 1, %s1225_s12   ;;  %s949_s10 = sshll.u32 (!%p191_p9), %s1233_s14, 6 }
  0x1d   : > { %194 = sbr.rel (%p191_p9) target bundleno = 386 (0x182), region = 51  ;;  %s948_s11 = sshll.u32 (!%p191_p9), %s197_s9, 5 }
  0x1e   : > { %p228_p10 = scmp.lt.s32.totalorder (!%p191_p9), %s949_s10, 255  ;;  %p234_p11 = scmp.lt.s32.totalorder (!%p191_p9), %s1237_s15, 1 }
  0x1f   : > { %s1348_s30 = scalar_lea.vmem (!%p191_p9), [#allocation3], %s948_s11  ;;  %p954_p12 = scmp.ne.s32.totalorder (!%p191_p9), %s1233_s14, 0 }
  0x22   : > { %s1463_s10 = smov (!%p228_p10, %s949_s10), 255  ;;  %s1465_s15 = smov (!%p234_p11, %s1237_s15), 1 }
  0x23   : > { %s1028_s21 = sshll.u32 %s1463_s10, 3  ;;  %s1029_s26 = sshll.u32 %s1465_s15, 4 }
  0x24   : > { %s1341_s24 = scalar_lea.vmem %s1447_s1, %s1028_s21  ;;  %s1346_s29 = scalar_lea.vmem %s1449_s3, %s1029_s26 }
  0x25   : > { %242 = sbr.rel (%p954_p12) target bundleno = 45 (0x2d), region = 59 }
  0x2a   : > { %v1251_v4 = vmov 0.0  }
  0x2b   : > { %243 = vst [vmem:[#allocation2 + $0x10] sm:$0xff] %v1251_v4  ;;  %244 = vst [vmem:[#allocation2] sm:$0xff] %v1251_v4 }
  0x2c   : > { %245 = vst [vmem:[#allocation2 + $0x18] sm:$0xff] %v1251_v4  ;;  %246 = vst [vmem:[#allocation2 + $0x8] sm:$0xff] %v1251_v4 }
  0x2d PF: > { %v1089_v5 = vld [vmem:[%s1341_s24 + $0x74] ss:$8 sps:$4 sm:$0xff]   ;;  %v1093_v7 = vld [vmem:[%s1341_s24 + $0x70] ss:$8 sps:$4 sm:$0xff]   ;;  %v1095_v9 = vld [vmem:[%s1341_s24 + $0x64] ss:$8 sps:$4 sm:$0xff]  }
  0x2e   : > { %v1091_v6 = vld [vmem:[%s1341_s24 + $0x174] ss:$8 sps:$4 sm:$0xff]   ;;  %659 = vmatprep.subr.bf16.mxu0 %v1089_v5  ;;  %v1094_v8 = vld [vmem:[%s1341_s24 + $0x170] ss:$8 sps:$4 sm:$0xff]   ;;  %v1097_v10 = vld [vmem:[%s1341_s24 + $0x164] ss:$8 sps:$4 sm:$0xff]  }
  0x2f   : > { %702 = vmatprep.subr.bf16.mxu1 %v1091_v6  ;;  %660 = vmatpush1.bf16.msra.mxu0 %v1093_v7  ;;  %v1099_v11 = vld [vmem:[%s1341_s24 + $0x60] ss:$8 sps:$4 sm:$0xff]   ;;  %v1101_v13 = vld [vmem:[%s1341_s24 + $0x54] ss:$8 sps:$4 sm:$0xff]   ;;  %v1105_v15 = vld [vmem:[%s1341_s24 + $0x50] ss:$8 sps:$4 sm:$0xff]  }
  0x30   : > { %703 = vmatpush1.bf16.msra.mxu1 %v1094_v8  ;;  %661 = vmatprep.subr.bf16.mxu0 %v1095_v9  ;;  %v1100_v12 = vld [vmem:[%s1341_s24 + $0x160] ss:$8 sps:$4 sm:$0xff]   ;;  %v1103_v14 = vld [vmem:[%s1341_s24 + $0x154] ss:$8 sps:$4 sm:$0xff]   ;;  %v1106_v16 = vld [vmem:[%s1341_s24 + $0x150] ss:$8 sps:$4 sm:$0xff]  }
  0x31   : > { %704 = vmatprep.subr.bf16.mxu1 %v1097_v10  ;;  %v1107_v17 = vld [vmem:[%s1341_s24 + $0x44] ss:$8 sps:$4 sm:$0xff]   ;;  %v1111_v19 = vld [vmem:[%s1341_s24 + $0x40] ss:$8 sps:$4 sm:$0xff]   ;;  %v1113_v21 = vld [vmem:[%s1341_s24 + $0x34] ss:$8 sps:$4 sm:$0xff]  }
  0x32   : > { %v1109_v18 = vld [vmem:[%s1341_s24 + $0x144] ss:$8 sps:$4 sm:$0xff]   ;;  %v1112_v20 = vld [vmem:[%s1341_s24 + $0x140] ss:$8 sps:$4 sm:$0xff]   ;;  %v1115_v22 = vld [vmem:[%s1341_s24 + $0x134] ss:$8 sps:$4 sm:$0xff]  }
  0x33   : > { %662 = vmatpush1.bf16.msra.mxu0 %v1099_v11  ;;  %v1117_v23 = vld [vmem:[%s1341_s24 + $0x30] ss:$8 sps:$4 sm:$0xff]   ;;  %v1119_v25 = vld [vmem:[%s1341_s24 + $0x24] ss:$8 sps:$4 sm:$0xff]   ;;  %v1123_v27 = vld [vmem:[%s1341_s24 + $0x20] ss:$8 sps:$4 sm:$0xff]  }
  0x34   : > { %705 = vmatpush1.bf16.msra.mxu1 %v1100_v12  ;;  %663 = vmatprep.subr.bf16.mxu0 %v1101_v13  ;;  %v1118_v24 = vld [vmem:[%s1341_s24 + $0x130] ss:$8 sps:$4 sm:$0xff]   ;;  %v1121_v26 = vld [vmem:[%s1341_s24 + $0x124] ss:$8 sps:$4 sm:$0xff]   ;;  %v1124_v28 = vld [vmem:[%s1341_s24 + $0x120] ss:$8 sps:$4 sm:$0xff]  }
  0x35   : > { %706 = vmatprep.subr.bf16.mxu1 %v1103_v14  ;;  %v1125_v29 = vld [vmem:[%s1341_s24 + $0x14] ss:$8 sps:$4 sm:$0xff]   ;;  %v1129_v31 = vld [vmem:[%s1341_s24 + $0x10] ss:$8 sps:$4 sm:$0xff]   ;;  %v1131_v33 = vld [vmem:[%s1341_s24 + $0x4] ss:$8 sps:$4 sm:$0xff]  }
  0x36   : > { %v1127_v30 = vld [vmem:[%s1341_s24 + $0x114] ss:$8 sps:$4 sm:$0xff]   ;;  %v1130_v32 = vld [vmem:[%s1341_s24 + $0x110] ss:$8 sps:$4 sm:$0xff]   ;;  %v1133_v34 = vld [vmem:[%s1341_s24 + $0x104] ss:$8 sps:$4 sm:$0xff]  }
  0x37   : > { %664 = vmatpush1.bf16.msra.mxu0 %v1105_v15  ;;  %v1135_v35 = vld [vmem:[%s1341_s24] ss:$8 sps:$4 sm:$0xff]   ;;  %v1137_v37 = vld [vmem:[%s1341_s24 + $0xf4] ss:$8 sps:$4 sm:$0xff]   ;;  %v1141_v39 = vld [vmem:[%s1341_s24 + $0xf0] ss:$8 sps:$4 sm:$0xff]  }
  0x38   : > { %707 = vmatpush1.bf16.msra.mxu1 %v1106_v16  ;;  %665 = vmatprep.subr.bf16.mxu0 %v1107_v17  ;;  %v1136_v36 = vld [vmem:[%s1341_s24 + $0x100] ss:$8 sps:$4 sm:$0xff]   ;;  %v1139_v38 = vld [vmem:[%s1341_s24 + $0x1f4] ss:$8 sps:$4 sm:$0xff]   ;;  %v1142_v40 = vld [vmem:[%s1341_s24 + $0x1f0] ss:$8 sps:$4 sm:$0xff]  }
  0x39   : > { %708 = vmatprep.subr.bf16.mxu1 %v1109_v18  ;;  %v1143_v41 = vld [vmem:[%s1341_s24 + $0xe4] ss:$8 sps:$4 sm:$0xff]   ;;  %v1147_v43 = vld [vmem:[%s1341_s24 + $0xe0] ss:$8 sps:$4 sm:$0xff]   ;;  %v1149_v45 = vld [vmem:[%s1341_s24 + $0xd4] ss:$8 sps:$4 sm:$0xff]  }
  0x3a   : > { %v1145_v42 = vld [vmem:[%s1341_s24 + $0x1e4] ss:$8 sps:$4 sm:$0xff]   ;;  %v1148_v44 = vld [vmem:[%s1341_s24 + $0x1e0] ss:$8 sps:$4 sm:$0xff]   ;;  %v1151_v46 = vld [vmem:[%s1341_s24 + $0x1d4] ss:$8 sps:$4 sm:$0xff]  }
  0x3b   : > { %666 = vmatpush1.bf16.msra.mxu0 %v1111_v19  ;;  %v1153_v47 = vld [vmem:[%s1341_s24 + $0xd0] ss:$8 sps:$4 sm:$0xff]   ;;  %v1155_v49 = vld [vmem:[%s1341_s24 + $0xc4] ss:$8 sps:$4 sm:$0xff]   ;;  %v1159_v51 = vld [vmem:[%s1341_s24 + $0xc0] ss:$8 sps:$4 sm:$0xff]  }
  0x3c   : > { %709 = vmatpush1.bf16.msra.mxu1 %v1112_v20  ;;  %667 = vmatprep.subr.bf16.mxu0 %v1113_v21  ;;  %v1154_v48 = vld [vmem:[%s1341_s24 + $0x1d0] ss:$8 sps:$4 sm:$0xff]   ;;  %v1157_v50 = vld [vmem:[%s1341_s24 + $0x1c4] ss:$8 sps:$4 sm:$0xff]   ;;  %v1160_v53 = vld [vmem:[%s1341_s24 + $0x1c0] ss:$8 sps:$4 sm:$0xff]  }
  0x3d   : > { %710 = vmatprep.subr.bf16.mxu1 %v1115_v22  ;;  %v1187_v52 = vld [vmem:[%s1348_s30 + $0x4] ss:$16 sps:$4 sm:$0xff]   ;;  %v1190_v56 = vld [vmem:[%s1348_s30 + $0xc] ss:$16 sps:$4 sm:$0xff]   ;;  %v1165_v57 = vld [vmem:[%s1341_s24 + $0xb0] ss:$8 sps:$4 sm:$0xff]  }
  0x3e   : > { %v1161_v54 = vld [vmem:[%s1341_s24 + $0xb4] ss:$8 sps:$4 sm:$0xff]   ;;  %691 = vmatprep.mubr.bf16.mxu0 %v1187_v52  ;;  %734 = vmatprep.mubr.bf16.mxu1 %v1190_v56  ;;  %v1166_v58 = vld [vmem:[%s1341_s24 + $0x1b0] ss:$8 sps:$4 sm:$0xff]   ;;  %v1167_v59 = vld [vmem:[%s1341_s24 + $0xa4] ss:$8 sps:$4 sm:$0xff]  }
  0x3f   : > { %668 = vmatpush1.bf16.msra.mxu0 %v1117_v23  ;;  %v1163_v55 = vld [vmem:[%s1341_s24 + $0x1b4] ss:$8 sps:$4 sm:$0xff]   ;;  %v1169_v60 = vld [vmem:[%s1341_s24 + $0x1a4] ss:$8 sps:$4 sm:$0xff]   ;;  %v1171_v61 = vld [vmem:[%s1341_s24 + $0xa0] ss:$8 sps:$4 sm:$0xff]  }
  0x40   : > { %711 = vmatpush1.bf16.msra.mxu1 %v1118_v24  ;;  %669 = vmatprep.subr.bf16.mxu0 %v1119_v25  ;;  %v1172_v62 = vld [vmem:[%s1341_s24 + $0x1a0] ss:$8 sps:$4 sm:$0xff]   ;;  %v1173_v63 = vld [vmem:[%s1341_s24 + $0x94] ss:$8 sps:$4 sm:$0xff]   ;;  %v1177_v1 = vld [vmem:[%s1341_s24 + $0x90] ss:$8 sps:$4 sm:$0xff]  }
  0x41   : > { %712 = vmatprep.subr.bf16.mxu1 %v1121_v26  ;;  %v1175_v0 = vld [vmem:[%s1341_s24 + $0x194] ss:$8 sps:$4 sm:$0xff]   ;;  %v1178_v2 = vld [vmem:[%s1341_s24 + $0x190] ss:$8 sps:$4 sm:$0xff]   ;;  %v1179_v3 = vld [vmem:[%s1341_s24 + $0x84] ss:$8 sps:$4 sm:$0xff]  }
  0x42   : > { %v1181_v4 = vld [vmem:[%s1341_s24 + $0x184] ss:$8 sps:$4 sm:$0xff]   ;;  %v1183_v5 = vld [vmem:[%s1341_s24 + $0x80] ss:$8 sps:$4 sm:$0xff]   ;;  %v247_v10 = vld [vmem:[#allocation2 + $0x10] sm:$0xff]  ;;  %p1023_p13 = scmp.ne.s32.totalorder %s1233_s14, 3 }
  0x43   : > { %670 = vmatpush1.bf16.msra.mxu0 %v1123_v27  ;;  %v1184_v6 = vld [vmem:[%s1341_s24 + $0x180] ss:$8 sps:$4 sm:$0xff]   ;;  %v249_v19 = vld [vmem:[#allocation2 + $0x18] sm:$0xff] }
  0x44   : > { %713 = vmatpush1.bf16.msra.mxu1 %v1124_v28  ;;  %671 = vmatprep.subr.bf16.mxu0 %v1125_v29  ;;  %v1185_v7 = vld [vmem:[%s1348_s30] ss:$16 sps:$4 sm:$0xff]   ;;  %v1188_v8 = vld [vmem:[%s1348_s30 + $0x8] ss:$16 sps:$4 sm:$0xff]  }
  0x45   : > { %714 = vmatprep.subr.bf16.mxu1 %v1127_v30  ;;  %v248_v14 = vld [vmem:[#allocation2] sm:$0xff]  ;;  %v250_v24 = vld [vmem:[#allocation2 + $0x8] sm:$0xff] }
  0x47   : > { %672 = vmatpush1.bf16.msra.mxu0 %v1129_v31 }
  0x48   : > { %715 = vmatpush1.bf16.msra.mxu1 %v1130_v32  ;;  %673 = vmatprep.subr.bf16.mxu0 %v1131_v33 }
  0x49   : > { %716 = vmatprep.subr.bf16.mxu1 %v1133_v34 }
  0x4b   : > { %674 = vmatpush1.bf16.msra.mxu0 %v1135_v35 }
  0x4c   : > { %717 = vmatpush1.bf16.msra.mxu1 %v1136_v36  ;;  %675 = vmatprep.subr.bf16.mxu0 %v1137_v37 }
  0x4d   : > { %718 = vmatprep.subr.bf16.mxu1 %v1139_v38 }
  0x4f   : > { %676 = vmatpush2.bf16.msra.mxu0 %v1141_v39 }
  0x50   : > { %719 = vmatpush2.bf16.msra.mxu1 %v1142_v40  ;;  %677 = vmatprep.subr.bf16.mxu0 %v1143_v41 }
  0x51   : > { %720 = vmatprep.subr.bf16.mxu1 %v1145_v42 }
  0x53   : > { %678 = vmatpush2.bf16.msra.mxu0 %v1147_v43 }
  0x54   : > { %721 = vmatpush2.bf16.msra.mxu1 %v1148_v44  ;;  %679 = vmatprep.subr.bf16.mxu0 %v1149_v45 }
  0x55   : > { %722 = vmatprep.subr.bf16.mxu1 %v1151_v46 }
  0x57   : > { %680 = vmatpush2.bf16.msra.mxu0 %v1153_v47 }
  0x58   : > { %723 = vmatpush2.bf16.msra.mxu1 %v1154_v48  ;;  %681 = vmatprep.subr.bf16.mxu0 %v1155_v49 }
  0x59   : > { %724 = vmatprep.subr.bf16.mxu1 %v1157_v50 }
  0x5b   : > { %682 = vmatpush2.bf16.msra.mxu0 %v1159_v51 }
  0x5c   : > { %725 = vmatpush2.bf16.msra.mxu1 %v1160_v53  ;;  %683 = vmatprep.subr.bf16.mxu0 %v1161_v54 }
  0x5d   : > { %726 = vmatprep.subr.bf16.mxu1 %v1163_v55 }
  0x5f   : > { %684 = vmatpush2.bf16.msra.mxu0 %v1165_v57 }
  0x60   : > { %727 = vmatpush2.bf16.msra.mxu1 %v1166_v58  ;;  %685 = vmatprep.subr.bf16.mxu0 %v1167_v59 }
  0x61   : > { %728 = vmatprep.subr.bf16.mxu1 %v1169_v60 }
  0x63   : > { %686 = vmatpush2.bf16.msra.mxu0 %v1171_v61 }
  0x64   : > { %729 = vmatpush2.bf16.msra.mxu1 %v1172_v62  ;;  %687 = vmatprep.subr.bf16.mxu0 %v1173_v63 }
  0x65   : > { %730 = vmatprep.subr.bf16.mxu1 %v1175_v0 }
  0x67   : > { %688 = vmatpush2.bf16.msra.mxu0 %v1177_v1 }
  0x68   : > { %731 = vmatpush2.bf16.msra.mxu1 %v1178_v2  ;;  %689 = vmatprep.subr.bf16.mxu0 %v1179_v3 }
  0x69   : > { %732 = vmatprep.subr.bf16.mxu1 %v1181_v4 }
  0x6b   : > { %690 = vmatpush2.bf16.msra.mxu0 %v1183_v5 }
  0x6c   : > { %733 = vmatpush2.bf16.msra.mxu1 %v1184_v6 }
  0x6e   : > { %692 = vmatmul.mubr.bf16.vlgmr.msra.gmra.mxu0 %v1185_v7 }
  0x6f   : > { %735 = vmatmul.mubr.bf16.vlgmr.msra.gmra.mxu1 %v1188_v8 }
 0x12e   : > { %v693_v9 = vpop.f32.mrf.mxu0 }
 0x12f   : > { %v736_v11 = vpop.f32.mrf.mxu1 }
 0x130   : > { %v737_v12 = vadd.f32 %v736_v11, %v693_v9  ;;  %v695_v13 = vpop.f32.mrf.mxu0 }
 0x131   : > { %v738_v15 = vpop.f32.mrf.mxu1 }
 0x132   : > { %v745_v16 = vadd.f32 %v737_v12, %v247_v10  ;;  %v739_v17 = vadd.f32 %v738_v15, %v695_v13  ;;  %v697_v18 = vpop.f32.mrf.mxu0 }
 0x133   : > { %v740_v20 = vpop.f32.mrf.mxu1 }
 0x134   : > { %749 = vst [vmem:[#allocation2 + $0x10] sm:$0xff] %v745_v16  ;;  %v746_v21 = vadd.f32 %v739_v17, %v248_v14  ;;  %v741_v22 = vadd.f32 %v740_v20, %v697_v18  ;;  %v699_v23 = vpop.f32.mrf.mxu0 }
 0x135   : > { %v742_v25 = vpop.f32.mrf.mxu1 }
 0x136   : > { %750 = vst [vmem:[#allocation2] sm:$0xff] %v746_v21  ;;  %v747_v26 = vadd.f32 %v741_v22, %v249_v19  ;;  %v743_v27 = vadd.f32 %v742_v25, %v699_v23  ;;  %756 = sbr.rel (%p1023_p13) target bundleno = 386 (0x182), region = 63 }
 0x138   : > { %751 = vst [vmem:[#allocation2 + $0x18] sm:$0xff] %v747_v26  ;;  %v748_v28 = vadd.f32 %v743_v27, %v250_v24 }
 0x13a   : > { %752 = vst [vmem:[#allocation2 + $0x8] sm:$0xff] %v748_v28 }
 0x13b   : > { %v763_v29 = vlaneseq  ;;  %v761_v31 = vld [vmem:[%s1448_s2] sm:$0x3]  ;;  %v757_v32 = vld [vmem:[#allocation2 + $0x10] sm:$0xff] }
 0x13d   : > { %v764_v30 = vshrl.u32 %v763_v29, 7  ;;  %v758_v35 = vld [vmem:[#allocation2] sm:$0xff] }
 0x13f   : > { %v765_v33 = vsub.s32 0, %v764_v30  ;;  %v769_v34 = vsub.s32 1, %v764_v30  ;;  %v759_v36 = vld [vmem:[#allocation2 + $0x18] sm:$0xff] }
 0x141   : > { %v760_v37 = vld [vmem:[#allocation2 + $0x8] sm:$0xff]  ;;  %v766_v38 = vrot.slane %v761_v31, %v765_v33  ;;  %v770_v39 = vrot.slane %v761_v31, %v769_v34 }
 0x143   : > { %v773_v40 = vadd.f32 %v766_v38, %v757_v32  ;;  %v774_v41 = vadd.f32 %v770_v39, %v758_v35  ;;  %v775_v42 = vadd.f32 %v766_v38, %v759_v36  ;;  %v776_v43 = vadd.f32 %v770_v39, %v760_v37 }
 0x145   : > { %v777_v44 = vadd.f32 %v775_v42, %v773_v40  ;;  %v784_v45 = vadd.f32 %v776_v43, %v774_v41 }
 0x147   : > { %v778_v46 = vrot.slane %v777_v44, 4  ;;  %v785_v47 = vrot.slane %v784_v45, 4 }
 0x149   : > { %v779_v48 = vadd.f32 %v778_v46, %v777_v44  ;;  %v786_v49 = vadd.f32 %v785_v47, %v784_v45 }
 0x14b   : > { %v780_v50 = vrot.slane %v779_v48, 2  ;;  %v787_v51 = vrot.slane %v786_v49, 2 }
 0x14d   : > { %v781_v52 = vadd.f32 %v780_v50, %v779_v48  ;;  %v788_v53 = vadd.f32 %v787_v51, %v786_v49 }
 0x14f   : > { %v782_v54 = vrot.slane %v781_v52, 1  ;;  %v789_v55 = vrot.slane %v788_v53, 1 }
 0x151   : > { %v783_v56 = vadd.f32 %v782_v54, %v781_v52  ;;  %v790_v57 = vadd.f32 %v789_v55, %v788_v53 }
 0x153   : > { %v792_v58 = vmul.f32 0.0625, %v783_v56  ;;  %v793_v59 = vmul.f32 0.0625, %v790_v57 }
 0x155   : > { %v794_v60 = vsub.f32 %v773_v40, %v792_v58  ;;  %v795_v61 = vsub.f32 %v774_v41, %v793_v59  ;;  %v796_v62 = vsub.f32 %v775_v42, %v792_v58  ;;  %v797_v63 = vsub.f32 %v776_v43, %v793_v59 }
 0x157   : > { %v798_v0 = vmul.f32 %v794_v60, %v794_v60  ;;  %v799_v1 = vmul.f32 %v795_v61, %v795_v61  ;;  %v800_v2 = vmul.f32 %v796_v62, %v796_v62  ;;  %v801_v3 = vmul.f32 %v797_v63, %v797_v63 }
 0x159   : > { %v802_v4 = vadd.f32 %v800_v2, %v798_v0  ;;  %v809_v5 = vadd.f32 %v801_v3, %v799_v1 }
 0x15b   : > { %v803_v6 = vrot.slane %v802_v4, 4  ;;  %v810_v7 = vrot.slane %v809_v5, 4 }
 0x15d   : > { %v804_v8 = vadd.f32 %v803_v6, %v802_v4  ;;  %v811_v9 = vadd.f32 %v810_v7, %v809_v5 }
 0x15f   : > { %v805_v10 = vrot.slane %v804_v8, 2  ;;  %v812_v11 = vrot.slane %v811_v9, 2 }
 0x161   : > { %v806_v12 = vadd.f32 %v805_v10, %v804_v8  ;;  %v813_v13 = vadd.f32 %v812_v11, %v811_v9 }
 0x163   : > { %v807_v14 = vrot.slane %v806_v12, 1  ;;  %v814_v15 = vrot.slane %v813_v13, 1 }
 0x165   : > { %v808_v16 = vadd.f32 %v807_v14, %v806_v12  ;;  %v815_v17 = vadd.f32 %v814_v15, %v813_v13 }
 0x167   : > { %v816_v18 = vmul.f32 0.0625, %v808_v16  ;;  %v817_v19 = vmul.f32 0.0625, %v815_v17 }
 0x169   : > { %v818_v20 = vadd.f32 1e-05, %v816_v18  ;;  %v819_v21 = vadd.f32 1e-05, %v817_v19 }
 0x16b   : > { %1191 = vrsqrt.f32 %v818_v20 }
 0x16c   : > { %1193 = vrsqrt.f32 %v819_v21 }
 0x178   : > { %v1192_v22 = vpop.eup %1191 }
 0x179   : > { %v1194_v23 = vpop.eup %1193  ;;  %v822_v24 = vmul.f32 %v1192_v22, %v794_v60  ;;  %v824_v25 = vmul.f32 %v1192_v22, %v796_v62 }
 0x17a   : > { %v823_v26 = vmul.f32 %v1194_v23, %v795_v61  ;;  %v825_v27 = vmul.f32 %v1194_v23, %v797_v63 }
 0x17b   : > { %vm826_vm0 = vcmp.ge.f32.partialorder %v822_v24, 0.0  ;;  %v830_v28 = vmul.f32 0.2, %v822_v24  ;;  %vm828_vm1 = vcmp.ge.f32.partialorder %v824_v25, 0.0  ;;  %v832_v29 = vmul.f32 0.2, %v824_v25 }
 0x17c   : > { %vm827_vm2 = vcmp.ge.f32.partialorder %v823_v26, 0.0  ;;  %v831_v30 = vmul.f32 0.2, %v823_v26  ;;  %vm829_vm3 = vcmp.ge.f32.partialorder %v825_v27, 0.0  ;;  %v833_v31 = vmul.f32 0.2, %v825_v27 }
 0x17d   : > { %v834_v32 = vsel %vm826_vm0, %v822_v24, %v830_v28  ;;  %v836_v33 = vsel %vm828_vm1, %v824_v25, %v832_v29 }
 0x17e   : > { %v835_v34 = vsel %vm827_vm2, %v823_v26, %v831_v30  ;;  %v837_v35 = vsel %vm829_vm3, %v825_v27, %v833_v31 }
 0x17f   : > { %v1030_v36 = vpack.c.bf16 %v835_v34, %v834_v32  ;;  %v1031_v37 = vpack.c.bf16 %v837_v35, %v836_v33 }
 0x181   : > { %850 = vst [vmem:[%s1346_s29] sm:$0xff] %v1030_v36  ;;  %851 = vst [vmem:[%s1346_s29 + $0x8] sm:$0xff] %v1031_v37 }
 0x182 PF: > { %s13_s18 = sadd.s32 1, %s1249_s18   ;;  %s1450_s12 = smov %s1229_s13 }
 0x183   : > { %p10_p0 = scmp.ge.s32.totalorder %s13_s18, 10   ;;  %s1451_s13 = smov %s1323_s25 }
 0x184   : > { %s1452_s14 = smov %s1241_s16  ;;  %s1453_s15 = smov %s1245_s17 }
 0x185   : > { %s1454_s16 = smov %s1457_s19  ;;  %s1455_s17 = smov %s1461_s20 }
 0x186   :  { %12 = sbr.rel (!%p10_p0) target bundleno = 4 (0x4), region = 101 }

// kernel: discriminator_forward.8
= control target key start
LH: loop header
LB: loop body
LE: loop exit
PB: predicated region body
PF: predicated region fallthrough
CT: control target
= control target key end

     0   :  { %s1914_s12 = smov 0   ;;  %s1916_s13 = smov 0   ;;  %s2146_s0 = inlined_call_operand.vmem [shape: bf16[2,4,4096], index: 0, kind: input, shape index: {}]   ;;  %s2147_s1 = inlined_call_operand.vmem [shape: bf16[4096,512], index: 1, kind: input, shape index: {}]   ;;  %s2148_s2 = inlined_call_operand.vmem [shape: f32[1,512], index: 2, kind: input, shape index: {}]   ;;  %s2149_s3 = inlined_call_operand.vmem [shape: bf16[2,4,512], index: 3, kind: output, shape index: {}]  }
   0x1   :  { %s1918_s14 = smov 0   ;;  %s1920_s15 = smov 0  }
   0x2   :  { %s1922_s16 = smov 0  }
   0x3 LB: > { %s22_s17 = sadd.s32 1, %s1882_s14  ;;  %s25_s18 = sadd.s32 1, %s1886_s15  ;;  %s1890_s16 = sphi %s1922_s16, %s13_s16   ;;  %s1886_s15 = sphi %s1920_s15, %s2153_s15   ;;  %s1882_s14 = sphi %s1918_s14, %s2152_s14   ;;  %s1878_s13 = sphi %s1916_s13, %s2151_s13   ;;  %s1874_s12 = sphi %s1914_s12, %s2150_s12  }
   0x4   : > { %p23_p0 = scmp.ge.s32.totalorder %s22_s17, 8  ;;  %p1464_p1 = scmp.ge.s32.totalorder %s1890_s16, 1 }
   0x5   : > { %p168_p2 = scmp.lt.s32.totalorder %s1890_s16, 17 }
   0x6   : > { %s2155_s17 = smov (%p23_p0, %s22_s17), 0  ;;  %s2157_s18 = smov (!%p23_p0, %s25_s18), %s1886_s15 }
   0x7   : > { %p169_p3 = pnand %p1464_p1, %p168_p2  ;;  %p27_p4 = scmp.ge.s32.totalorder %s2157_s18, 2 }
   0x8   : > { %s1465_s19 = sshll.u32 (!%p169_p3), %s1874_s12, 2  ;;  %p203_p5 = scmp.lt.s32.totalorder (!%p169_p3), %s1878_s13, 1 }
   0x9   : > { %s2159_s18 = smov (%p27_p4, %s2157_s18), 0  ;;  %172 = sbr.rel (%p169_p3) target bundleno = 439 (0x1b7), region = 32 }
   0xa   : > { %p205_p6 = scmp.lt.s32.totalorder (!%p169_p3), %s1465_s19, 31  ;;  %s1468_s20 = sshll.u32 (!%p169_p3), %s1874_s12, 6 }
   0xb   : > { %p213_p7 = scmp.lt.s32.totalorder (!%p169_p3), %s1468_s20, 511  ;;  %p1473_p8 = scmp.ne.s32.totalorder (!%p169_p3), %s1874_s12, 0 }
   0xe   : > { %s2161_s13 = smov (!%p203_p5, %s1878_s13), 1  ;;  %s2163_s19 = smov (!%p205_p6, %s1465_s19), 31 }
   0xf   : > { %s1466_s21 = sshll.u32 %s2161_s13, 5  ;;  %s1608_s23 = sshll.u32 %s2161_s13, 3 }
  0x10   : > { %s208_s22 = sadd.s32 %s1466_s21, %s2163_s19  ;;  %s1951_s27 = scalar_lea.vmem %s2149_s3, %s1608_s23 }
  0x11   : > { %s1467_s24 = sshll.u32 %s208_s22, 1  ;;  %s2165_s20 = smov (!%p213_p7, %s1468_s20), 511 }
  0x12   : > { %s1956_s30 = scalar_lea.vmem %s2146_s0, %s1467_s24  ;;  %s1607_s4 = sshll.u32 %s2165_s20, 4 }
  0x13   : > { %s1961_s7 = scalar_lea.vmem %s2147_s1, %s1607_s4  ;;  %227 = sbr.rel (%p1473_p8) target bundleno = 26 (0x1a), region = 36 }
  0x18   : > { %v1892_v0 = vmov 0.0  }
  0x19   : > { %228 = vst [vmem:[#allocation2] sm:$0xff] %v1892_v0  ;;  %229 = vst [vmem:[#allocation2 + $0x8] sm:$0xff] %v1892_v0 }
  0x1a PF: > { %v1651_v1 = vld [vmem:[%s1961_s7 + $0xe4] ss:$16 sps:$4 sm:$0xff]   ;;  %v1655_v3 = vld [vmem:[%s1961_s7 + $0xe0] ss:$16 sps:$4 sm:$0xff]   ;;  %v1893_v37 = vmov 1983009808   ;;  %v366_v39 = vlaneseq }
  0x1b   : > { %v1653_v2 = vld [vmem:[%s1961_s7 + $0x2e4] ss:$16 sps:$4 sm:$0xff]   ;;  %1023 = vmatprep.subr.bf16.mxu0 %v1651_v1  ;;  %v1656_v4 = vld [vmem:[%s1961_s7 + $0x2e0] ss:$16 sps:$4 sm:$0xff]   ;;  %v364_v38 = vunpack.c.l.s4 %v1893_v37  ;;  %v1786_v37 = vld [vmem:[%s1961_s7 + $0x2c] ss:$16 sps:$4 sm:$0xff]  }
  0x1c   : > { %1064 = vmatprep.subr.bf16.mxu1 %v1653_v2  ;;  %v1657_v5 = vld [vmem:[%s1961_s7 + $0xc4] ss:$16 sps:$4 sm:$0xff]   ;;  %1024 = vmatpush1.bf16.msra.mxu0 %v1655_v3  ;;  %v1661_v7 = vld [vmem:[%s1961_s7 + $0xc0] ss:$16 sps:$4 sm:$0xff]   ;;  %v2003_v44 = vshrl.u32 %v366_v39, 7  ;;  %p1602_p9 = scmp.ne.s32.totalorder %s1874_s12, 7 }
  0x1d   : > { %1065 = vmatpush1.bf16.msra.mxu1 %v1656_v4  ;;  %v1659_v6 = vld [vmem:[%s1961_s7 + $0x2c4] ss:$16 sps:$4 sm:$0xff]   ;;  %1025 = vmatprep.subr.bf16.mxu0 %v1657_v5  ;;  %v1662_v8 = vld [vmem:[%s1961_s7 + $0x2c0] ss:$16 sps:$4 sm:$0xff]   ;;  %v365_v43 = vunpack.c.0.s8 %v364_v38  ;;  %v1789_v38 = vld [vmem:[%s1961_s7 + $0x22c] ss:$16 sps:$4 sm:$0xff]  }
  0x1e   : > { %1066 = vmatprep.subr.bf16.mxu1 %v1659_v6  ;;  %v1663_v9 = vld [vmem:[%s1961_s7 + $0xa4] ss:$16 sps:$4 sm:$0xff]   ;;  %v1667_v11 = vld [vmem:[%s1961_s7 + $0xa0] ss:$16 sps:$4 sm:$0xff]   ;;  %v1784_v39 = vld [vmem:[%s1961_s7 + $0x28] ss:$16 sps:$4 sm:$0xff]  }
  0x1f   : > { %v1665_v10 = vld [vmem:[%s1961_s7 + $0x2a4] ss:$16 sps:$4 sm:$0xff]   ;;  %v1668_v12 = vld [vmem:[%s1961_s7 + $0x2a0] ss:$16 sps:$4 sm:$0xff]   ;;  %v2011_v50 = vsub.s32 %v365_v43, %v2003_v44  ;;  %v1790_v43 = vld [vmem:[%s1961_s7 + $0x8] ss:$16 sps:$4 sm:$0xff]  }
  0x20   : > { %1026 = vmatpush1.bf16.msra.mxu0 %v1661_v7  ;;  %v1669_v13 = vld [vmem:[%s1961_s7 + $0x84] ss:$16 sps:$4 sm:$0xff]   ;;  %v1673_v15 = vld [vmem:[%s1961_s7 + $0x80] ss:$16 sps:$4 sm:$0xff]  }
  0x21   : > { %1067 = vmatpush1.bf16.msra.mxu1 %v1662_v8  ;;  %1027 = vmatprep.subr.bf16.mxu0 %v1663_v9  ;;  %v1671_v14 = vld [vmem:[%s1961_s7 + $0x284] ss:$16 sps:$4 sm:$0xff]   ;;  %v1674_v16 = vld [vmem:[%s1961_s7 + $0x280] ss:$16 sps:$4 sm:$0xff]  }
  0x22   : > { %1068 = vmatprep.subr.bf16.mxu1 %v1665_v10  ;;  %v1675_v17 = vld [vmem:[%s1961_s7 + $0x64] ss:$16 sps:$4 sm:$0xff]   ;;  %v1679_v19 = vld [vmem:[%s1961_s7 + $0x60] ss:$16 sps:$4 sm:$0xff]  }
  0x23   : > { %v1677_v18 = vld [vmem:[%s1961_s7 + $0x264] ss:$16 sps:$4 sm:$0xff]   ;;  %v1680_v20 = vld [vmem:[%s1961_s7 + $0x260] ss:$16 sps:$4 sm:$0xff]  }
  0x24   : > { %1028 = vmatpush1.bf16.msra.mxu0 %v1667_v11  ;;  %v1681_v21 = vld [vmem:[%s1961_s7 + $0x44] ss:$16 sps:$4 sm:$0xff]   ;;  %v1685_v23 = vld [vmem:[%s1961_s7 + $0x40] ss:$16 sps:$4 sm:$0xff]  }
  0x25   : > { %1069 = vmatpush1.bf16.msra.mxu1 %v1668_v12  ;;  %1029 = vmatprep.subr.bf16.mxu0 %v1669_v13  ;;  %v1683_v22 = vld [vmem:[%s1961_s7 + $0x244] ss:$16 sps:$4 sm:$0xff]   ;;  %v1686_v24 = vld [vmem:[%s1961_s7 + $0x240] ss:$16 sps:$4 sm:$0xff]   ;;  %v1750_v13 = vld [vmem:[%s1961_s7 + $0xec] ss:$16 sps:$4 sm:$0xff]  }
  0x26   : > { %1070 = vmatprep.subr.bf16.mxu1 %v1671_v14  ;;  %v1687_v25 = vld [vmem:[%s1961_s7 + $0x24] ss:$16 sps:$4 sm:$0xff]   ;;  %v1691_v27 = vld [vmem:[%s1961_s7 + $0x20] ss:$16 sps:$4 sm:$0xff]   ;;  %v1753_v14 = vld [vmem:[%s1961_s7 + $0x2ec] ss:$16 sps:$4 sm:$0xff]  }
  0x27   : > { %v1689_v26 = vld [vmem:[%s1961_s7 + $0x224] ss:$16 sps:$4 sm:$0xff]   ;;  %v1692_v28 = vld [vmem:[%s1961_s7 + $0x220] ss:$16 sps:$4 sm:$0xff]  }
  0x28   : > { %1030 = vmatpush1.bf16.msra.mxu0 %v1673_v15  ;;  %v1693_v29 = vld [vmem:[%s1961_s7 + $0x4] ss:$16 sps:$4 sm:$0xff]   ;;  %v1697_v31 = vld [vmem:[%s1961_s7] ss:$16 sps:$4 sm:$0xff]   ;;  %v1748_v15 = vld [vmem:[%s1961_s7 + $0xe8] ss:$16 sps:$4 sm:$0xff]  }
  0x29   : > { %1071 = vmatpush1.bf16.msra.mxu1 %v1674_v16  ;;  %1031 = vmatprep.subr.bf16.mxu0 %v1675_v17  ;;  %v1695_v30 = vld [vmem:[%s1961_s7 + $0x204] ss:$16 sps:$4 sm:$0xff]   ;;  %v1698_v32 = vld [vmem:[%s1961_s7 + $0x200] ss:$16 sps:$4 sm:$0xff]   ;;  %v1751_v16 = vld [vmem:[%s1961_s7 + $0x2e8] ss:$16 sps:$4 sm:$0xff]  }
  0x2a   : > { %1072 = vmatprep.subr.bf16.mxu1 %v1677_v18  ;;  %v1699_v33 = vld [vmem:[%s1961_s7 + $0x1e4] ss:$16 sps:$4 sm:$0xff]   ;;  %v1703_v35 = vld [vmem:[%s1961_s7 + $0x1e0] ss:$16 sps:$4 sm:$0xff]   ;;  %v1756_v17 = vld [vmem:[%s1961_s7 + $0xcc] ss:$16 sps:$4 sm:$0xff]  }
  0x2b   : > { %v1701_v34 = vld [vmem:[%s1961_s7 + $0x3e4] ss:$16 sps:$4 sm:$0xff]   ;;  %v1704_v36 = vld [vmem:[%s1961_s7 + $0x3e0] ss:$16 sps:$4 sm:$0xff]   ;;  %v1759_v18 = vld [vmem:[%s1961_s7 + $0x2cc] ss:$16 sps:$4 sm:$0xff]  }
  0x2c   : > { %1032 = vmatpush1.bf16.msra.mxu0 %v1679_v19  ;;  %v1705_v40 = vld [vmem:[%s1961_s7 + $0x1c4] ss:$16 sps:$4 sm:$0xff]   ;;  %v1709_v42 = vld [vmem:[%s1961_s7 + $0x1c0] ss:$16 sps:$4 sm:$0xff]   ;;  %v1754_v19 = vld [vmem:[%s1961_s7 + $0xc8] ss:$16 sps:$4 sm:$0xff]  }
  0x2d   : > { %1073 = vmatpush1.bf16.msra.mxu1 %v1680_v20  ;;  %1033 = vmatprep.subr.bf16.mxu0 %v1681_v21  ;;  %v1707_v41 = vld [vmem:[%s1961_s7 + $0x3c4] ss:$16 sps:$4 sm:$0xff]   ;;  %v1710_v45 = vld [vmem:[%s1961_s7 + $0x3c0] ss:$16 sps:$4 sm:$0xff]   ;;  %v1757_v20 = vld [vmem:[%s1961_s7 + $0x2c8] ss:$16 sps:$4 sm:$0xff]  }
  0x2e   : > { %1074 = vmatprep.subr.bf16.mxu1 %v1683_v22  ;;  %v1711_v46 = vld [vmem:[%s1961_s7 + $0x1a4] ss:$16 sps:$4 sm:$0xff]   ;;  %v1715_v48 = vld [vmem:[%s1961_s7 + $0x1a0] ss:$16 sps:$4 sm:$0xff]   ;;  %v1762_v21 = vld [vmem:[%s1961_s7 + $0xac] ss:$16 sps:$4 sm:$0xff]  }
  0x2f   : > { %v1713_v47 = vld [vmem:[%s1961_s7 + $0x3a4] ss:$16 sps:$4 sm:$0xff]   ;;  %v1716_v49 = vld [vmem:[%s1961_s7 + $0x3a0] ss:$16 sps:$4 sm:$0xff]   ;;  %v1765_v22 = vld [vmem:[%s1961_s7 + $0x2ac] ss:$16 sps:$4 sm:$0xff]  }
  0x30   : > { %1034 = vmatpush1.bf16.msra.mxu0 %v1685_v23  ;;  %v1717_v51 = vld [vmem:[%s1961_s7 + $0x184] ss:$16 sps:$4 sm:$0xff]   ;;  %v1721_v54 = vld [vmem:[%s1961_s7 + $0x180] ss:$16 sps:$4 sm:$0xff]   ;;  %v1760_v23 = vld [vmem:[%s1961_s7 + $0xa8] ss:$16 sps:$4 sm:$0xff]  }
  0x31   : > { %1075 = vmatpush1.bf16.msra.mxu1 %v1686_v24  ;;  %1035 = vmatprep.subr.bf16.mxu0 %v1687_v25  ;;  %v1719_v52 = vld [vmem:[%s1961_s7 + $0x384] ss:$16 sps:$4 sm:$0xff]   ;;  %v1722_v57 = vld [vmem:[%s1961_s7 + $0x380] ss:$16 sps:$4 sm:$0xff]   ;;  %v1763_v24 = vld [vmem:[%s1961_s7 + $0x2a8] ss:$16 sps:$4 sm:$0xff]  }
  0x32   : > { %1076 = vmatprep.subr.bf16.mxu1 %v1689_v26  ;;  %v232_v53 = vld [vmem:[%s1956_s30] sm:$0xff]  ;;  %v1768_v25 = vld [vmem:[%s1961_s7 + $0x8c] ss:$16 sps:$4 sm:$0xff]  }
  0x33   : > { %v2018_v55 = vrot.slane %v232_v53, %v2011_v50  ;;  %v362_v56 = vcombine.high %v232_v53, %v232_v53  ;;  %v1723_v58 = vld [vmem:[%s1961_s7 + $0x164] ss:$16 sps:$4 sm:$0xff]   ;;  %v1727_v62 = vld [vmem:[%s1961_s7 + $0x160] ss:$16 sps:$4 sm:$0xff]   ;;  %v1771_v26 = vld [vmem:[%s1961_s7 + $0x28c] ss:$16 sps:$4 sm:$0xff]  }
  0x34   : > { %1036 = vmatpush1.bf16.msra.mxu0 %v1691_v27  ;;  %v1725_v59 = vld [vmem:[%s1961_s7 + $0x364] ss:$16 sps:$4 sm:$0xff]   ;;  %v1728_v0 = vld [vmem:[%s1961_s7 + $0x360] ss:$16 sps:$4 sm:$0xff]   ;;  %v1766_v27 = vld [vmem:[%s1961_s7 + $0x88] ss:$16 sps:$4 sm:$0xff]  }
  0x35   : > { %1077 = vmatpush1.bf16.msra.mxu1 %v1692_v28  ;;  %1037 = vmatprep.subr.bf16.mxu0 %v1693_v29  ;;  %v377_v60 = vcombine.high %v2018_v55, %v2018_v55  ;;  %v2026_v61 = vrot.slane %v362_v56, %v2011_v50  ;;  %v1729_v1 = vld [vmem:[%s1961_s7 + $0x144] ss:$16 sps:$4 sm:$0xff]   ;;  %v1733_v3 = vld [vmem:[%s1961_s7 + $0x140] ss:$16 sps:$4 sm:$0xff]   ;;  %v1769_v28 = vld [vmem:[%s1961_s7 + $0x288] ss:$16 sps:$4 sm:$0xff]  }
  0x36   : > { %1078 = vmatprep.subr.bf16.mxu1 %v1695_v30  ;;  %v1731_v2 = vld [vmem:[%s1961_s7 + $0x344] ss:$16 sps:$4 sm:$0xff]   ;;  %v1734_v4 = vld [vmem:[%s1961_s7 + $0x340] ss:$16 sps:$4 sm:$0xff]   ;;  %v1774_v29 = vld [vmem:[%s1961_s7 + $0x6c] ss:$16 sps:$4 sm:$0xff]  }
  0x37   : > { %1055 = vmatprep.mubr.bf16.mxu0 %v377_v60  ;;  %v378_v63 = vcombine.high %v2026_v61, %v2026_v61  ;;  %v1735_v5 = vld [vmem:[%s1961_s7 + $0x124] ss:$16 sps:$4 sm:$0xff]   ;;  %v1739_v7 = vld [vmem:[%s1961_s7 + $0x120] ss:$16 sps:$4 sm:$0xff]   ;;  %v1777_v30 = vld [vmem:[%s1961_s7 + $0x26c] ss:$16 sps:$4 sm:$0xff]  }
  0x38   : > { %1038 = vmatpush1.bf16.msra.mxu0 %v1697_v31  ;;  %v1737_v6 = vld [vmem:[%s1961_s7 + $0x324] ss:$16 sps:$4 sm:$0xff]   ;;  %v1740_v8 = vld [vmem:[%s1961_s7 + $0x320] ss:$16 sps:$4 sm:$0xff]   ;;  %v1772_v31 = vld [vmem:[%s1961_s7 + $0x68] ss:$16 sps:$4 sm:$0xff]  }
  0x39   : > { %1079 = vmatpush1.bf16.msra.mxu1 %v1698_v32  ;;  %1039 = vmatprep.subr.bf16.mxu0 %v1699_v33  ;;  %v1741_v9 = vld [vmem:[%s1961_s7 + $0x104] ss:$16 sps:$4 sm:$0xff]   ;;  %v1745_v11 = vld [vmem:[%s1961_s7 + $0x100] ss:$16 sps:$4 sm:$0xff]   ;;  %v1775_v32 = vld [vmem:[%s1961_s7 + $0x268] ss:$16 sps:$4 sm:$0xff]  }
  0x3a   : > { %1080 = vmatprep.subr.bf16.mxu1 %v1701_v34  ;;  %1096 = vmatprep.mubr.bf16.mxu1 %v378_v63  ;;  %v1743_v10 = vld [vmem:[%s1961_s7 + $0x304] ss:$16 sps:$4 sm:$0xff]   ;;  %v1746_v12 = vld [vmem:[%s1961_s7 + $0x300] ss:$16 sps:$4 sm:$0xff]   ;;  %v1780_v33 = vld [vmem:[%s1961_s7 + $0x4c] ss:$16 sps:$4 sm:$0xff]  }
  0x3b   : > { %v1783_v34 = vld [vmem:[%s1961_s7 + $0x24c] ss:$16 sps:$4 sm:$0xff]   ;;  %v1802_v53 = vld [vmem:[%s1961_s7 + $0x1c8] ss:$16 sps:$4 sm:$0xff]  }
  0x3c   : > { %1040 = vmatpush2.bf16.msra.mxu0 %v1703_v35  ;;  %v1778_v35 = vld [vmem:[%s1961_s7 + $0x48] ss:$16 sps:$4 sm:$0xff]   ;;  %v1810_v56 = vld [vmem:[%s1961_s7 + $0x1ac] ss:$16 sps:$4 sm:$0xff]  }
  0x3d   : > { %1081 = vmatpush2.bf16.msra.mxu1 %v1704_v36  ;;  %1041 = vmatprep.subr.bf16.mxu0 %v1705_v40  ;;  %v1781_v36 = vld [vmem:[%s1961_s7 + $0x248] ss:$16 sps:$4 sm:$0xff]  }
  0x3e   : > { %1082 = vmatprep.subr.bf16.mxu1 %v1707_v41  ;;  %v1787_v40 = vld [vmem:[%s1961_s7 + $0x228] ss:$16 sps:$4 sm:$0xff]   ;;  %v1792_v41 = vld [vmem:[%s1961_s7 + $0xc] ss:$16 sps:$4 sm:$0xff]  }
  0x40   : > { %1042 = vmatpush2.bf16.msra.mxu0 %v1709_v42  ;;  %v1795_v42 = vld [vmem:[%s1961_s7 + $0x20c] ss:$16 sps:$4 sm:$0xff]  }
  0x41   : > { %1083 = vmatpush2.bf16.msra.mxu1 %v1710_v45  ;;  %1043 = vmatprep.subr.bf16.mxu0 %v1711_v46  ;;  %v1793_v45 = vld [vmem:[%s1961_s7 + $0x208] ss:$16 sps:$4 sm:$0xff]   ;;  %v1798_v46 = vld [vmem:[%s1961_s7 + $0x1ec] ss:$16 sps:$4 sm:$0xff]  }
  0x42   : > { %1084 = vmatprep.subr.bf16.mxu1 %v1713_v47  ;;  %v1801_v47 = vld [vmem:[%s1961_s7 + $0x3ec] ss:$16 sps:$4 sm:$0xff]  }
  0x44   : > { %1044 = vmatpush2.bf16.msra.mxu0 %v1715_v48  ;;  %v1796_v48 = vld [vmem:[%s1961_s7 + $0x1e8] ss:$16 sps:$4 sm:$0xff]  }
  0x45   : > { %1085 = vmatpush2.bf16.msra.mxu1 %v1716_v49  ;;  %1045 = vmatprep.subr.bf16.mxu0 %v1717_v51  ;;  %v1799_v49 = vld [vmem:[%s1961_s7 + $0x3e8] ss:$16 sps:$4 sm:$0xff]   ;;  %v1804_v51 = vld [vmem:[%s1961_s7 + $0x1cc] ss:$16 sps:$4 sm:$0xff]  }
  0x46   : > { %1086 = vmatprep.subr.bf16.mxu1 %v1719_v52  ;;  %v1807_v52 = vld [vmem:[%s1961_s7 + $0x3cc] ss:$16 sps:$4 sm:$0xff]  }
  0x48   : > { %1046 = vmatpush2.bf16.msra.mxu0 %v1721_v54  ;;  %v1805_v54 = vld [vmem:[%s1961_s7 + $0x3c8] ss:$16 sps:$4 sm:$0xff]  }
  0x49   : > { %1087 = vmatpush2.bf16.msra.mxu1 %v1722_v57  ;;  %1047 = vmatprep.subr.bf16.mxu0 %v1723_v58  ;;  %v1813_v57 = vld [vmem:[%s1961_s7 + $0x3ac] ss:$16 sps:$4 sm:$0xff]   ;;  %v1808_v58 = vld [vmem:[%s1961_s7 + $0x1a8] ss:$16 sps:$4 sm:$0xff]  }
  0x4a   : > { %1088 = vmatprep.subr.bf16.mxu1 %v1725_v59  ;;  %v1811_v59 = vld [vmem:[%s1961_s7 + $0x3a8] ss:$16 sps:$4 sm:$0xff]  }
  0x4c   : > { %1048 = vmatpush2.bf16.msra.mxu0 %v1727_v62  ;;  %v1819_v62 = vld [vmem:[%s1961_s7 + $0x38c] ss:$16 sps:$4 sm:$0xff]  }
  0x4d   : > { %1089 = vmatpush2.bf16.msra.mxu1 %v1728_v0  ;;  %1049 = vmatprep.subr.bf16.mxu0 %v1729_v1  ;;  %v1817_v0 = vld [vmem:[%s1961_s7 + $0x388] ss:$16 sps:$4 sm:$0xff]   ;;  %v1822_v1 = vld [vmem:[%s1961_s7 + $0x16c] ss:$16 sps:$4 sm:$0xff]  }
  0x4e   : > { %1090 = vmatprep.subr.bf16.mxu1 %v1731_v2  ;;  %v1825_v2 = vld [vmem:[%s1961_s7 + $0x36c] ss:$16 sps:$4 sm:$0xff]  }
  0x50   : > { %1050 = vmatpush2.bf16.msra.mxu0 %v1733_v3  ;;  %v1820_v3 = vld [vmem:[%s1961_s7 + $0x168] ss:$16 sps:$4 sm:$0xff]  }
  0x51   : > { %1091 = vmatpush2.bf16.msra.mxu1 %v1734_v4  ;;  %1051 = vmatprep.subr.bf16.mxu0 %v1735_v5  ;;  %v1823_v4 = vld [vmem:[%s1961_s7 + $0x368] ss:$16 sps:$4 sm:$0xff]   ;;  %v1828_v5 = vld [vmem:[%s1961_s7 + $0x14c] ss:$16 sps:$4 sm:$0xff]  }
  0x52   : > { %1092 = vmatprep.subr.bf16.mxu1 %v1737_v6  ;;  %v1831_v6 = vld [vmem:[%s1961_s7 + $0x34c] ss:$16 sps:$4 sm:$0xff]  }
  0x54   : > { %1052 = vmatpush2.bf16.msra.mxu0 %v1739_v7  ;;  %v1826_v7 = vld [vmem:[%s1961_s7 + $0x148] ss:$16 sps:$4 sm:$0xff]  }
  0x55   : > { %1093 = vmatpush2.bf16.msra.mxu1 %v1740_v8  ;;  %1053 = vmatprep.subr.bf16.mxu0 %v1741_v9  ;;  %v1829_v8 = vld [vmem:[%s1961_s7 + $0x348] ss:$16 sps:$4 sm:$0xff]   ;;  %v1834_v9 = vld [vmem:[%s1961_s7 + $0x12c] ss:$16 sps:$4 sm:$0xff]  }
  0x56   : > { %1094 = vmatprep.subr.bf16.mxu1 %v1743_v10  ;;  %v1837_v10 = vld [vmem:[%s1961_s7 + $0x32c] ss:$16 sps:$4 sm:$0xff]  }
  0x58   : > { %1054 = vmatpush2.bf16.msra.mxu0 %v1745_v11  ;;  %v1832_v11 = vld [vmem:[%s1961_s7 + $0x128] ss:$16 sps:$4 sm:$0xff]  }
  0x59   : > { %1095 = vmatpush2.bf16.msra.mxu1 %v1746_v12  ;;  %1105 = vmatprep.subr.bf16.mxu0 %v1750_v13  ;;  %v1835_v12 = vld [vmem:[%s1961_s7 + $0x328] ss:$16 sps:$4 sm:$0xff]   ;;  %v1840_v13 = vld [vmem:[%s1961_s7 + $0x10c] ss:$16 sps:$4 sm:$0xff]  }
  0x5a   : > { %1146 = vmatprep.subr.bf16.mxu1 %v1753_v14  ;;  %v1843_v14 = vld [vmem:[%s1961_s7 + $0x30c] ss:$16 sps:$4 sm:$0xff]  }
  0x5b   : > { %1056 = vmatmul.mubr.bf16.vlgmr.msra.gmra.mxu0 %v2018_v55 }
  0x5c   : > { %1097 = vmatmul.mubr.bf16.vlgmr.msra.gmra.mxu1 %v2026_v61  ;;  %1106 = vmatpush1.bf16.msra.mxu0 %v1748_v15  ;;  %v1838_v15 = vld [vmem:[%s1961_s7 + $0x108] ss:$16 sps:$4 sm:$0xff]  }
  0x5d   : > { %1147 = vmatpush1.bf16.msra.mxu1 %v1751_v16  ;;  %1107 = vmatprep.subr.bf16.mxu0 %v1756_v17  ;;  %v1841_v16 = vld [vmem:[%s1961_s7 + $0x308] ss:$16 sps:$4 sm:$0xff]  }
  0x5e   : > { %1148 = vmatprep.subr.bf16.mxu1 %v1759_v18  ;;  %1137 = vmatprep.mubr.bf16.mxu0 %v377_v60  ;;  %v1816_v60 = vld [vmem:[%s1961_s7 + $0x18c] ss:$16 sps:$4 sm:$0xff]  }
  0x5f   : > { %1178 = vmatprep.mubr.bf16.mxu1 %v378_v63  ;;  %v1814_v63 = vld [vmem:[%s1961_s7 + $0x188] ss:$16 sps:$4 sm:$0xff]  }
  0x60   : > { %1108 = vmatpush1.bf16.msra.mxu0 %v1754_v19 }
  0x61   : > { %1149 = vmatpush1.bf16.msra.mxu1 %v1757_v20  ;;  %1109 = vmatprep.subr.bf16.mxu0 %v1762_v21 }
  0x62   : > { %1150 = vmatprep.subr.bf16.mxu1 %v1765_v22 }
  0x64   : > { %1110 = vmatpush1.bf16.msra.mxu0 %v1760_v23  ;;  %v230_v23 = vld [vmem:[#allocation2] sm:$0xff] }
  0x65   : > { %1151 = vmatpush1.bf16.msra.mxu1 %v1763_v24  ;;  %1111 = vmatprep.subr.bf16.mxu0 %v1768_v25 }
  0x66   : > { %1152 = vmatprep.subr.bf16.mxu1 %v1771_v26 }
  0x68   : > { %1112 = vmatpush1.bf16.msra.mxu0 %v1766_v27 }
  0x69   : > { %1153 = vmatpush1.bf16.msra.mxu1 %v1769_v28  ;;  %1113 = vmatprep.subr.bf16.mxu0 %v1774_v29 }
  0x6a   : > { %1154 = vmatprep.subr.bf16.mxu1 %v1777_v30 }
  0x6c   : > { %1114 = vmatpush1.bf16.msra.mxu0 %v1772_v31 }
  0x6d   : > { %1155 = vmatpush1.bf16.msra.mxu1 %v1775_v32  ;;  %1115 = vmatprep.subr.bf16.mxu0 %v1780_v33 }
  0x6e   : > { %1156 = vmatprep.subr.bf16.mxu1 %v1783_v34  ;;  %v231_v34 = vld [vmem:[#allocation2 + $0x8] sm:$0xff] }
  0x70   : > { %1116 = vmatpush1.bf16.msra.mxu0 %v1778_v35 }
  0x71   : > { %1157 = vmatpush1.bf16.msra.mxu1 %v1781_v36  ;;  %1117 = vmatprep.subr.bf16.mxu0 %v1786_v37 }
  0x72   : > { %1158 = vmatprep.subr.bf16.mxu1 %v1789_v38 }
  0x74   : > { %1118 = vmatpush1.bf16.msra.mxu0 %v1784_v39 }
  0x75   : > { %1159 = vmatpush1.bf16.msra.mxu1 %v1787_v40  ;;  %1119 = vmatprep.subr.bf16.mxu0 %v1792_v41 }
  0x76   : > { %1160 = vmatprep.subr.bf16.mxu1 %v1795_v42 }
  0x78   : > { %1120 = vmatpush1.bf16.msra.mxu0 %v1790_v43 }
  0x79   : > { %1161 = vmatpush1.bf16.msra.mxu1 %v1793_v45  ;;  %1121 = vmatprep.subr.bf16.mxu0 %v1798_v46 }
  0x7a   : > { %1162 = vmatprep.subr.bf16.mxu1 %v1801_v47 }
  0x7c   : > { %1122 = vmatpush2.bf16.msra.mxu0 %v1796_v48 }
  0x7d   : > { %1163 = vmatpush2.bf16.msra.mxu1 %v1799_v49  ;;  %1123 = vmatprep.subr.bf16.mxu0 %v1804_v51 }
  0x7e   : > { %1164 = vmatprep.subr.bf16.mxu1 %v1807_v52 }
  0x80   : > { %1124 = vmatpush2.bf16.msra.mxu0 %v1802_v53 }
  0x81   : > { %1165 = vmatpush2.bf16.msra.mxu1 %v1805_v54  ;;  %1125 = vmatprep.subr.bf16.mxu0 %v1810_v56 }
  0x82   : > { %1166 = vmatprep.subr.bf16.mxu1 %v1813_v57 }
  0x84   : > { %1126 = vmatpush2.bf16.msra.mxu0 %v1808_v58 }
  0x85   : > { %1167 = vmatpush2.bf16.msra.mxu1 %v1811_v59  ;;  %1127 = vmatprep.subr.bf16.mxu0 %v1816_v60 }
  0x86   : > { %1168 = vmatprep.subr.bf16.mxu1 %v1819_v62 }
  0x88   : > { %1128 = vmatpush2.bf16.msra.mxu0 %v1814_v63 }
  0x89   : > { %1169 = vmatpush2.bf16.msra.mxu1 %v1817_v0  ;;  %1129 = vmatprep.subr.bf16.mxu0 %v1822_v1 }
  0x8a   : > { %1170 = vmatprep.subr.bf16.mxu1 %v1825_v2 }
  0x8c   : > { %1130 = vmatpush2.bf16.msra.mxu0 %v1820_v3 }
  0x8d   : > { %1171 = vmatpush2.bf16.msra.mxu1 %v1823_v4  ;;  %1131 = vmatprep.subr.bf16.mxu0 %v1828_v5 }
  0x8e   : > { %1172 = vmatprep.subr.bf16.mxu1 %v1831_v6 }
  0x90   : > { %1132 = vmatpush2.bf16.msra.mxu0 %v1826_v7 }
  0x91   : > { %1173 = vmatpush2.bf16.msra.mxu1 %v1829_v8  ;;  %1133 = vmatprep.subr.bf16.mxu0 %v1834_v9 }
  0x92   : > { %1174 = vmatprep.subr.bf16.mxu1 %v1837_v10 }
  0x94   : > { %1134 = vmatpush2.bf16.msra.mxu0 %v1832_v11 }
  0x95   : > { %1175 = vmatpush2.bf16.msra.mxu1 %v1835_v12  ;;  %1135 = vmatprep.subr.bf16.mxu0 %v1840_v13 }
  0x96   : > { %1176 = vmatprep.subr.bf16.mxu1 %v1843_v14 }
  0x98   : > { %1136 = vmatpush2.bf16.msra.mxu0 %v1838_v15 }
  0x99   : > { %1177 = vmatpush2.bf16.msra.mxu1 %v1841_v16 }
  0x9b   : > { %1138 = vmatmul.mubr.bf16.vlgmr.msra.gmra.mxu0 %v2018_v55 }
  0x9c   : > { %1179 = vmatmul.mubr.bf16.vlgmr.msra.gmra.mxu1 %v2026_v61 }
 0x11b   : > { %v1057_v17 = vpop.f32.mrf.mxu0 }
 0x11c   : > { %v1098_v18 = vpop.f32.mrf.mxu1 }
 0x11d   : > { %v1099_v19 = vadd.f32 %v1098_v18, %v1057_v17  ;;  %v1059_v20 = vpop.f32.mrf.mxu0 }
 0x11e   : > { %v1100_v21 = vpop.f32.mrf.mxu1 }
 0x11f   : > { %v1101_v22 = vadd.f32 %v1100_v21, %v1059_v20  ;;  %v1061_v24 = vpop.f32.mrf.mxu0 }
 0x120   : > { %v1102_v25 = vpop.f32.mrf.mxu1 }
 0x121   : > { %v1191_v26 = vcombine.low %v1099_v19, %v1101_v22  ;;  %v1062_v27 = vpop.f32.mrf.mxu0 }
 0x122   : > { %v1103_v28 = vpop.f32.mrf.mxu1 }
 0x123   : > { %v1195_v29 = vadd.f32 %v1191_v26, %v230_v23 }
 0x125   : > { %1197 = vst [vmem:[#allocation2] sm:$0xff] %v1195_v29 }
 0x15b   : > { %v1139_v30 = vpop.f32.mrf.mxu0 }
 0x15c   : > { %v1180_v31 = vpop.f32.mrf.mxu1 }
 0x15d   : > { %v1141_v32 = vpop.f32.mrf.mxu0  ;;  %v1181_v33 = vadd.f32 %v1180_v31, %v1139_v30 }
 0x15e   : > { %v1182_v55 = vpop.f32.mrf.mxu1 }
 0x15f   : > { %v1183_v61 = vadd.f32 %v1182_v55, %v1141_v32  ;;  %v1143_v35 = vpop.f32.mrf.mxu0 }
 0x160   : > { %v1184_v36 = vpop.f32.mrf.mxu1 }
 0x161   : > { %v1192_v37 = vcombine.low %v1181_v33, %v1183_v61  ;;  %v1144_v38 = vpop.f32.mrf.mxu0  ;;  %1202 = sbr.rel (%p1602_p9) target bundleno = 439 (0x1b7), region = 40 }
 0x162   : > { %v1185_v39 = vpop.f32.mrf.mxu1 }
 0x163   : > { %v1196_v40 = vadd.f32 %v1192_v37, %v231_v34 }
 0x165   : > { %1198 = vst [vmem:[#allocation2 + $0x8] sm:$0xff] %v1196_v40 }
 0x166   : > { %v1205_v41 = vld [vmem:[%s2148_s2] sm:$0xf]  ;;  %v1209_v42 = vsub.s32 0, %v2003_v44  ;;  %v1213_v43 = vsub.s32 1, %v2003_v44  ;;  %v1217_v45 = vsub.s32 2, %v2003_v44  ;;  %v1221_v46 = vsub.s32 3, %v2003_v44 }
 0x167   : > { %v1203_v49 = vld [vmem:[#allocation2] sm:$0xff]  ;;  %vm1235_vm0 = vcmask 1043456  }
 0x168   : > { %v1210_v47 = vrot.slane %v1205_v41, %v1209_v42  ;;  %v1214_v48 = vrot.slane %v1205_v41, %v1213_v43  ;;  %v1218_v51 = vrot.slane %v1205_v41, %v1217_v45  ;;  %v1222_v52 = vrot.slane %v1205_v41, %v1221_v46 }
 0x16a   : > { %v1223_v54 = vcombine.low %v1210_v47, %v1214_v48  ;;  %v1224_v56 = vcombine.low %v1218_v51, %v1222_v52 }
 0x16c   : > { %v1204_v53 = vld [vmem:[#allocation2 + $0x8] sm:$0xff]  ;;  %v1227_v57 = vadd.f32 %v1223_v54, %v1203_v49 }
 0x16d   : > { %v1228_v58 = vadd.f32 %v1224_v56, %v1204_v53 }
 0x16e   : > { %v1231_v59 = vcombine.high %v1227_v57, %v1227_v57  ;;  %v1236_v60 = vsel %vm1235_vm0, %v1227_v57, 0.0 }
 0x16f   : > { %v1232_v62 = vcombine.high %v1228_v58, %v1228_v58  ;;  %v1237_v63 = vrot.slane %v1236_v60, 4  ;;  %v1250_v0 = vsel %vm1235_vm0, %v1228_v58, 0.0 }
 0x170   : > { %v1243_v44 = vsel %vm1235_vm0, %v1231_v59, 0.0  ;;  %v1251_v1 = vrot.slane %v1250_v0, 4 }
 0x171   : > { %v1238_v2 = vadd.f32 %v1237_v63, %v1236_v60  ;;  %v1244_v3 = vrot.slane %v1243_v44, 4  ;;  %v1257_v4 = vsel %vm1235_vm0, %v1232_v62, 0.0 }
 0x172   : > { %v1252_v5 = vadd.f32 %v1251_v1, %v1250_v0  ;;  %v1258_v6 = vrot.slane %v1257_v4, 4 }
 0x173   : > { %v1239_v7 = vrot.slane %v1238_v2, 2  ;;  %v1245_v8 = vadd.f32 %v1244_v3, %v1243_v44 }
 0x174   : > { %v1253_v9 = vrot.slane %v1252_v5, 2  ;;  %v1259_v10 = vadd.f32 %v1258_v6, %v1257_v4 }
 0x175   : > { %v1240_v11 = vadd.f32 %v1239_v7, %v1238_v2  ;;  %v1246_v12 = vrot.slane %v1245_v8, 2 }
 0x176   : > { %v1254_v13 = vadd.f32 %v1253_v9, %v1252_v5  ;;  %v1260_v14 = vrot.slane %v1259_v10, 2 }
 0x177   : > { %v1241_v15 = vrot.slane %v1240_v11, 1  ;;  %v1247_v16 = vadd.f32 %v1246_v12, %v1245_v8 }
 0x178   : > { %v1255_v17 = vrot.slane %v1254_v13, 1  ;;  %v1261_v18 = vadd.f32 %v1260_v14, %v1259_v10 }
 0x179   : > { %v1242_v19 = vadd.f32 %v1241_v15, %v1240_v11  ;;  %v1248_v20 = vrot.slane %v1247_v16, 1 }
 0x17a   : > { %v1256_v21 = vadd.f32 %v1255_v17, %v1254_v13  ;;  %v1262_v22 = vrot.slane %v1261_v18, 1 }
 0x17b   : > { %v1249_v23 = vadd.f32 %v1248_v20, %v1247_v16  ;;  %v1265_v24 = vmul.f32 0.25, %v1242_v19 }
 0x17c   : > { %v1263_v25 = vadd.f32 %v1262_v22, %v1261_v18  ;;  %v1267_v26 = vmul.f32 0.25, %v1256_v21 }
 0x17d   : > { %v1266_v27 = vmul.f32 0.25, %v1249_v23 }
 0x17e   : > { %v1268_v28 = vmul.f32 0.25, %v1263_v25 }
 0x17f   : > { %v1273_v29 = vcombine.low %v1265_v24, %v1266_v27 }
 0x180   : > { %v1274_v30 = vcombine.low %v1267_v26, %v1268_v28 }
 0x181   : > { %v1277_v31 = vsub.f32 %v1227_v57, %v1273_v29 }
 0x182   : > { %v1278_v32 = vsub.f32 %v1228_v58, %v1274_v30 }
 0x183   : > { %v1279_v55 = vmul.f32 %v1277_v31, %v1277_v31 }
 0x184   : > { %v1280_v33 = vmul.f32 %v1278_v32, %v1278_v32 }
 0x185   : > { %v1283_v61 = vcombine.high %v1279_v55, %v1279_v55  ;;  %v1287_v34 = vsel %vm1235_vm0, %v1279_v55, 0.0 }
 0x186   : > { %v1284_v35 = vcombine.high %v1280_v33, %v1280_v33  ;;  %v1288_v36 = vrot.slane %v1287_v34, 4  ;;  %v1301_v37 = vsel %vm1235_vm0, %v1280_v33, 0.0 }
 0x187   : > { %v1294_v38 = vsel %vm1235_vm0, %v1283_v61, 0.0  ;;  %v1302_v39 = vrot.slane %v1301_v37, 4 }
 0x188   : > { %v1289_v40 = vadd.f32 %v1288_v36, %v1287_v34  ;;  %v1295_v41 = vrot.slane %v1294_v38, 4  ;;  %v1308_v42 = vsel %vm1235_vm0, %v1284_v35, 0.0 }
 0x189   : > { %v1303_v43 = vadd.f32 %v1302_v39, %v1301_v37  ;;  %v1309_v45 = vrot.slane %v1308_v42, 4 }
 0x18a   : > { %v1290_v46 = vrot.slane %v1289_v40, 2  ;;  %v1296_v47 = vadd.f32 %v1295_v41, %v1294_v38 }
 0x18b   : > { %v1304_v48 = vrot.slane %v1303_v43, 2  ;;  %v1310_v49 = vadd.f32 %v1309_v45, %v1308_v42 }
 0x18c   : > { %v1291_v51 = vadd.f32 %v1290_v46, %v1289_v40  ;;  %v1297_v52 = vrot.slane %v1296_v47, 2 }
 0x18d   : > { %v1305_v53 = vadd.f32 %v1304_v48, %v1303_v43  ;;  %v1311_v54 = vrot.slane %v1310_v49, 2 }
 0x18e   : > { %v1292_v56 = vrot.slane %v1291_v51, 1  ;;  %v1298_v57 = vadd.f32 %v1297_v52, %v1296_v47 }
 0x18f   : > { %v1306_v58 = vrot.slane %v1305_v53, 1  ;;  %v1312_v59 = vadd.f32 %v1311_v54, %v1310_v49 }
 0x190   : > { %v1293_v60 = vadd.f32 %v1292_v56, %v1291_v51  ;;  %v1299_v62 = vrot.slane %v1298_v57, 1 }
 0x191   : > { %v1307_v63 = vadd.f32 %v1306_v58, %v1305_v53  ;;  %v1313_v0 = vrot.slane %v1312_v59, 1 }
 0x192   : > { %v1300_v44 = vadd.f32 %v1299_v62, %v1298_v57  ;;  %v1315_v1 = vmul.f32 0.25, %v1293_v60 }
 0x193   : > { %v1314_v2 = vadd.f32 %v1313_v0, %v1312_v59  ;;  %v1317_v3 = vmul.f32 0.25, %v1307_v63 }
 0x194   : > { %v1316_v4 = vmul.f32 0.25, %v1300_v44  ;;  %v1319_v5 = vadd.f32 1e-05, %v1315_v1 }
 0x195   : > { %v1318_v6 = vmul.f32 0.25, %v1314_v2  ;;  %v1321_v7 = vadd.f32 1e-05, %v1317_v3 }
 0x196   : > { %v1320_v8 = vadd.f32 1e-05, %v1316_v4  ;;  %1844 = vrsqrt.f32 %v1319_v5 }
 0x197   : > { %v1322_v9 = vadd.f32 1e-05, %v1318_v6  ;;  %1846 = vrsqrt.f32 %v1321_v7 }
 0x198   : > { %1848 = vrsqrt.f32 %v1320_v8 }
 0x199   : > { %1850 = vrsqrt.f32 %v1322_v9 }
 0x1a3   : > { %v1845_v10 = vpop.eup %1844 }
 0x1a4   : > { %v1847_v11 = vpop.eup %1846 }
 0x1a5   : > { %v1849_v12 = vpop.eup %1848 }
 0x1a6   : > { %v1851_v13 = vpop.eup %1850  ;;  %v1331_v14 = vcombine.low %v1845_v10, %v1849_v12 }
 0x1a7   : > { %v1332_v15 = vcombine.low %v1847_v11, %v1851_v13 }
 0x1a8   : > { %v1335_v16 = vmul.f32 %v1331_v14, %v1277_v31 }
 0x1a9   : > { %v1336_v17 = vmul.f32 %v1332_v15, %v1278_v32 }
 0x1aa   : > { %vm1337_vm1 = vcmp.ge.f32.partialorder %v1335_v16, 0.0  ;;  %v1339_v18 = vmul.f32 0.2, %v1335_v16 }
 0x1ab   : > { %vm1338_vm2 = vcmp.ge.f32.partialorder %v1336_v17, 0.0  ;;  %v1340_v19 = vmul.f32 0.2, %v1336_v17 }
 0x1ac   : > { %v1341_v20 = vsel %vm1337_vm1, %v1335_v16, %v1339_v18 }
 0x1ad   : > { %v1342_v21 = vsel %vm1338_vm2, %v1336_v17, %v1340_v19  ;;  %v1345_v22 = vcombine.high %v1341_v20, %v1341_v20 }
 0x1ae   : > { %v1346_v23 = vcombine.high %v1342_v21, %v1342_v21 }
 0x1af   : > { %v1603_v24 = vpack.c.bf16 %v1345_v22, %v1341_v20 }
 0x1b0   : > { %v1604_v25 = vpack.c.bf16 %v1346_v23, %v1342_v21 }
 0x1b1   : > { %v1365_v26 = vrot.slane %v1603_v24, %v2011_v50 }
 0x1b2   : > { %v1372_v27 = vrot.slane %v1604_v25, %v2011_v50 }
 0x1b4   : > { %v1373_v28 = vcombine.low %v1365_v26, %v1372_v27 }
 0x1b6   : > { %1375 = vst [vmem:[%s1951_s27] sm:$0xff] %v1373_v28 }
 0x1b7 PF: > { %s13_s16 = sadd.s32 1, %s1890_s16   ;;  %s2150_s12 = smov %s1882_s14 }
 0x1b8   : > { %p10_p10 = scmp.ge.s32.totalorder %s13_s16, 18   ;;  %s2151_s13 = smov %s1886_s15 }
 0x1b9   : > { %s2152_s14 = smov %s2155_s17  ;;  %s2153_s15 = smov %s2159_s18 }
 0x1ba   :  { %12 = sbr.rel (!%p10_p10) target bundleno = 3 (0x3), region = 73 }

// kernel: discriminator_forward.9
= control target key start
LH: loop header
LB: loop body
LE: loop exit
PB: predicated region body
PF: predicated region fallthrough
CT: control target
= control target key end

     0   :  { %s951_s12 = smov 0   ;;  %s953_s13 = smov 0   ;;  %s1034_s0 = inlined_call_operand.vmem [shape: bf16[8,8192], index: 0, kind: input, shape index: {}]   ;;  %s1035_s1 = inlined_call_operand.vmem [shape: bf16[8192,128], index: 1, kind: input, shape index: {}]   ;;  %s1036_s2 = inlined_call_operand.vmem [shape: f32[1,128], index: 2, kind: input, shape index: {}]   ;;  %s1037_s3 = inlined_call_operand.vmem [shape: f32[8,128], index: 3, kind: output, shape index: {}]  }
   0x1   :  { %s955_s14 = smov 0  }
   0x2 LB: > { %s25_s15 = sadd.s32 1, %s924_s13  ;;  %p749_p0 = scmp.ge.s32.totalorder %s928_s14, 1  ;;  %s928_s14 = sphi %s955_s14, %s13_s14   ;;  %s924_s13 = sphi %s953_s13, %s1039_s13   ;;  %s920_s12 = sphi %s951_s12, %s1038_s12  }
   0x3   : > { %p26_p1 = scmp.ge.s32.totalorder %s25_s15, 16  ;;  %p189_p2 = scmp.lt.s32.totalorder %s928_s14, 17 }
   0x5   : > { %s1041_s15 = smov (%p26_p1, %s25_s15), 0  ;;  %p190_p3 = pnand %p749_p0, %p189_p2 }
   0x6   : > { %s750_s16 = sshll.u32 (!%p190_p3), %s920_s12, 2  ;;  %s752_s17 = sshll.u32 (!%p190_p3), %s920_s12, 6 }
   0x7   : > { %193 = sbr.rel (%p190_p3) target bundleno = 301 (0x12d), region = 32  ;;  %p233_p4 = scmp.lt.s32.totalorder (!%p190_p3), %s750_s16, 63 }
   0x8   : > { %p241_p5 = scmp.lt.s32.totalorder (!%p190_p3), %s752_s17, 1023  ;;  %p754_p6 = scmp.ne.s32.totalorder (!%p190_p3), %s920_s12, 0 }
   0xc   : > { %s1043_s16 = smov (!%p233_p4, %s750_s16), 63  ;;  %s1045_s17 = smov (!%p241_p5, %s752_s17), 1023 }
   0xd   : > { %s751_s18 = sshll.u32 %s1043_s16, 2  ;;  %s753_s22 = sshll.u32 %s1045_s17, 2 }
   0xe   : > { %s976_s21 = scalar_lea.vmem %s1034_s0, %s751_s18  ;;  %s981_s25 = scalar_lea.vmem %s1035_s1, %s753_s22 }
   0xf   : > { %263 = sbr.rel (%p754_p6) target bundleno = 22 (0x16), region = 36 }
  0x14   : > { %v930_v0 = vmov 0.0  }
  0x15   : > { %264 = vst [vmem:[#allocation2] sm:$0xff] %v930_v0 }
  0x16 PF: > { %v866_v1 = vld [vmem:[%s981_s25 + $0x78] sm:$0xff]   ;;  %v870_v5 = vld [vmem:[%s981_s25 + $0x70] sm:$0xff]   ;;  %v874_v9 = vld [vmem:[%s981_s25 + $0x68] sm:$0xff]   ;;  %p791_p7 = scmp.ne.s32.totalorder %s920_s12, 15 }
  0x17   : > { %v867_v2 = vld [vmem:[%s981_s25 + $0xf8] sm:$0xff]   ;;  %797 = vmatprep.subr.bf16.mxu0 %v866_v1  ;;  %v871_v6 = vld [vmem:[%s981_s25 + $0xf0] sm:$0xff]   ;;  %v875_v10 = vld [vmem:[%s981_s25 + $0xe8] sm:$0xff]  }
  0x18   : > { %v868_v3 = vld [vmem:[%s981_s25 + $0x38] sm:$0xff]   ;;  %819 = vmatprep.subr.bf16.mxu1 %v867_v2  ;;  %v872_v7 = vld [vmem:[%s981_s25 + $0x30] sm:$0xff]   ;;  %v876_v11 = vld [vmem:[%s981_s25 + $0x28] sm:$0xff]  }
  0x19   : > { %v869_v4 = vld [vmem:[%s981_s25 + $0xb8] sm:$0xff]   ;;  %798 = vmatpush3.bf16.msra.mxu0 %v868_v3  ;;  %v873_v8 = vld [vmem:[%s981_s25 + $0xb0] sm:$0xff]   ;;  %v877_v12 = vld [vmem:[%s981_s25 + $0xa8] sm:$0xff]  }
  0x1a   : > { %820 = vmatpush3.bf16.msra.mxu1 %v869_v4  ;;  %799 = vmatprep.subr.bf16.mxu0 %v870_v5  ;;  %v878_v13 = vld [vmem:[%s981_s25 + $0x60] sm:$0xff]   ;;  %v882_v17 = vld [vmem:[%s981_s25 + $0x58] sm:$0xff]   ;;  %v886_v21 = vld [vmem:[%s981_s25 + $0x50] sm:$0xff]  }
  0x1b   : > { %821 = vmatprep.subr.bf16.mxu1 %v871_v6  ;;  %v879_v14 = vld [vmem:[%s981_s25 + $0xe0] sm:$0xff]   ;;  %v883_v18 = vld [vmem:[%s981_s25 + $0xd8] sm:$0xff]   ;;  %v887_v22 = vld [vmem:[%s981_s25 + $0xd0] sm:$0xff]  }
  0x1c   : > { %v880_v15 = vld [vmem:[%s981_s25 + $0x20] sm:$0xff]   ;;  %v884_v19 = vld [vmem:[%s981_s25 + $0x18] sm:$0xff]   ;;  %v888_v23 = vld [vmem:[%s981_s25 + $0x10] sm:$0xff]  }
  0x1d   : > { %800 = vmatpush3.bf16.msra.mxu0 %v872_v7  ;;  %v881_v16 = vld [vmem:[%s981_s25 + $0xa0] sm:$0xff]   ;;  %v885_v20 = vld [vmem:[%s981_s25 + $0x98] sm:$0xff]   ;;  %v889_v24 = vld [vmem:[%s981_s25 + $0x90] sm:$0xff]  }
  0x1e   : > { %822 = vmatpush3.bf16.msra.mxu1 %v873_v8  ;;  %801 = vmatprep.subr.bf16.mxu0 %v874_v9  ;;  %v890_v25 = vld [vmem:[%s981_s25 + $0x48] sm:$0xff]   ;;  %v894_v29 = vld [vmem:[%s981_s25 + $0x40] sm:$0xff]  }
  0x1f   : > { %823 = vmatprep.subr.bf16.mxu1 %v875_v10  ;;  %v891_v26 = vld [vmem:[%s981_s25 + $0xc8] sm:$0xff]   ;;  %v895_v30 = vld [vmem:[%s981_s25 + $0xc0] sm:$0xff]  }
  0x20   : > { %v892_v27 = vld [vmem:[%s981_s25 + $0x8] sm:$0xff]   ;;  %v896_v31 = vld [vmem:[%s981_s25] sm:$0xff]  }
  0x21   : > { %802 = vmatpush3.bf16.msra.mxu0 %v876_v11  ;;  %v893_v28 = vld [vmem:[%s981_s25 + $0x88] sm:$0xff]   ;;  %v897_v32 = vld [vmem:[%s981_s25 + $0x80] sm:$0xff]  }
  0x22   : > { %824 = vmatpush3.bf16.msra.mxu1 %v877_v12  ;;  %803 = vmatprep.subr.bf16.mxu0 %v878_v13  ;;  %v266_v33 = vld [vmem:[%s976_s21] sm:$0xff]  ;;  %v267_v34 = vld [vmem:[%s976_s21 + $0x8] sm:$0xff] }
  0x23   : > { %825 = vmatprep.subr.bf16.mxu1 %v879_v14  ;;  %v755_v35 = vcombine.low %v266_v33, %v266_v33  ;;  %v756_v36 = vcombine.high %v266_v33, %v266_v33  ;;  %v757_v37 = vcombine.low %v267_v34, %v267_v34  ;;  %v758_v38 = vcombine.high %v267_v34, %v267_v34  ;;  %v265_v45 = vld [vmem:[#allocation2] sm:$0xff] }
  0x25   : > { %804 = vmatpush3.bf16.msra.mxu0 %v880_v15  ;;  %570 = vmatprep.mubr.bf16.mxu0 %v756_v36 }
  0x26   : > { %826 = vmatpush3.bf16.msra.mxu1 %v881_v16  ;;  %805 = vmatprep.subr.bf16.mxu0 %v882_v17 }
  0x27   : > { %827 = vmatprep.subr.bf16.mxu1 %v883_v18  ;;  %610 = vmatprep.mubr.bf16.mxu1 %v758_v38 }
  0x29   : > { %806 = vmatpush3.bf16.msra.mxu0 %v884_v19 }
  0x2a   : > { %828 = vmatpush3.bf16.msra.mxu1 %v885_v20  ;;  %807 = vmatprep.subr.bf16.mxu0 %v886_v21 }
  0x2b   : > { %829 = vmatprep.subr.bf16.mxu1 %v887_v22 }
  0x2d   : > { %808 = vmatpush3.bf16.msra.mxu0 %v888_v23 }
  0x2e   : > { %830 = vmatpush3.bf16.msra.mxu1 %v889_v24  ;;  %809 = vmatprep.subr.bf16.mxu0 %v890_v25 }
  0x2f   : > { %831 = vmatprep.subr.bf16.mxu1 %v891_v26 }
  0x31   : > { %810 = vmatpush3.bf16.msra.mxu0 %v892_v27 }
  0x32   : > { %832 = vmatpush3.bf16.msra.mxu1 %v893_v28  ;;  %811 = vmatprep.subr.bf16.mxu0 %v894_v29 }
  0x33   : > { %833 = vmatprep.subr.bf16.mxu1 %v895_v30 }
  0x35   : > { %812 = vmatpush3.bf16.msra.mxu0 %v896_v31 }
  0x36   : > { %834 = vmatpush3.bf16.msra.mxu1 %v897_v32 }
  0x38   : > { %571 = vmatmul.mubr.bf16.vlgmr.msra.gmra.mxu0 %v755_v35 }
  0x39   : > { %611 = vmatmul.mubr.bf16.vlgmr.msra.gmra.mxu1 %v757_v37 }
  0xf8   : > { %v813_v39 = vpop.f32.mrf.mxu0 }
  0xf9   : > { %v835_v40 = vpop.f32.mrf.mxu1 }
  0xfa   : > { %v814_v41 = vpop.f32.mrf.mxu0 }
  0xfb   : > { %v836_v42 = vpop.f32.mrf.mxu1  ;;  %v815_v43 = vadd.f32 %v814_v41, %v813_v39 }
  0xfc   : > { %v837_v44 = vadd.f32 %v836_v42, %v835_v40  ;;  %v816_v46 = vpop.f32.mrf.mxu0 }
  0xfd   : > { %v838_v47 = vpop.f32.mrf.mxu1 }
  0xfe   : > { %v613_v48 = vadd.f32 %v837_v44, %v815_v43  ;;  %v817_v49 = vpop.f32.mrf.mxu0  ;;  %623 = sbr.rel (%p791_p7) target bundleno = 301 (0x12d), region = 40 }
  0xff   : > { %v839_v50 = vpop.f32.mrf.mxu1 }
 0x100   : > { %v618_v51 = vadd.f32 %v613_v48, %v265_v45 }
 0x102   : > { %619 = vst [vmem:[#allocation2] sm:$0xff] %v618_v51 }
 0x103   : > { %v792_v53 = vld [vmem:[%s1036_s2] ss:$0 sm:$0xff] }
 0x109   : > { %v624_v52 = vld [vmem:[#allocation2] sm:$0xff] }
 0x10a   : > { %v632_v54 = vadd.f32 %v792_v53, %v624_v52 }
 0x10c   : > { %v793_v55 = vmul.f32 -1.442695, %v632_v54 }
 0x10e   : > { %902 = vpow2.f32 %v793_v55 }
 0x11b   : > { %v903_v56 = vpop.eup %902 }
 0x11c   : > { %v636_v57 = vadd.f32 1.0, %v903_v56 }
 0x11e   : > { %904 = vrcp.f32 %v636_v57 }
 0x12b   : > { %v905_v58 = vpop.eup %904 }
 0x12c   : > { %639 = vst [vmem:[%s1037_s3] sm:$0xff] %v905_v58 }
 0x12d PF: > { %s13_s14 = sadd.s32 1, %s928_s14   ;;  %s1038_s12 = smov %s924_s13 }
 0x12e   : > { %p10_p8 = scmp.ge.s32.totalorder %s13_s14, 18   ;;  %s1039_s13 = smov %s1041_s15 }
 0x130   :  { %12 = sbr.rel (!%p10_p8) target bundleno = 2 (0x2), region = 76 }

</bundles_post_ra>
